<compile_context>
chip_gen: v6e
topology: v6e:2x2x1
jax: 0.10.0
libtpu: 0.0.40
codegen_flags: <defaults>
</compile_context>

<pallas_src>
import jax
import jax.numpy as jnp
from jax import lax
from jax.experimental import pallas as pl
from jax.experimental.pallas import tpu as pltpu


def _doc_attn_kernel(x_ref, w_ref, wih_ref, whh_ref, b_ref,
                     attn_fT_ref, attn_bT_ref, lw_pack_ref, hsum_ref, lb_ref,
                     probs_ref, aT_ref,
                     xw_all, hf_all, hb_all):
    # x_ref:       (L, B, 2S)  time-major; row (t,d) = [x_d(t) | x_d(L-1-t)], x_d = w_d.T
    # w_ref:       (S, B, E)   time-major; row (s,d) = w_d[s, :]
    # wih_ref:     (2S, 8H)    gate-interleaved input weights (both directions)
    # whh_ref:     (2H, 8H)    gate-interleaved recurrent weights
    # b_ref:       (1, 8H)     combined biases
    # attn_fT_ref: (H, nh)     attention[:, :H].T
    # attn_bT_ref: (H, nh)     attention[:, H:].T
    # lw_pack_ref: (E, C*nh)   lw_pack[e, c*nh + h] = linear_w[c, h*E + e]
    # hsum_ref:    (C*nh, C)   head-sum selector (sums the nh lanes of each class)
    # lb_ref:      (1, C)      linear bias
    # probs_ref:   (B, C)      per-doc class probabilities
    # aT_ref:      (L, B, nh)  attention weights, time-major (== torch a.T per doc)
    L, B, twoS = x_ref.shape
    S = twoS // 2
    H2 = whh_ref.shape[0]            # 2H
    H = H2 // 2
    nh = attn_fT_ref.shape[1]
    C = lb_ref.shape[1]
    Cnh = lw_pack_ref.shape[1]
    E = w_ref.shape[2]

    # 1) Input projections for all timesteps, both directions, all docs: ONE matmul.
    x_flat = x_ref[...].reshape(L * B, twoS)
    xw_all[...] = jnp.dot(x_flat, wih_ref[...],
                          preferred_element_type=jnp.float32) + b_ref[...]

    whh = whh_ref[...]               # loop-invariant recurrent weight, hoisted

    # 2) Fused bidirectional recurrence, batched over B docs.
    #    Step k advances forward time k and backward time L-1-k for all docs with a
    #    single (B,2H)x(2H,8H) matmul; the (B,8H) gate block is exactly one f32 vreg.
    def step(k, carry):
        h, c = carry                                           # (B, 2H) each
        row = pl.multiple_of(k * B, B)
        gates = xw_all[pl.ds(row, B), :] + jnp.dot(
            h, whh, preferred_element_type=jnp.float32)        # (B, 8H)
        sig = jax.nn.sigmoid(gates)                            # full-width EUP
        th = jnp.tanh(gates)                                   # full-width EUP
        i_g = sig[:, 0 * H2:1 * H2]                            # [i_f | i_b]
        f_g = sig[:, 1 * H2:2 * H2]                            # [f_f | f_b]
        g_g = th[:, 2 * H2:3 * H2]                             # [g_f | g_b]
        o_g = sig[:, 3 * H2:4 * H2]                            # [o_f | o_b]
        c_new = f_g * c + i_g * g_g
        h_new = o_g * jnp.tanh(c_new)
        hf_all[pl.ds(row, B), :] = h_new[:, 0:H]               # fwd hidden at time k
        rrow = pl.multiple_of((L - 1 - k) * B, B)
        hb_all[pl.ds(rrow, B), :] = h_new[:, H:H2]             # bwd hidden at time L-1-k
        return h_new, c_new

    h0 = jnp.zeros((B, H2), jnp.float32)
    c0 = jnp.zeros((B, H2), jnp.float32)
    unroll = 4 if L % 4 == 0 else (2 if L % 2 == 0 else 1)

    def unrolled_body(j, carry):
        base = j * unroll
        for u in range(unroll):                                # manual unroll (LLO visibility)
            carry = step(base + u, carry)
        return carry

    lax.fori_loop(0, L // unroll, unrolled_body, (h0, c0))

    # 3) Attention scores for every (timestep, doc): flat matmuls, no transposes.
    rT_flat = (jnp.dot(hf_all[...], attn_fT_ref[...], preferred_element_type=jnp.float32)
               + jnp.dot(hb_all[...], attn_bT_ref[...], preferred_element_type=jnp.float32))
    rT3 = rT_flat.reshape(L, B, nh)
    rT3 = rT3 - jnp.max(rT3, axis=0, keepdims=True)            # softmax over time
    er = jnp.exp(rT3)
    aT3 = er / jnp.sum(er, axis=0, keepdims=True)              # exact divide (off critical path)
    aT_ref[...] = aT3

    # 4) reweighted = a @ w folded with the final linear (no per-head tiny matmuls):
    #    logits[d,c] = lb[c] + sum_s sum_h a[d,h,s] * (w_d[s,:] . lw[c, h*E:(h+1)*E])
    kw = jnp.dot(w_ref[...].reshape(S * B, E), lw_pack_ref[...],
                 preferred_element_type=jnp.float32)           # (S*B, C*nh)
    a_flat = aT3.reshape(L * B, nh)
    a_rep = jnp.concatenate([a_flat] * C, axis=-1)             # (S*B, C*nh), lanes = (c, h)
    g_sum = jnp.sum((kw * a_rep).reshape(S, B, Cnh), axis=0)   # (B, C*nh): reduce over time
    logits = jnp.dot(g_sum, hsum_ref[...],
                     preferred_element_type=jnp.float32) + lb_ref[...]   # (B, C): reduce over heads
    logits = logits - jnp.max(logits, axis=1, keepdims=True)
    el = jnp.exp(logits)
    probs_ref[...] = el / jnp.sum(el, axis=1, keepdims=True)   # exact divide


def prepare_params(params):
    """Host-side weight packing.  Call ONCE and reuse (hoisted out of the forward)."""
    H = params["whh_f"].shape[1]
    E = params["wih_f"].shape[1]
    nh = params["attention"].shape[0]
    C = params["lb"].shape[0]

    def gate_interleave(m_f_T, m_b_T):
        # m_*_T: (R, 4H) torch gate order [i|f|g|o] along columns.
        # Output: (R_f + R_b, 8H) with columns [i_f,i_b | f_f,f_b | g_f,g_b | o_f,o_b],
        # forward weights in top rows, backward in bottom rows (direction block-diagonal).
        r_f = m_f_T.shape[0]
        out = jnp.zeros((r_f + m_b_T.shape[0], 8 * H), jnp.float32)
        for g in range(4):
            out = out.at[:r_f, g * 2 * H:g * 2 * H + H].set(m_f_T[:, g * H:(g + 1) * H])
            out = out.at[r_f:, g * 2 * H + H:(g + 1) * 2 * H].set(m_b_T[:, g * H:(g + 1) * H])
        return out

    wih_comb = gate_interleave(params["wih_f"].T, params["wih_b"].T)   # (2E, 8H)
    whh_comb = gate_interleave(params["whh_f"].T, params["whh_b"].T)   # (2H, 8H)

    b_f = (params["bih_f"] + params["bhh_f"]).reshape(1, 4 * H)
    b_b = (params["bih_b"] + params["bhh_b"]).reshape(1, 4 * H)
    b_comb = gate_interleave(b_f, b_b).sum(axis=0, keepdims=True)      # (1, 8H)

    attn = params["attention"].astype(jnp.float32)
    attn_fT = attn[:, :H].T                                            # (H, nh)
    attn_bT = attn[:, H:].T                                            # (H, nh)

    # Final linear folded for the in-kernel formulation:
    #   lw_pack[e, c*nh + h] = lw[c, h*E + e];  hsum sums the nh lanes of each class.
    lw3 = params["lw"].reshape(C, nh, E).astype(jnp.float32)
    lw_pack = jnp.transpose(lw3, (2, 0, 1)).reshape(E, C * nh)         # (E, C*nh)
    hsum = (jnp.arange(C * nh)[:, None] // nh
            == jnp.arange(C)[None, :]).astype(jnp.float32)             # (C*nh, C)
    lb_row = params["lb"].reshape(1, C).astype(jnp.float32)            # (1, C)

    return {"wih": wih_comb, "whh": whh_comb, "b": b_comb,
            "attn_fT": attn_fT, "attn_bT": attn_bT,
            "lw_pack": lw_pack, "hsum": hsum, "lb": lb_row}


def document_attention_forward_batch(w_batch, packed, *, doc_tile=8):
    """w_batch: (B, S, 1, E) float32.  Returns (probs (B, C), a.T (B, E, nh))."""
    w_sq = jnp.squeeze(w_batch, axis=2).astype(jnp.float32)    # torch: w.squeeze(1), per doc
    B, S, E = w_sq.shape
    assert S == E, "reference module requires seq_len == embedding_size"
    H = packed["attn_fT"].shape[0]
    nh = packed["attn_fT"].shape[1]
    C = packed["lb"].shape[1]
    L = E
    Bt = doc_tile
    G = pl.cdiv(B, Bt)
    Bp = G * Bt
    if Bp != B:                                                # pad with zero docs
        w_sq = jnp.concatenate([w_sq, jnp.zeros((Bp - B, S, E), jnp.float32)], axis=0)

    # Host-side layout plumbing (plain XLA, negligible):
    x = jnp.transpose(w_sq, (0, 2, 1))                         # (Bp, L, S): per-doc w.T
    x_comb = jnp.concatenate([x, x[:, ::-1, :]], axis=2)       # (Bp, L, 2S): fwd | reversed
    x_g = x_comb.reshape(G, Bt, L, 2 * S).transpose(0, 2, 1, 3)  # (G, L, Bt, 2S) time-major
    w_g = w_sq.reshape(G, Bt, S, E).transpose(0, 2, 1, 3)        # (G, S, Bt, E)  time-major

    probs_g, aT_g = pl.pallas_call(
        _doc_attn_kernel,
        grid=(G,),
        out_shape=(jax.ShapeDtypeStruct((G, Bt, C), jnp.float32),
                   jax.ShapeDtypeStruct((G, L, Bt, nh), jnp.float32)),
        in_specs=[
            pl.BlockSpec((None, L, Bt, 2 * S), lambda g: (g, 0, 0, 0)),   # per-group inputs
            pl.BlockSpec((None, S, Bt, E), lambda g: (g, 0, 0, 0)),       # per-group w
            pl.BlockSpec((2 * E, 8 * H), lambda g: (0, 0)),               # wih_comb
            pl.BlockSpec((2 * H, 8 * H), lambda g: (0, 0)),               # whh_comb
            pl.BlockSpec((1, 8 * H), lambda g: (0, 0)),                   # b_comb
            pl.BlockSpec((H, nh), lambda g: (0, 0)),                      # attn_fT
            pl.BlockSpec((H, nh), lambda g: (0, 0)),                      # attn_bT
            pl.BlockSpec((E, C * nh), lambda g: (0, 0)),                  # lw_pack
            pl.BlockSpec((C * nh, C), lambda g: (0, 0)),                  # hsum
            pl.BlockSpec((1, C), lambda g: (0, 0)),                       # lb
        ],
        out_specs=(
            pl.BlockSpec((None, Bt, C), lambda g: (g, 0, 0)),
            pl.BlockSpec((None, L, Bt, nh), lambda g: (g, 0, 0, 0)),
        ),
        scratch_shapes=[
            pltpu.VMEM((L * Bt, 8 * H), jnp.float32),   # fused input projections
            pltpu.VMEM((L * Bt, H), jnp.float32),       # forward hidden states (time-major)
            pltpu.VMEM((L * Bt, H), jnp.float32),       # backward hidden states (time-correct)
        ],
        compiler_params=pltpu.CompilerParams(
            dimension_semantics=("parallel",)),          # >=2 steps -> both TCs on v7x
    )(x_g, w_g, packed["wih"], packed["whh"], packed["b"],
      packed["attn_fT"], packed["attn_bT"], packed["lw_pack"], packed["hsum"], packed["lb"])

    probs = probs_g.reshape(Bp, C)[:B]
    aT = jnp.transpose(aT_g, (0, 2, 1, 3)).reshape(Bp, L, nh)[:B]
    return probs, aT


def document_attention_forward(w, packed):
    """w: (S, 1, E) float32 — the torch module's input.  Returns (probs, a.T)."""
    probs, aT = document_attention_forward_batch(w[None], packed)
    return probs[0], aT[0]


def init_params(key, embedding_size, hidden_dim, num_heads, n_classes):
    E, H = embedding_size, hidden_dim
    ks = jax.random.split(key, 11)
    k_lstm = 1.0 / float(H) ** 0.5
    k_lin = 1.0 / float(num_heads * E) ** 0.5

    def u(k, shape, bound):
        return jax.random.uniform(k, shape, jnp.float32, -bound, bound)

    return {
        "wih_f": u(ks[0], (4 * H, E), k_lstm),
        "whh_f": u(ks[1], (4 * H, H), k_lstm),
        "bih_f": u(ks[2], (4 * H,), k_lstm),
        "bhh_f": u(ks[3], (4 * H,), k_lstm),
        "wih_b": u(ks[4], (4 * H, E), k_lstm),
        "whh_b": u(ks[5], (4 * H, H), k_lstm),
        "bih_b": u(ks[6], (4 * H,), k_lstm),
        "bhh_b": u(ks[7], (4 * H,), k_lstm),
        # torch.rand → uniform [0, 1)
        "attention": jax.random.uniform(ks[8], (num_heads, 2 * H), jnp.float32),
        "lw": u(ks[9], (n_classes, num_heads * E), k_lin),
        "lb": u(ks[10], (n_classes,), k_lin),
        # TODO(synk): embeddings_fname / nn.Embedding state-dict load has no in-script
        # equivalent; the forward shown never uses an Embedding, so nothing is lost.
    }


if __name__ == "__main__":
    E = 32          # embedding_size (== seq_len, required by the reference forward)
    H = 16          # hidden_dim
    NUM_HEADS = 4
    N_CLASSES = 8
    S = E
    B = 16          # batch of documents: 2 groups of 8 -> 2 "parallel" grid steps

    key = jax.random.PRNGKey(0)
    k_w, k_p = jax.random.split(key)
    params = init_params(k_p, E, H, NUM_HEADS, N_CLASSES)
    packed = prepare_params(params)          # pack weights once (hoisted out of forward)
    w_batch = jax.random.normal(k_w, (B, S, 1, E), jnp.float32)

    probs, a_t = document_attention_forward_batch(w_batch, packed)
    probs, a_t = jax.block_until_ready((probs, a_t))

    assert probs.shape == (B, N_CLASSES)
    assert a_t.shape == (B, E, NUM_HEADS)
    assert bool(jnp.all(jnp.isfinite(probs))) and bool(jnp.all(jnp.isfinite(a_t)))
    # softmax outputs must sum to 1 (per document / per head)
    assert bool(jnp.allclose(jnp.sum(probs, axis=-1), jnp.ones((B,)), atol=1e-3))
    assert bool(jnp.allclose(jnp.sum(a_t, axis=1),
                             jnp.ones((B, NUM_HEADS)), atol=1e-3))

    # single-document API (exactly the torch module's forward signature)
    p0, a0 = document_attention_forward(w_batch[0], packed)
    p0, a0 = jax.block_until_ready((p0, a0))
    assert p0.shape == (N_CLASSES,) and a0.shape == (E, NUM_HEADS)
    assert bool(jnp.allclose(p0, probs[0], atol=1e-5, rtol=1e-5))
    assert bool(jnp.allclose(a0, a_t[0], atol=1e-5, rtol=1e-5))

    print("KERNEL_OK")
</pallas_src>

<mosaic_0001>
module attributes {stable_mosaic.version = 11 : i64} {
  func.func @_doc_attn_kernel(%arg0: i32, %arg1: memref<1x32x8x64xf32, #tpu.memory_space<vmem>>, %arg2: memref<1x32x8x32xf32, #tpu.memory_space<vmem>>, %arg3: memref<64x128xf32, #tpu.memory_space<vmem>>, %arg4: memref<32x128xf32, #tpu.memory_space<vmem>>, %arg5: memref<1x128xf32, #tpu.memory_space<vmem>>, %arg6: memref<16x4xf32, #tpu.memory_space<vmem>>, %arg7: memref<16x4xf32, #tpu.memory_space<vmem>>, %arg8: memref<32x32xf32, #tpu.memory_space<vmem>>, %arg9: memref<32x8xf32, #tpu.memory_space<vmem>>, %arg10: memref<1x8xf32, #tpu.memory_space<vmem>>, %arg11: memref<1x8x8xf32, #tpu.memory_space<vmem>>, %arg12: memref<1x32x8x4xf32, #tpu.memory_space<vmem>>, %arg13: memref<256x128xf32, #tpu.memory_space<vmem>>, %arg14: memref<256x16xf32, #tpu.memory_space<vmem>>, %arg15: memref<256x16xf32, #tpu.memory_space<vmem>>) attributes {dimension_semantics = [#tpu.dimension_semantics<parallel>], iteration_bounds = array<i64: 2>, scalar_prefetch = 0 : i64, scratch_operands = 3 : i64, tpu.core_type = #tpu.core_type<tc>, window_params = [{transform_indices = @transform_0, window_bounds = array<i64: 1, 32, 8, 64>}, {transform_indices = @transform_1, window_bounds = array<i64: 1, 32, 8, 32>}, {pipeline_mode = #tpu.pipeline_mode<synchronous>, transform_indices = @transform_2, window_bounds = array<i64: 64, 128>}, {pipeline_mode = #tpu.pipeline_mode<synchronous>, transform_indices = @transform_3, window_bounds = array<i64: 32, 128>}, {pipeline_mode = #tpu.pipeline_mode<synchronous>, transform_indices = @transform_4, window_bounds = array<i64: 1, 128>}, {pipeline_mode = #tpu.pipeline_mode<synchronous>, transform_indices = @transform_5, window_bounds = array<i64: 16, 4>}, {pipeline_mode = #tpu.pipeline_mode<synchronous>, transform_indices = @transform_6, window_bounds = array<i64: 16, 4>}, {pipeline_mode = #tpu.pipeline_mode<synchronous>, transform_indices = @transform_7, window_bounds = array<i64: 32, 32>}, {pipeline_mode = #tpu.pipeline_mode<synchronous>, transform_indices = @transform_8, window_bounds = array<i64: 32, 8>}, {pipeline_mode = #tpu.pipeline_mode<synchronous>, transform_indices = @transform_9, window_bounds = array<i64: 1, 8>}, {transform_indices = @transform_10, window_bounds = array<i64: 1, 8, 8>}, {transform_indices = @transform_11, window_bounds = array<i64: 1, 32, 8, 4>}]} {
    %c0 = arith.constant 0 : index
    %c0_0 = arith.constant 0 : index
    %c0_1 = arith.constant 0 : index
    %c0_2 = arith.constant 0 : index
    %0 = vector.load %arg1[%c0, %c0_0, %c0_1, %c0_2] : memref<1x32x8x64xf32, #tpu.memory_space<vmem>>, vector<1x32x8x64xf32>
    %1 = vector.shape_cast %0 : vector<1x32x8x64xf32> to vector<32x8x64xf32>
    %2 = vector.shape_cast %1 : vector<32x8x64xf32> to vector<256x64xf32>
    %c0_3 = arith.constant 0 : index
    %c0_4 = arith.constant 0 : index
    %3 = vector.load %arg3[%c0_3, %c0_4] : memref<64x128xf32, #tpu.memory_space<vmem>>, vector<64x128xf32>
    %cst = arith.constant dense<0.000000e+00> : vector<256x128xf32>
    %4 = tpu.matmul %2, %3, %cst {dimension_numbers = #tpu.dot_dimension_numbers<[1], [0], [0], [1], [0, 0, 1, 1], [], []>} : vector<256x64xf32>, vector<64x128xf32>, vector<256x128xf32> -> vector<256x128xf32>
    %c0_5 = arith.constant 0 : index
    %c0_6 = arith.constant 0 : index
    %5 = vector.load %arg5[%c0_5, %c0_6] : memref<1x128xf32, #tpu.memory_space<vmem>>, vector<1x128xf32>
    %6 = vector.broadcast %5 : vector<1x128xf32> to vector<256x128xf32>
    %7 = arith.addf %4, %6 : vector<256x128xf32>
    %c0_7 = arith.constant 0 : index
    %c0_8 = arith.constant 0 : index
    %8 = vector.load %arg13[%c0_7, %c0_8] : memref<256x128xf32, #tpu.memory_space<vmem>>, vector<256x128xf32>
    tpu.vector_store %arg13[%c0_7, %c0_8], %7 {strides = array<i32>} : memref<256x128xf32, #tpu.memory_space<vmem>>, vector<256x128xf32>,
    %c0_9 = arith.constant 0 : index
    %c0_10 = arith.constant 0 : index
    %9 = vector.load %arg4[%c0_9, %c0_10] : memref<32x128xf32, #tpu.memory_space<vmem>>, vector<32x128xf32>
    %cst_11 = arith.constant 0.000000e+00 : f32
    %10 = vector.broadcast %cst_11 : f32 to vector<8x32xf32>
    %cst_12 = arith.constant 0.000000e+00 : f32
    %11 = vector.broadcast %cst_12 : f32 to vector<8x32xf32>
    %c0_i32 = arith.constant 0 : i32
    %c8_i32 = arith.constant 8 : i32
    %12 = arith.addi %c0_i32, %c8_i32 : i32
    %c1_i32 = arith.constant 1 : i32
    %13:2 = scf.for %arg16 = %c0_i32 to %12 step %c1_i32 iter_args(%arg17 = %10, %arg18 = %11) -> (vector<8x32xf32>, vector<8x32xf32>)  : i32 {
      %c4_i32 = arith.constant 4 : i32
      %61 = arith.muli %arg16, %c4_i32 : i32
      %c0_i32_48 = arith.constant 0 : i32
      %62 = arith.addi %61, %c0_i32_48 : i32
      %c8_i32_49 = arith.constant 8 : i32
      %63 = arith.muli %62, %c8_i32_49 : i32
      %64 = tpu.assume_multiple %63, 8 : i32
      %65 = arith.index_cast %64 : i32 to index
      %c0_50 = arith.constant 0 : index
      %66 = vector.load %arg13[%65, %c0_50] : memref<256x128xf32, #tpu.memory_space<vmem>>, vector<8x128xf32>
      %cst_51 = arith.constant dense<0.000000e+00> : vector<8x128xf32>
      %67 = tpu.matmul %arg17, %9, %cst_51 {dimension_numbers = #tpu.dot_dimension_numbers<[1], [0], [0], [1], [0, 0, 1, 1], [], []>} : vector<8x32xf32>, vector<32x128xf32>, vector<8x128xf32> -> vector<8x128xf32>
      %68 = arith.addf %66, %67 : vector<8x128xf32>
      %69 = arith.negf %68 : vector<8x128xf32>
      %70 = math.exp %69 : vector<8x128xf32>
      %cst_52 = arith.constant 1.000000e+00 : f32
      %71 = vector.broadcast %cst_52 : f32 to vector<8x128xf32>
      %72 = arith.addf %71, %70 : vector<8x128xf32>
      %73 = arith.divf %71, %72 : vector<8x128xf32>
      %74 = math.tanh %68 : vector<8x128xf32>
      %75 = vector.extract_strided_slice %73 {offsets = [0, 0], sizes = [8, 32], strides = [1, 1]} : vector<8x128xf32> to vector<8x32xf32>
      %76 = vector.extract_strided_slice %73 {offsets = [0, 32], sizes = [8, 32], strides = [1, 1]} : vector<8x128xf32> to vector<8x32xf32>
      %77 = vector.extract_strided_slice %74 {offsets = [0, 64], sizes = [8, 32], strides = [1, 1]} : vector<8x128xf32> to vector<8x32xf32>
      %78 = vector.extract_strided_slice %73 {offsets = [0, 96], sizes = [8, 32], strides = [1, 1]} : vector<8x128xf32> to vector<8x32xf32>
      %79 = arith.mulf %76, %arg18 : vector<8x32xf32>
      %80 = arith.mulf %75, %77 : vector<8x32xf32>
      %81 = arith.addf %79, %80 : vector<8x32xf32>
      %82 = math.tanh %81 : vector<8x32xf32>
      %83 = arith.mulf %78, %82 : vector<8x32xf32>
      %84 = vector.extract_strided_slice %83 {offsets = [0, 0], sizes = [8, 16], strides = [1, 1]} : vector<8x32xf32> to vector<8x16xf32>
      %85 = arith.index_cast %64 : i32 to index
      %c0_53 = arith.constant 0 : index
      %86 = vector.load %arg14[%85, %c0_53] : memref<256x16xf32, #tpu.memory_space<vmem>>, vector<8x16xf32>
      tpu.vector_store %arg14[%85, %c0_53], %84 {strides = array<i32>} : memref<256x16xf32, #tpu.memory_space<vmem>>, vector<8x16xf32>,
      %c31_i32 = arith.constant 31 : i32
      %87 = arith.subi %c31_i32, %62 : i32
      %c8_i32_54 = arith.constant 8 : i32
      %88 = arith.muli %87, %c8_i32_54 : i32
      %89 = tpu.assume_multiple %88, 8 : i32
      %90 = vector.extract_strided_slice %83 {offsets = [0, 16], sizes = [8, 16], strides = [1, 1]} : vector<8x32xf32> to vector<8x16xf32>
      %91 = arith.index_cast %89 : i32 to index
      %c0_55 = arith.constant 0 : index
      %92 = vector.load %arg15[%91, %c0_55] : memref<256x16xf32, #tpu.memory_space<vmem>>, vector<8x16xf32>
      tpu.vector_store %arg15[%91, %c0_55], %90 {strides = array<i32>} : memref<256x16xf32, #tpu.memory_space<vmem>>, vector<8x16xf32>,
      %c1_i32_56 = arith.constant 1 : i32
      %93 = arith.addi %61, %c1_i32_56 : i32
      %c8_i32_57 = arith.constant 8 : i32
      %94 = arith.muli %93, %c8_i32_57 : i32
      %95 = tpu.assume_multiple %94, 8 : i32
      %96 = arith.index_cast %95 : i32 to index
      %c0_58 = arith.constant 0 : index
      %97 = vector.load %arg13[%96, %c0_58] : memref<256x128xf32, #tpu.memory_space<vmem>>, vector<8x128xf32>
      %cst_59 = arith.constant dense<0.000000e+00> : vector<8x128xf32>
      %98 = tpu.matmul %83, %9, %cst_59 {dimension_numbers = #tpu.dot_dimension_numbers<[1], [0], [0], [1], [0, 0, 1, 1], [], []>} : vector<8x32xf32>, vector<32x128xf32>, vector<8x128xf32> -> vector<8x128xf32>
      %99 = arith.addf %97, %98 : vector<8x128xf32>
      %100 = arith.negf %99 : vector<8x128xf32>
      %101 = math.exp %100 : vector<8x128xf32>
      %cst_60 = arith.constant 1.000000e+00 : f32
      %102 = vector.broadcast %cst_60 : f32 to vector<8x128xf32>
      %103 = arith.addf %102, %101 : vector<8x128xf32>
      %104 = arith.divf %102, %103 : vector<8x128xf32>
      %105 = math.tanh %99 : vector<8x128xf32>
      %106 = vector.extract_strided_slice %104 {offsets = [0, 0], sizes = [8, 32], strides = [1, 1]} : vector<8x128xf32> to vector<8x32xf32>
      %107 = vector.extract_strided_slice %104 {offsets = [0, 32], sizes = [8, 32], strides = [1, 1]} : vector<8x128xf32> to vector<8x32xf32>
      %108 = vector.extract_strided_slice %105 {offsets = [0, 64], sizes = [8, 32], strides = [1, 1]} : vector<8x128xf32> to vector<8x32xf32>
      %109 = vector.extract_strided_slice %104 {offsets = [0, 96], sizes = [8, 32], strides = [1, 1]} : vector<8x128xf32> to vector<8x32xf32>
      %110 = arith.mulf %107, %81 : vector<8x32xf32>
      %111 = arith.mulf %106, %108 : vector<8x32xf32>
      %112 = arith.addf %110, %111 : vector<8x32xf32>
      %113 = math.tanh %112 : vector<8x32xf32>
      %114 = arith.mulf %109, %113 : vector<8x32xf32>
      %115 = vector.extract_strided_slice %114 {offsets = [0, 0], sizes = [8, 16], strides = [1, 1]} : vector<8x32xf32> to vector<8x16xf32>
      %116 = arith.index_cast %95 : i32 to index
      %c0_61 = arith.constant 0 : index
      %117 = vector.load %arg14[%116, %c0_61] : memref<256x16xf32, #tpu.memory_space<vmem>>, vector<8x16xf32>
      tpu.vector_store %arg14[%116, %c0_61], %115 {strides = array<i32>} : memref<256x16xf32, #tpu.memory_space<vmem>>, vector<8x16xf32>,
      %c31_i32_62 = arith.constant 31 : i32
      %118 = arith.subi %c31_i32_62, %93 : i32
      %c8_i32_63 = arith.constant 8 : i32
      %119 = arith.muli %118, %c8_i32_63 : i32
      %120 = tpu.assume_multiple %119, 8 : i32
      %121 = vector.extract_strided_slice %114 {offsets = [0, 16], sizes = [8, 16], strides = [1, 1]} : vector<8x32xf32> to vector<8x16xf32>
      %122 = arith.index_cast %120 : i32 to index
      %c0_64 = arith.constant 0 : index
      %123 = vector.load %arg15[%122, %c0_64] : memref<256x16xf32, #tpu.memory_space<vmem>>, vector<8x16xf32>
      tpu.vector_store %arg15[%122, %c0_64], %121 {strides = array<i32>} : memref<256x16xf32, #tpu.memory_space<vmem>>, vector<8x16xf32>,
      %c2_i32 = arith.constant 2 : i32
      %124 = arith.addi %61, %c2_i32 : i32
      %c8_i32_65 = arith.constant 8 : i32
      %125 = arith.muli %124, %c8_i32_65 : i32
      %126 = tpu.assume_multiple %125, 8 : i32
      %127 = arith.index_cast %126 : i32 to index
      %c0_66 = arith.constant 0 : index
      %128 = vector.load %arg13[%127, %c0_66] : memref<256x128xf32, #tpu.memory_space<vmem>>, vector<8x128xf32>
      %cst_67 = arith.constant dense<0.000000e+00> : vector<8x128xf32>
      %129 = tpu.matmul %114, %9, %cst_67 {dimension_numbers = #tpu.dot_dimension_numbers<[1], [0], [0], [1], [0, 0, 1, 1], [], []>} : vector<8x32xf32>, vector<32x128xf32>, vector<8x128xf32> -> vector<8x128xf32>
      %130 = arith.addf %128, %129 : vector<8x128xf32>
      %131 = arith.negf %130 : vector<8x128xf32>
      %132 = math.exp %131 : vector<8x128xf32>
      %cst_68 = arith.constant 1.000000e+00 : f32
      %133 = vector.broadcast %cst_68 : f32 to vector<8x128xf32>
      %134 = arith.addf %133, %132 : vector<8x128xf32>
      %135 = arith.divf %133, %134 : vector<8x128xf32>
      %136 = math.tanh %130 : vector<8x128xf32>
      %137 = vector.extract_strided_slice %135 {offsets = [0, 0], sizes = [8, 32], strides = [1, 1]} : vector<8x128xf32> to vector<8x32xf32>
      %138 = vector.extract_strided_slice %135 {offsets = [0, 32], sizes = [8, 32], strides = [1, 1]} : vector<8x128xf32> to vector<8x32xf32>
      %139 = vector.extract_strided_slice %136 {offsets = [0, 64], sizes = [8, 32], strides = [1, 1]} : vector<8x128xf32> to vector<8x32xf32>
      %140 = vector.extract_strided_slice %135 {offsets = [0, 96], sizes = [8, 32], strides = [1, 1]} : vector<8x128xf32> to vector<8x32xf32>
      %141 = arith.mulf %138, %112 : vector<8x32xf32>
      %142 = arith.mulf %137, %139 : vector<8x32xf32>
      %143 = arith.addf %141, %142 : vector<8x32xf32>
      %144 = math.tanh %143 : vector<8x32xf32>
      %145 = arith.mulf %140, %144 : vector<8x32xf32>
      %146 = vector.extract_strided_slice %145 {offsets = [0, 0], sizes = [8, 16], strides = [1, 1]} : vector<8x32xf32> to vector<8x16xf32>
      %147 = arith.index_cast %126 : i32 to index
      %c0_69 = arith.constant 0 : index
      %148 = vector.load %arg14[%147, %c0_69] : memref<256x16xf32, #tpu.memory_space<vmem>>, vector<8x16xf32>
      tpu.vector_store %arg14[%147, %c0_69], %146 {strides = array<i32>} : memref<256x16xf32, #tpu.memory_space<vmem>>, vector<8x16xf32>,
      %c31_i32_70 = arith.constant 31 : i32
      %149 = arith.subi %c31_i32_70, %124 : i32
      %c8_i32_71 = arith.constant 8 : i32
      %150 = arith.muli %149, %c8_i32_71 : i32
      %151 = tpu.assume_multiple %150, 8 : i32
      %152 = vector.extract_strided_slice %145 {offsets = [0, 16], sizes = [8, 16], strides = [1, 1]} : vector<8x32xf32> to vector<8x16xf32>
      %153 = arith.index_cast %151 : i32 to index
      %c0_72 = arith.constant 0 : index
      %154 = vector.load %arg15[%153, %c0_72] : memref<256x16xf32, #tpu.memory_space<vmem>>, vector<8x16xf32>
      tpu.vector_store %arg15[%153, %c0_72], %152 {strides = array<i32>} : memref<256x16xf32, #tpu.memory_space<vmem>>, vector<8x16xf32>,
      %c3_i32 = arith.constant 3 : i32
      %155 = arith.addi %61, %c3_i32 : i32
      %c8_i32_73 = arith.constant 8 : i32
      %156 = arith.muli %155, %c8_i32_73 : i32
      %157 = tpu.assume_multiple %156, 8 : i32
      %158 = arith.index_cast %157 : i32 to index
      %c0_74 = arith.constant 0 : index
      %159 = vector.load %arg13[%158, %c0_74] : memref<256x128xf32, #tpu.memory_space<vmem>>, vector<8x128xf32>
      %cst_75 = arith.constant dense<0.000000e+00> : vector<8x128xf32>
      %160 = tpu.matmul %145, %9, %cst_75 {dimension_numbers = #tpu.dot_dimension_numbers<[1], [0], [0], [1], [0, 0, 1, 1], [], []>} : vector<8x32xf32>, vector<32x128xf32>, vector<8x128xf32> -> vector<8x128xf32>
      %161 = arith.addf %159, %160 : vector<8x128xf32>
      %162 = arith.negf %161 : vector<8x128xf32>
      %163 = math.exp %162 : vector<8x128xf32>
      %cst_76 = arith.constant 1.000000e+00 : f32
      %164 = vector.broadcast %cst_76 : f32 to vector<8x128xf32>
      %165 = arith.addf %164, %163 : vector<8x128xf32>
      %166 = arith.divf %164, %165 : vector<8x128xf32>
      %167 = math.tanh %161 : vector<8x128xf32>
      %168 = vector.extract_strided_slice %166 {offsets = [0, 0], sizes = [8, 32], strides = [1, 1]} : vector<8x128xf32> to vector<8x32xf32>
      %169 = vector.extract_strided_slice %166 {offsets = [0, 32], sizes = [8, 32], strides = [1, 1]} : vector<8x128xf32> to vector<8x32xf32>
      %170 = vector.extract_strided_slice %167 {offsets = [0, 64], sizes = [8, 32], strides = [1, 1]} : vector<8x128xf32> to vector<8x32xf32>
      %171 = vector.extract_strided_slice %166 {offsets = [0, 96], sizes = [8, 32], strides = [1, 1]} : vector<8x128xf32> to vector<8x32xf32>
      %172 = arith.mulf %169, %143 : vector<8x32xf32>
      %173 = arith.mulf %168, %170 : vector<8x32xf32>
      %174 = arith.addf %172, %173 : vector<8x32xf32>
      %175 = math.tanh %174 : vector<8x32xf32>
      %176 = arith.mulf %171, %175 : vector<8x32xf32>
      %177 = vector.extract_strided_slice %176 {offsets = [0, 0], sizes = [8, 16], strides = [1, 1]} : vector<8x32xf32> to vector<8x16xf32>
      %178 = arith.index_cast %157 : i32 to index
      %c0_77 = arith.constant 0 : index
      %179 = vector.load %arg14[%178, %c0_77] : memref<256x16xf32, #tpu.memory_space<vmem>>, vector<8x16xf32>
      tpu.vector_store %arg14[%178, %c0_77], %177 {strides = array<i32>} : memref<256x16xf32, #tpu.memory_space<vmem>>, vector<8x16xf32>,
      %c31_i32_78 = arith.constant 31 : i32
      %180 = arith.subi %c31_i32_78, %155 : i32
      %c8_i32_79 = arith.constant 8 : i32
      %181 = arith.muli %180, %c8_i32_79 : i32
      %182 = tpu.assume_multiple %181, 8 : i32
      %183 = vector.extract_strided_slice %176 {offsets = [0, 16], sizes = [8, 16], strides = [1, 1]} : vector<8x32xf32> to vector<8x16xf32>
      %184 = arith.index_cast %182 : i32 to index
      %c0_80 = arith.constant 0 : index
      %185 = vector.load %arg15[%184, %c0_80] : memref<256x16xf32, #tpu.memory_space<vmem>>, vector<8x16xf32>
      tpu.vector_store %arg15[%184, %c0_80], %183 {strides = array<i32>} : memref<256x16xf32, #tpu.memory_space<vmem>>, vector<8x16xf32>,
      scf.yield %176, %174 : vector<8x32xf32>, vector<8x32xf32>
    }
    %c8_i32_13 = arith.constant 8 : i32
    %c0_14 = arith.constant 0 : index
    %c0_15 = arith.constant 0 : index
    %14 = vector.load %arg14[%c0_14, %c0_15] : memref<256x16xf32, #tpu.memory_space<vmem>>, vector<256x16xf32>
    %c0_16 = arith.constant 0 : index
    %c0_17 = arith.constant 0 : index
    %15 = vector.load %arg6[%c0_16, %c0_17] : memref<16x4xf32, #tpu.memory_space<vmem>>, vector<16x4xf32>
    %cst_18 = arith.constant dense<0.000000e+00> : vector<256x4xf32>
    %16 = tpu.matmul %14, %15, %cst_18 {dimension_numbers = #tpu.dot_dimension_numbers<[1], [0], [0], [1], [0, 0, 1, 1], [], []>} : vector<256x16xf32>, vector<16x4xf32>, vector<256x4xf32> -> vector<256x4xf32>
    %c0_19 = arith.constant 0 : index
    %c0_20 = arith.constant 0 : index
    %17 = vector.load %arg15[%c0_19, %c0_20] : memref<256x16xf32, #tpu.memory_space<vmem>>, vector<256x16xf32>
    %c0_21 = arith.constant 0 : index
    %c0_22 = arith.constant 0 : index
    %18 = vector.load %arg7[%c0_21, %c0_22] : memref<16x4xf32, #tpu.memory_space<vmem>>, vector<16x4xf32>
    %cst_23 = arith.constant dense<0.000000e+00> : vector<256x4xf32>
    %19 = tpu.matmul %17, %18, %cst_23 {dimension_numbers = #tpu.dot_dimension_numbers<[1], [0], [0], [1], [0, 0, 1, 1], [], []>} : vector<256x16xf32>, vector<16x4xf32>, vector<256x4xf32> -> vector<256x4xf32>
    %20 = arith.addf %16, %19 : vector<256x4xf32>
    %21 = vector.shape_cast %20 : vector<256x4xf32> to vector<32x8x4xf32>
    %cst_24 = arith.constant dense<0xFF800000> : vector<8x4xf32>
    %22 = vector.multi_reduction <maximumf>, %21, %cst_24 [0] : vector<32x8x4xf32> to vector<8x4xf32>
    %23 = vector.shape_cast %22 : vector<8x4xf32> to vector<1x8x4xf32>
    %24 = vector.broadcast %23 : vector<1x8x4xf32> to vector<32x8x4xf32>
    %25 = arith.subf %21, %24 : vector<32x8x4xf32>
    %26 = math.exp %25 : vector<32x8x4xf32>
    %cst_25 = arith.constant dense<0.000000e+00> : vector<8x4xf32>
    %27 = vector.multi_reduction <add>, %26, %cst_25 [0] : vector<32x8x4xf32> to vector<8x4xf32>
    %28 = vector.shape_cast %27 : vector<8x4xf32> to vector<1x8x4xf32>
    %29 = vector.broadcast %28 : vector<1x8x4xf32> to vector<32x8x4xf32>
    %30 = arith.divf %26, %29 : vector<32x8x4xf32>
    %c0_26 = arith.constant 0 : index
    %c0_27 = arith.constant 0 : index
    %c0_28 = arith.constant 0 : index
    %c0_29 = arith.constant 0 : index
    %31 = vector.load %arg12[%c0_26, %c0_27, %c0_28, %c0_29] : memref<1x32x8x4xf32, #tpu.memory_space<vmem>>, vector<1x32x8x4xf32>
    %32 = vector.shape_cast %31 : vector<1x32x8x4xf32> to vector<32x8x4xf32>
    %33 = vector.shape_cast %30 : vector<32x8x4xf32> to vector<1x32x8x4xf32>
    tpu.vector_store %arg12[%c0_26, %c0_27, %c0_28, %c0_29], %33 {strides = array<i32>} : memref<1x32x8x4xf32, #tpu.memory_space<vmem>>, vector<1x32x8x4xf32>,
    %c0_30 = arith.constant 0 : index
    %c0_31 = arith.constant 0 : index
    %c0_32 = arith.constant 0 : index
    %c0_33 = arith.constant 0 : index
    %34 = vector.load %arg2[%c0_30, %c0_31, %c0_32, %c0_33] : memref<1x32x8x32xf32, #tpu.memory_space<vmem>>, vector<1x32x8x32xf32>
    %35 = vector.shape_cast %34 : vector<1x32x8x32xf32> to vector<32x8x32xf32>
    %36 = vector.shape_cast %35 : vector<32x8x32xf32> to vector<256x32xf32>
    %c0_34 = arith.constant 0 : index
    %c0_35 = arith.constant 0 : index
    %37 = vector.load %arg8[%c0_34, %c0_35] : memref<32x32xf32, #tpu.memory_space<vmem>>, vector<32x32xf32>
    %cst_36 = arith.constant dense<0.000000e+00> : vector<256x32xf32>
    %38 = tpu.matmul %36, %37, %cst_36 {dimension_numbers = #tpu.dot_dimension_numbers<[1], [0], [0], [1], [0, 0, 1, 1], [], []>} : vector<256x32xf32>, vector<32x32xf32>, vector<256x32xf32> -> vector<256x32xf32>
    %39 = vector.shape_cast %30 : vector<32x8x4xf32> to vector<256x4xf32>
    %40 = tpu.concatenate %39, %39, %39, %39, %39, %39, %39, %39 in 1 : vector<256x4xf32>, vector<256x4xf32>, vector<256x4xf32>, vector<256x4xf32>, vector<256x4xf32>, vector<256x4xf32>, vector<256x4xf32>, vector<256x4xf32> -> vector<256x32xf32>
    %41 = arith.mulf %38, %40 : vector<256x32xf32>
    %42 = vector.shape_cast %41 : vector<256x32xf32> to vector<32x8x32xf32>
    %cst_37 = arith.constant dense<0.000000e+00> : vector<8x32xf32>
    %43 = vector.multi_reduction <add>, %42, %cst_37 [0] : vector<32x8x32xf32> to vector<8x32xf32>
    %c0_38 = arith.constant 0 : index
    %c0_39 = arith.constant 0 : index
    %44 = vector.load %arg9[%c0_38, %c0_39] : memref<32x8xf32, #tpu.memory_space<vmem>>, vector<32x8xf32>
    %cst_40 = arith.constant dense<0.000000e+00> : vector<8x8xf32>
    %45 = tpu.matmul %43, %44, %cst_40 {dimension_numbers = #tpu.dot_dimension_numbers<[1], [0], [0], [1], [0, 0, 1, 1], [], []>} : vector<8x32xf32>, vector<32x8xf32>, vector<8x8xf32> -> vector<8x8xf32>
    %c0_41 = arith.constant 0 : index
    %c0_42 = arith.constant 0 : index
    %46 = vector.load %arg10[%c0_41, %c0_42] : memref<1x8xf32, #tpu.memory_space<vmem>>, vector<1x8xf32>
    %47 = vector.broadcast %46 : vector<1x8xf32> to vector<8x8xf32>
    %48 = arith.addf %45, %47 : vector<8x8xf32>
    %cst_43 = arith.constant dense<0xFF800000> : vector<8xf32>
    %49 = vector.multi_reduction <maximumf>, %48, %cst_43 [1] : vector<8x8xf32> to vector<8xf32>
    %50 = vector.shape_cast %49 : vector<8xf32> to vector<8x1xf32>
    %51 = vector.broadcast %50 : vector<8x1xf32> to vector<8x8xf32>
    %52 = arith.subf %48, %51 : vector<8x8xf32>
    %53 = math.exp %52 : vector<8x8xf32>
    %cst_44 = arith.constant dense<0.000000e+00> : vector<8xf32>
    %54 = vector.multi_reduction <add>, %53, %cst_44 [1] : vector<8x8xf32> to vector<8xf32>
    %55 = vector.shape_cast %54 : vector<8xf32> to vector<8x1xf32>
    %56 = vector.broadcast %55 : vector<8x1xf32> to vector<8x8xf32>
    %57 = arith.divf %53, %56 : vector<8x8xf32>
    %c0_45 = arith.constant 0 : index
    %c0_46 = arith.constant 0 : index
    %c0_47 = arith.constant 0 : index
    %58 = vector.load %arg11[%c0_45, %c0_46, %c0_47] : memref<1x8x8xf32, #tpu.memory_space<vmem>>, vector<1x8x8xf32>
    %59 = vector.shape_cast %58 : vector<1x8x8xf32> to vector<8x8xf32>
    %60 = vector.shape_cast %57 : vector<8x8xf32> to vector<1x8x8xf32>
    tpu.vector_store %arg11[%c0_45, %c0_46, %c0_47], %60 {strides = array<i32>} : memref<1x8x8xf32, #tpu.memory_space<vmem>>, vector<1x8x8xf32>,
    return
  }
  func.func @transform_0(%arg0: i32) -> (i32, i32, i32, i32) {
    %c0_i32 = arith.constant 0 : i32
    %c0_i32_0 = arith.constant 0 : i32
    %c0_i32_1 = arith.constant 0 : i32
    %c0_i32_2 = arith.constant 0 : i32
    return %arg0, %c0_i32, %c0_i32_0, %c0_i32_1 : i32, i32, i32, i32
  }
  func.func @transform_1(%arg0: i32) -> (i32, i32, i32, i32) {
    %c0_i32 = arith.constant 0 : i32
    %c0_i32_0 = arith.constant 0 : i32
    %c0_i32_1 = arith.constant 0 : i32
    %c0_i32_2 = arith.constant 0 : i32
    return %arg0, %c0_i32, %c0_i32_0, %c0_i32_1 : i32, i32, i32, i32
  }
  func.func @transform_2(%arg0: i32) -> (i32, i32) {
    %c0_i32 = arith.constant 0 : i32
    %c0_i32_0 = arith.constant 0 : i32
    %c0_i32_1 = arith.constant 0 : i32
    return %c0_i32, %c0_i32_0 : i32, i32
  }
  func.func @transform_3(%arg0: i32) -> (i32, i32) {
    %c0_i32 = arith.constant 0 : i32
    %c0_i32_0 = arith.constant 0 : i32
    %c0_i32_1 = arith.constant 0 : i32
    return %c0_i32, %c0_i32_0 : i32, i32
  }
  func.func @transform_4(%arg0: i32) -> (i32, i32) {
    %c0_i32 = arith.constant 0 : i32
    %c0_i32_0 = arith.constant 0 : i32
    %c0_i32_1 = arith.constant 0 : i32
    return %c0_i32, %c0_i32_0 : i32, i32
  }
  func.func @transform_5(%arg0: i32) -> (i32, i32) {
    %c0_i32 = arith.constant 0 : i32
    %c0_i32_0 = arith.constant 0 : i32
    %c0_i32_1 = arith.constant 0 : i32
    return %c0_i32, %c0_i32_0 : i32, i32
  }
  func.func @transform_6(%arg0: i32) -> (i32, i32) {
    %c0_i32 = arith.constant 0 : i32
    %c0_i32_0 = arith.constant 0 : i32
    %c0_i32_1 = arith.constant 0 : i32
    return %c0_i32, %c0_i32_0 : i32, i32
  }
  func.func @transform_7(%arg0: i32) -> (i32, i32) {
    %c0_i32 = arith.constant 0 : i32
    %c0_i32_0 = arith.constant 0 : i32
    %c0_i32_1 = arith.constant 0 : i32
    return %c0_i32, %c0_i32_0 : i32, i32
  }
  func.func @transform_8(%arg0: i32) -> (i32, i32) {
    %c0_i32 = arith.constant 0 : i32
    %c0_i32_0 = arith.constant 0 : i32
    %c0_i32_1 = arith.constant 0 : i32
    return %c0_i32, %c0_i32_0 : i32, i32
  }
  func.func @transform_9(%arg0: i32) -> (i32, i32) {
    %c0_i32 = arith.constant 0 : i32
    %c0_i32_0 = arith.constant 0 : i32
    %c0_i32_1 = arith.constant 0 : i32
    return %c0_i32, %c0_i32_0 : i32, i32
  }
  func.func @transform_10(%arg0: i32) -> (i32, i32, i32) {
    %c0_i32 = arith.constant 0 : i32
    %c0_i32_0 = arith.constant 0 : i32
    %c0_i32_1 = arith.constant 0 : i32
    return %arg0, %c0_i32, %c0_i32_0 : i32, i32, i32
  }
  func.func @transform_11(%arg0: i32) -> (i32, i32, i32, i32) {
    %c0_i32 = arith.constant 0 : i32
    %c0_i32_0 = arith.constant 0 : i32
    %c0_i32_1 = arith.constant 0 : i32
    %c0_i32_2 = arith.constant 0 : i32
    return %arg0, %c0_i32, %c0_i32_0, %c0_i32_1 : i32, i32, i32, i32
  }
}

</mosaic_0001>

<bundles_post_ra>
// kernel: tpu_custom_call.1
= control target key start
LH: loop header
LB: loop body
LE: loop exit
PB: predicated region body
PF: predicated region fallthrough
CT: control target
= control target key end

     0   :  { %s7591_s0 = inlined_call_operand.hbm [shape: f32[2,32,8,64], index: 0, kind: input, shape index: {}]   ;;  %s7592_s1 = inlined_call_operand.hbm [shape: f32[2,32,8,32], index: 1, kind: input, shape index: {}]   ;;  %s7593_s2 = inlined_call_operand.vmem [shape: f32[64,128], index: 2, kind: input, shape index: {}]   ;;  %s7594_s3 = inlined_call_operand.hbm [shape: f32[32,128], index: 3, kind: input, shape index: {}]   ;;  %s7595_s4 = inlined_call_operand.vmem [shape: f32[1,128], index: 4, kind: input, shape index: {}]   ;;  %s7596_s5 = inlined_call_operand.vmem [shape: f32[16,4], index: 5, kind: input, shape index: {}]   ;;  %s7597_s6 = inlined_call_operand.vmem [shape: f32[16,4], index: 6, kind: input, shape index: {}]   ;;  %s7598_s7 = inlined_call_operand.hbm [shape: f32[32,32], index: 7, kind: input, shape index: {}]   ;;  %s7599_s8 = inlined_call_operand.vmem [shape: f32[32,8], index: 8, kind: input, shape index: {}]   ;;  %s7600_s9 = inlined_call_operand.vmem [shape: f32[1,8], index: 9, kind: input, shape index: {}]   ;;  %s7601_s10 = inlined_call_operand.hbm [shape: f32[2,8,8], index: 10, kind: output, shape index: {0}]   ;;  %s7602_s11 = inlined_call_operand.vmem [shape: f32[2,32,8,4], index: 11, kind: output, shape index: {1}]  }
   0x1   :  { %7640 = sst [smem:[#allocation109_spill]] %s7591_s0 }
   0x2   :  { %7641 = sst [smem:[#allocation110_spill]] %s7594_s3 }
   0x3   :  { %7642 = sst [smem:[#allocation111_spill]] %s7598_s7 }
   0x4   :  { %17 = vsyncpa [#allocation6], 0 }
   0x5   :  { %19 = vsyncpa [#allocation6 + $0x1], 0 }
   0x6   :  { %20 = vsyncpa [#allocation9], 0 }
   0x7   :  { %22 = vsyncpa [#allocation9 + $0x1], 0 }
   0x8   :  { %23 = vsyncpa [#allocation12], 0 }
   0x9   :  { %24 = vsyncpa [#allocation7], 0 }
   0xa   :  { %26 = vsyncpa [#allocation7 + $0x1], 0  ;;  %s5216_s17 = smov 0   ;;  %s5218_s18 = smov 0  }
   0xb   :  { %s5220_s19 = smov 0   ;;  %s5222_s20 = smov 0  }
   0xc LB: > { %7643 = sst [smem:[#allocation19_spill]] %s5109_s17  ;;  %s5237_s21 = sadd.s32 4294967295, %s5121_s20   ;;  %s5121_s20 = sphi %s5222_s20, %s7839_s20   ;;  %s5117_s19 = sphi %s5220_s19, %s7844_s19   ;;  %s5113_s18 = sphi %s5218_s18, %s7843_s18   ;;  %s5109_s17 = sphi %s5216_s17, %s7842_s17  }
   0xd   : > { %7644 = sst [smem:[#allocation20_spill]] %s5117_s19  ;;  %s4048_s22 = sadd.s32 4294967294, %s5121_s20  }
   0xe   : > { %p52_p0 = scmp.ne.s32.totalorder %s5113_s18, %s5109_s17  ;;  %p7612_p1 = scmp.eq.s32.totalorder %s5237_s21, 0 }
   0xf   : > { %p270_p2 = scmp.eq.s32.totalorder %s5237_s21, 1  ;;  %p276_p3 = scmp.eq.s32.totalorder %s4048_s22, 1 }
  0x10   : > { %p5246_p4 = por %p7612_p1, %p52_p0  ;;  %p4049_p5 = scmp.ge.s32.totalorder %s5121_s20, 1 }
  0x11   : > { %p5251_p6 = por %p276_p3, %p52_p0  ;;  %p309_p7 = scmp.lt.s32.totalorder %s5121_s20, 3 }
  0x12   : > { %s7645_s23 = scalar_select %p5246_p4, 1, 0 }
  0x13   : > { %s7646_s24 = scalar_select %p5251_p6, 1, 0 }
  0x14   : > { %p5256_p8 = pnand %p4049_p5, %p309_p7  ;;  %s5135_s26 = smov [#allocation10]  }
  0x15   : > { %7647 = sst [smem:[#allocation21_spill]] %s7646_s24  ;;  %s324_s27 = sshll.u32 %s5135_s26, 4  ;;  %s325_s27 = int_to_ptr.vmem [resolvable:$true] %s324_s27 }
  0x16   : > { %p4725_p9 = pneg %p5256_p8  ;;  %s5136_s29 = smov [#allocation11]  }
  0x17   : > { %s346_s30 = sshll.u32 %s5136_s29, 4  ;;  %s4936_s12 = scalar_lea.vmem %s325_s27, 512  ;;  %s347_s30 = int_to_ptr.vmem [resolvable:$true] %s346_s30 }
  0x18   : > { %p5265_p11 = pnand %p4725_p9, %p7612_p1  ;;  %p4937_p13 = scmp.ne.s32.totalorder %s325_s27, %s4936_s12 }
  0x19   : > { %p4944_p5 = scmp.lt.s32.totalorder %s325_s27, %s325_s27  ;;  %p4945_p7 = scmp.lt.s32.totalorder %s4936_s12, %s4936_s12 }
  0x1a   : > { %p4927_p12 = pneg %p5265_p11 }
  0x1b   : > { %p4946_p10 = por %p4945_p7, %p4944_p5 }
  0x1c   : > { %p4939_p0 = pnand %p4937_p13, %p4927_p12 }
  0x1e   : > { %p4940_p3 = pneg %p4939_p0 }
  0x20   : > { %p4947_p9 = pnand %p4946_p10, %p4940_p3 }
  0x22   : > { %4950 = shalt.err (!%p4947_p9)
}
  0x23   : > { %s7603_s13 = smov 128   ;;  %s7605_s14 = smov 8  }
  0x24   : > { %s7650_s3 = sld [smem:[#allocation110_spill]]  ;;  %s4962_s22 = scalar_lea.vmem %s347_s30, 512 }
  0x25   : > { %p4963_p13 = scmp.ne.s32.totalorder %s347_s30, %s4962_s22  ;;  %p4970_p10 = scmp.lt.s32.totalorder %s347_s30, %s347_s30 }
  0x26   : > { %p4971_p3 = scmp.lt.s32.totalorder %s4962_s22, %s4962_s22 }
  0x27   : > { %p4965_p0 = pnand %p4963_p13, %p4927_p12 }
  0x28   : > { %p4972_p7 = por %p4971_p3, %p4970_p10 }
  0x29   : > { %p4966_p5 = pneg %p4965_p0 }
  0x2a   : > { %4728 = dma.hbm_to_vmem [thread:$0]  (!%p5265_p11), %s7650_s3, 512, %s325_s27, [#allocation9], %s7603_s13, %s7603_s13, %s7605_s14  }
  0x2b   : > { %p4973_p9 = pnand %p4972_p7, %p4966_p5 }
  0x2d   : > { %4976 = shalt.err (!%p4973_p9)
}
  0x2e   : > { %s7651_s7 = sld [smem:[#allocation111_spill]]  ;;  %s5294_s27 = sadd.s32 1, %s5121_s20  }
  0x2f   : > { %7652 = sst [smem:[#allocation22_spill]] %s5294_s27  ;;  %s39_s28 = sadd.s32 1, %s5117_s19 }
  0x30   : > { %s36_s12 = ssub.s32 %s5121_s20, %s5294_s27  ;;  %p46_p12 = scmp.ne.s32.totalorder %s5117_s19, %s5113_s18 }
  0x31   : > { %p37_p13 = scmp.eq.s32.totalorder %s36_s12, 0  ;;  %p47_p0 = scmp.eq.s32.totalorder %s5121_s20, 0 }
  0x32   : > { %p5304_p5 = por %p270_p2, %p46_p12  ;;  %p4745_p10 = scmp.lt.s32.totalorder %s5121_s20, 2 }
  0x33   : > { %s5310_s16 = scalar_select %p37_p13, %s5117_s19, %s39_s28  }
  0x34   : > { %4731 = dma.hbm_to_vmem [thread:$0]  (!%p5265_p11), %s7651_s7, 512, %s347_s30, [#allocation12], %s7603_s13, %s7603_s13, %s7605_s14  }
  0x35   : > { %s7653_s15 = scalar_select %p5304_p5, 1, 0 }
  0x36   : > { %7654 = sst [smem:[#allocation23_spill]] %s5310_s16  ;;  %p48_p3 = por %p47_p0, %p46_p12 }
  0x37   : > { %s366_s22 = sand.u32 1, %s5117_s19   ;;  %s4234_s30 = sshll.u32 %s5121_s20, 12 }
  0x38   : > { %s4053_s26 = sshll.u32 %s366_s22, 8  ;;  %s7655_s0 = sld [smem:[#allocation109_spill]] }
  0x39   : > { %s370_s12 = scalar_lea.vmem [#allocation5], %s4053_s26  ;;  %p5321_p2 = pnand %p4745_p10, %p48_p3 }
  0x3a   : > { %s377_s3 = sshll.u32 %s370_s12, 4  ;;  %s5328_s19 = scalar_lea.hbm %s7592_s1, %s4234_s30  ;;  %s5319_s3 = int_to_ptr.vmem [resolvable:$true] %s377_s3 }
  0x3b   : > { %s391_s13 = scalar_lea.vmem [#allocation8], %s4053_s26  ;;  %s5332_s27 = scalar_lea.sflag [#allocation6], %s366_s22 }
  0x3c   : > { %s5330_s29 = sshll.u32 %s391_s13, 4  ;;  %p4979_p7 = pneg %p5321_p2  ;;  %s5363_s29 = int_to_ptr.vmem [resolvable:$true] %s5330_s29 }
  0x3e   : > { %s5317_s14 = scalar_lea.hbm %s7655_s0, %s4234_s30  ;;  %s4982_s16 = scalar_lea.hbm %s7655_s0, 8192 }
  0x3f   : > { %s4977_s24 = scalar_lea.hbm %s5317_s14, 4096  ;;  %p4983_p13 = scmp.lt.s32.totalorder %s5317_s14, %s7655_s0 }
  0x40   : > { %p4978_p11 = scmp.ne.s32.totalorder %s5317_s14, %s4977_s24  ;;  %p4984_p0 = scmp.lt.s32.totalorder %s4982_s16, %s4977_s24 }
  0x42   : > { %p4980_p9 = pnand %p4979_p7, %p4978_p11  ;;  %p4985_p10 = por %p4984_p0, %p4983_p13 }
  0x44   : > { %p4981_p12 = pneg %p4980_p9 }
  0x46   : > { %p4986_p3 = pnand %p4985_p10, %p4981_p12 }
  0x48   : > { %4989 = shalt.err (!%p4986_p3)
}
  0x49   : > { %s4990_s22 = scalar_lea.vmem %s5319_s3, 4096  ;;  %s5139_s17 = smov [#allocation5]  }
  0x4a   : > { %p4991_p1 = scmp.ne.s32.totalorder %s5319_s3, %s4990_s22  ;;  %s4995_s26 = sshll.u32 %s5139_s17, 4  ;;  %s4996_s26 = int_to_ptr.vmem [resolvable:$false] %s4995_s26 }
  0x4b   : > { %s4997_s13 = scalar_lea.vmem %s4996_s26, 8192  ;;  %p4998_p6 = scmp.lt.s32.totalorder %s5319_s3, %s4996_s26 }
  0x4c   : > { %p4993_p11 = pnand %p4991_p1, %p4979_p7  ;;  %p4999_p5 = scmp.lt.s32.totalorder %s4997_s13, %s4990_s22 }
  0x4e   : > { %p4994_p9 = pneg %p4993_p11  ;;  %p5000_p4 = por %p4999_p5, %p4998_p6 }
  0x50   : > { %p5001_p13 = pnand %p5000_p4, %p4994_p9 }
  0x52   : > { %5004 = shalt.err (!%p5001_p13)
}
  0x53   : > { %s7657_s24 = smov 8   ;;  %s7658_s12 = smov 128  }
  0x54   : > { %4735 = dma.hbm_to_vmem [thread:$0]  (!%p5321_p2), %s5317_s14, 4096, %s5319_s3, %s5332_s27, %s7658_s12, %s7658_s12, %s7657_s24  }
  0x55   : > { %s387_s16 = sand.u32 1, %s5121_s20   ;;  %s5005_s30 = scalar_lea.hbm %s5328_s19, 4096 }
  0x56   : > { %s388_s28 = scalar_lea.sflag [#allocation9], %s387_s16  ;;  %p5006_p1 = scmp.ne.s32.totalorder %s5328_s19, %s5005_s30 }
  0x57   : > { %s5010_s26 = scalar_lea.hbm %s7592_s1, 8192  ;;  %p5011_p5 = scmp.lt.s32.totalorder %s5328_s19, %s7592_s1 }
  0x58   : > { %p5008_p4 = pnand %p5006_p1, %p4979_p7  ;;  %p5012_p12 = scmp.lt.s32.totalorder %s5010_s26, %s5005_s30 }
  0x5a   : > { %p5009_p6 = pneg %p5008_p4  ;;  %p5013_p0 = por %p5012_p12, %p5011_p5 }
  0x5c   : > { %p5014_p10 = pnand %p5013_p0, %p5009_p6 }
  0x5e   : > { %5017 = shalt.err (!%p5014_p10)
}
  0x5f   : > { %s5018_s3 = scalar_lea.vmem %s5363_s29, 4096  ;;  %s5140_s14 = smov [#allocation8]  }
  0x60   : > { %p5019_p3 = scmp.ne.s32.totalorder %s5363_s29, %s5018_s3  ;;  %s5023_s27 = sshll.u32 %s5140_s14, 4  ;;  %s5024_s27 = int_to_ptr.vmem [resolvable:$false] %s5023_s27 }
  0x61   : > { %s5025_s16 = scalar_lea.vmem %s5024_s27, 8192  ;;  %p5026_p13 = scmp.lt.s32.totalorder %s5363_s29, %s5024_s27 }
  0x62   : > { %p5021_p11 = pnand %p5019_p3, %p4979_p7  ;;  %p5027_p1 = scmp.lt.s32.totalorder %s5025_s16, %s5018_s3 }
  0x64   : > { %p5022_p9 = pneg %p5021_p11  ;;  %p5028_p4 = por %p5027_p1, %p5026_p13 }
  0x66   : > { %p5029_p5 = pnand %p5028_p4, %p5022_p9 }
  0x68   : > { %5032 = shalt.err (!%p5029_p5)
}
  0x69   : > { %4738 = dma.hbm_to_vmem [thread:$0]  (!%p5321_p2), %s5328_s19, 4096, %s5363_s29, %s388_s28, %s7658_s12, %s7658_s12, %s7657_s24  }
  0x6a   : > { %410 = sbr.rel (%p5256_p8) target bundleno = 4733 (0x127d), region = 60 }
  0x6f   : > { %s5394_s0 = sand.u32 1, %s5113_s18   ;;  %p7659_p7 = scmp.ne.s32.totalorder %s7645_s23, 0 }
  0x70   : > { %s4060_s30 = sshll.u32 %s5394_s0, 8  ;;  %s413_s22 = scalar_lea.sflag [#allocation6], %s5394_s0 }
  0x71   : > { %s5398_s17 = scalar_lea.vmem [#allocation5], %s4060_s30 }
  0x72   : > { %5088 = dma.done.wait (%p7659_p7), %s413_s22, 4096  }
  0x73   : > { %5090 = vsyncadd (%p7659_p7), %s413_s22, 4294963200  ;;  %s421_s7 = sand.u32 1, %s5237_s21   ;;  %s5405_s25 = scalar_lea.vmem [#allocation8], %s4060_s30 }
  0x74   : > { %s422_s19 = scalar_lea.sflag [#allocation9], %s421_s7 }
  0x75   : > { %5092 = dma.done.wait (%p7659_p7), %s422_s19, 4096  }
  0x76   : > { %5094 = vsyncadd (%p7659_p7), %s422_s19, 4294963200  ;;  %p7660_p8 = scmp.eq.s32.totalorder %s5237_s21, 0 }
  0x78   : > { %5096 = dma.done.wait (%p7660_p8), [#allocation9], 512   ;;  %p7661_p2 = pmov %p7660_p8 }
  0x7a   : > { %5098 = vsyncadd (%p7661_p2), [#allocation9], 4294966784  ;;  %p7662_p6 = pmov %p7661_p2 }
  0x7b   : > { %p7663_p12 = pmov %p7661_p2 }
  0x7c   : > { %5100 = dma.done.wait (%p7662_p6), [#allocation12], 512  }
  0x7d   : > { %5102 = vsyncadd (%p7663_p12), [#allocation12], 4294966784  ;;  %s4064_s29 = sshll.u32 %s5394_s0, 3  ;;  %p482_p0 = scmp.lt.s32.totalorder %s5237_s21, 1  ;;  %v5427_v0 = vld [vmem:[#allocation10] sm:$0xff]  ;;  %v5429_v1 = vld [vmem:[#allocation10 + $0x8] sm:$0xff] }
  0x7e   : > { %v5431_v2 = vld [vmem:[#allocation10 + $0x10] sm:$0xff]  ;;  %v5433_v3 = vld [vmem:[#allocation10 + $0x18] sm:$0xff]  ;;  %v524_v6 = vld [vmem:[%s7593_s2 + $0x28] sm:$0xff]  ;;  %vm534_vm0 = vcmask 523264   ;;  %s5568_s30 = smov 0  }
  0x7f   : > { %s483_s24 = scalar_select %p482_p0, %s5237_s21, 1  ;;  %v526_v4 = vld [vmem:[%s7593_s2 + $0x38] sm:$0xff]  ;;  %v525_v5 = vld [vmem:[%s7593_s2 + $0x30] sm:$0xff]  ;;  %v523_v7 = vld [vmem:[%s7593_s2 + $0x20] sm:$0xff] }
  0x80   : > { %4412 = vmatprep.subr.mxu0 %v526_v4  ;;  %4691 = vmatprep.subr.mxu1 %v526_v4  ;;  %v522_v8 = vld [vmem:[%s7593_s2 + $0x18] sm:$0xff]  ;;  %v521_v9 = vld [vmem:[%s7593_s2 + $0x10] sm:$0xff]  ;;  %v520_v10 = vld [vmem:[%s7593_s2 + $0x8] sm:$0xff] }
  0x81   : > { %s4236_s23 = sshll.u32 %s483_s24, 8  ;;  %4413 = vmatpush3.msra.mxu0 %v526_v4  ;;  %4699 = vmatpush3.msra.mxu1 %v526_v4  ;;  %v519_v11 = vld [vmem:[%s7593_s2] sm:$0xff]  ;;  %v488_v14 = vld [vmem:[%s5398_s17 + $0x8] sm:$0xff]  ;;  %v489_v16 = vld [vmem:[%s5398_s17 + $0x10] sm:$0xff] }
  0x82   : > { %s5425_s26 = scalar_lea.vmem %s7602_s11, %s4236_s23  ;;  %4414 = vmatprep.subr.mxu0 %v525_v5  ;;  %4692 = vmatprep.subr.mxu1 %v525_v5  ;;  %v487_v12 = vld [vmem:[%s5398_s17] sm:$0xff]  ;;  %v504_v15 = vld [vmem:[%s5398_s17 + $0x88] sm:$0xff]  ;;  %v505_v17 = vld [vmem:[%s5398_s17 + $0x90] sm:$0xff] }
  0x83   : > { %4415 = vmatpush3.msra.mxu0 %v525_v5  ;;  %4700 = vmatpush3.msra.mxu1 %v525_v5  ;;  %v503_v13 = vld [vmem:[%s5398_s17 + $0x80] sm:$0xff]  ;;  %v490_v18 = vld [vmem:[%s5398_s17 + $0x18] sm:$0xff]  ;;  %v492_v22 = vld [vmem:[%s5398_s17 + $0x28] sm:$0xff] }
  0x84   : > { %4416 = vmatprep.subr.mxu0 %v524_v6  ;;  %4693 = vmatprep.subr.mxu1 %v524_v6  ;;  %v506_v19 = vld [vmem:[%s5398_s17 + $0x98] sm:$0xff]  ;;  %v491_v20 = vld [vmem:[%s5398_s17 + $0x20] sm:$0xff]  ;;  %v508_v23 = vld [vmem:[%s5398_s17 + $0xa8] sm:$0xff] }
  0x85   : > { %4417 = vmatpush3.msra.mxu0 %v524_v6  ;;  %4701 = vmatpush3.msra.mxu1 %v524_v6  ;;  %v507_v21 = vld [vmem:[%s5398_s17 + $0xa0] sm:$0xff]  ;;  %v493_v24 = vld [vmem:[%s5398_s17 + $0x30] sm:$0xff]  ;;  %v494_v26 = vld [vmem:[%s5398_s17 + $0x38] sm:$0xff] }
  0x86   : > { %4418 = vmatprep.subr.mxu0 %v523_v7  ;;  %4694 = vmatprep.subr.mxu1 %v523_v7  ;;  %v509_v25 = vld [vmem:[%s5398_s17 + $0xb0] sm:$0xff]  ;;  %v510_v27 = vld [vmem:[%s5398_s17 + $0xb8] sm:$0xff]  ;;  %v495_v28 = vld [vmem:[%s5398_s17 + $0x40] sm:$0xff] }
  0x87   : > { %4419 = vmatpush3.msra.mxu0 %v523_v7  ;;  %4702 = vmatpush3.msra.mxu1 %v523_v7  ;;  %v511_v29 = vld [vmem:[%s5398_s17 + $0xc0] sm:$0xff]  ;;  %v496_v30 = vld [vmem:[%s5398_s17 + $0x48] sm:$0xff]  ;;  %v497_v32 = vld [vmem:[%s5398_s17 + $0x50] sm:$0xff] }
  0x88   : > { %4420 = vmatprep.subr.mxu0 %v522_v8  ;;  %4695 = vmatprep.subr.mxu1 %v522_v8  ;;  %v512_v31 = vld [vmem:[%s5398_s17 + $0xc8] sm:$0xff]  ;;  %v513_v33 = vld [vmem:[%s5398_s17 + $0xd0] sm:$0xff]  ;;  %v498_v34 = vld [vmem:[%s5398_s17 + $0x58] sm:$0xff] }
  0x89   : > { %4421 = vmatpush3.msra.mxu0 %v522_v8  ;;  %4703 = vmatpush3.msra.mxu1 %v522_v8  ;;  %v514_v35 = vld [vmem:[%s5398_s17 + $0xd8] sm:$0xff]  ;;  %v499_v36 = vld [vmem:[%s5398_s17 + $0x60] sm:$0xff]  ;;  %v500_v38 = vld [vmem:[%s5398_s17 + $0x68] sm:$0xff] }
  0x8a   : > { %4422 = vmatprep.subr.mxu0 %v521_v9  ;;  %4696 = vmatprep.subr.mxu1 %v521_v9  ;;  %v515_v37 = vld [vmem:[%s5398_s17 + $0xe0] sm:$0xff]  ;;  %v516_v39 = vld [vmem:[%s5398_s17 + $0xe8] sm:$0xff]  ;;  %v501_v40 = vld [vmem:[%s5398_s17 + $0x70] sm:$0xff] }
  0x8b   : > { %4423 = vmatpush3.msra.mxu0 %v521_v9  ;;  %4704 = vmatpush3.msra.mxu1 %v521_v9  ;;  %v517_v41 = vld [vmem:[%s5398_s17 + $0xf0] sm:$0xff]  ;;  %v502_v42 = vld [vmem:[%s5398_s17 + $0x78] sm:$0xff]  ;;  %v5526_v44 = vld [vmem:[%s7595_s4] ss:$0 sm:$0xff] }
  0x8c   : > { %4424 = vmatprep.subr.mxu0 %v520_v10  ;;  %4697 = vmatprep.subr.mxu1 %v520_v10  ;;  %v518_v43 = vld [vmem:[%s5398_s17 + $0xf8] sm:$0xff]  ;;  %s5562_s17 = scalar_lea.vmem [#allocation13], %s4064_s29 }
  0x8d   : > { %4425 = vmatpush3.msra.mxu0 %v520_v10  ;;  %4705 = vmatpush3.msra.mxu1 %v520_v10 }
  0x8e   : > { %4426 = vmatprep.subr.mxu0 %v519_v11  ;;  %4698 = vmatprep.subr.mxu1 %v519_v11 }
  0x8f   : > { %4427 = vmatpush3.msra.mxu0 %v519_v11  ;;  %4706 = vmatpush3.msra.mxu1 %v519_v11 }
  0x90   : > { %4428 = vmatprep.mubr.msk.f32.mxu0 %vm534_vm0, %v487_v12  ;;  %4452 = vmatprep.mubr.msk.f32.mxu1 %vm534_vm0, %v503_v13 }
  0x91   : > { %4429 = vmatmul.mubr.msk.f32.vlgmr.msra.gmra.mxu0 %vm534_vm0, %v488_v14  ;;  %4453 = vmatmul.mubr.msk.f32.vlgmr.msra.gmra.mxu1 %vm534_vm0, %v504_v15 }
  0x92   : > { %4431 = vmatprep.mubr.msk.f32.mxu0 %vm534_vm0, %v489_v16  ;;  %4455 = vmatprep.mubr.msk.f32.mxu1 %vm534_vm0, %v505_v17 }
  0x95   : > { %4432 = vmatmul.mubr.msk.f32.gmra.mxu0 %vm534_vm0, %v490_v18  ;;  %4456 = vmatmul.mubr.msk.f32.gmra.mxu1 %vm534_vm0, %v506_v19 }
  0x96   : > { %4434 = vmatprep.mubr.msk.f32.mxu0 %vm534_vm0, %v491_v20  ;;  %4458 = vmatprep.mubr.msk.f32.mxu1 %vm534_vm0, %v507_v21 }
  0x99   : > { %4435 = vmatmul.mubr.msk.f32.gmra.mxu0 %vm534_vm0, %v492_v22  ;;  %4459 = vmatmul.mubr.msk.f32.gmra.mxu1 %vm534_vm0, %v508_v23 }
  0x9a   : > { %4437 = vmatprep.mubr.msk.f32.mxu0 %vm534_vm0, %v493_v24  ;;  %4461 = vmatprep.mubr.msk.f32.mxu1 %vm534_vm0, %v509_v25 }
  0x9d   : > { %4438 = vmatmul.mubr.msk.f32.gmra.mxu0 %vm534_vm0, %v494_v26  ;;  %4462 = vmatmul.mubr.msk.f32.gmra.mxu1 %vm534_vm0, %v510_v27 }
  0x9e   : > { %4440 = vmatprep.mubr.msk.f32.mxu0 %vm534_vm0, %v495_v28  ;;  %4464 = vmatprep.mubr.msk.f32.mxu1 %vm534_vm0, %v511_v29 }
  0xa1   : > { %4441 = vmatmul.mubr.msk.f32.gmra.mxu0 %vm534_vm0, %v496_v30  ;;  %4465 = vmatmul.mubr.msk.f32.gmra.mxu1 %vm534_vm0, %v512_v31 }
  0xa2   : > { %4443 = vmatprep.mubr.msk.f32.mxu0 %vm534_vm0, %v497_v32  ;;  %4467 = vmatprep.mubr.msk.f32.mxu1 %vm534_vm0, %v513_v33 }
  0xa5   : > { %4444 = vmatmul.mubr.msk.f32.gmra.mxu0 %vm534_vm0, %v498_v34  ;;  %4468 = vmatmul.mubr.msk.f32.gmra.mxu1 %vm534_vm0, %v514_v35 }
  0xa6   : > { %4446 = vmatprep.mubr.msk.f32.mxu0 %vm534_vm0, %v499_v36  ;;  %4470 = vmatprep.mubr.msk.f32.mxu1 %vm534_vm0, %v515_v37 }
  0xa9   : > { %4447 = vmatmul.mubr.msk.f32.gmra.mxu0 %vm534_vm0, %v500_v38  ;;  %4471 = vmatmul.mubr.msk.f32.gmra.mxu1 %vm534_vm0, %v516_v39 }
  0xaa   : > { %4449 = vmatprep.mubr.msk.f32.mxu0 %vm534_vm0, %v501_v40  ;;  %4473 = vmatprep.mubr.msk.f32.mxu1 %vm534_vm0, %v517_v41 }
  0xad   : > { %4450 = vmatmul.mubr.msk.f32.gmra.mxu0 %vm534_vm0, %v502_v42  ;;  %4474 = vmatmul.mubr.msk.f32.gmra.mxu1 %vm534_vm0, %v518_v43 }
 0x151   : > { %v4430_v45 = vpop.f32.mrf.mxu0  ;;  %v4454_v46 = vpop.f32.mrf.mxu1 }
 0x152   : > { %v703_v47 = vadd.f32 %v4430_v45, %v5526_v44  ;;  %v783_v48 = vadd.f32 %v4454_v46, %v5526_v44 }
 0x153   : > { %v697_v49 = vpop.f32.mrf.mxu0  ;;  %v777_v50 = vpop.f32.mrf.mxu1 }
 0x154   : > { %857 = vst [vmem:[#allocation2 + $0x8] sm:$0xff] %v703_v47  ;;  %873 = vst [vmem:[#allocation2 + $0x88] sm:$0xff] %v783_v48  ;;  %v698_v51 = vadd.f32 %v5526_v44, %v697_v49  ;;  %v778_v52 = vadd.f32 %v5526_v44, %v777_v50  ;;  %v5564_v50 = vmov 0.0  }
 0x155   : > { %v4433_v53 = vpop.f32.mrf.mxu0  ;;  %v4457_v54 = vpop.f32.mrf.mxu1 }
 0x156   : > { %856 = vst [vmem:[#allocation2] sm:$0xff] %v698_v51  ;;  %872 = vst [vmem:[#allocation2 + $0x80] sm:$0xff] %v778_v52  ;;  %v713_v55 = vadd.f32 %v4433_v53, %v5526_v44  ;;  %v793_v56 = vadd.f32 %v4457_v54, %v5526_v44  ;;  %v5566_v51 = vmov 0.0  }
 0x157   : > { %v707_v57 = vpop.f32.mrf.mxu0  ;;  %v787_v58 = vpop.f32.mrf.mxu1 }
 0x158   : > { %859 = vst [vmem:[#allocation2 + $0x18] sm:$0xff] %v713_v55  ;;  %875 = vst [vmem:[#allocation2 + $0x98] sm:$0xff] %v793_v56  ;;  %v708_v59 = vadd.f32 %v5526_v44, %v707_v57  ;;  %v788_v60 = vadd.f32 %v5526_v44, %v787_v58 }
 0x159   : > { %v4436_v61 = vpop.f32.mrf.mxu0  ;;  %v4460_v62 = vpop.f32.mrf.mxu1 }
 0x15a   : > { %858 = vst [vmem:[#allocation2 + $0x10] sm:$0xff] %v708_v59  ;;  %874 = vst [vmem:[#allocation2 + $0x90] sm:$0xff] %v788_v60  ;;  %v723_v63 = vadd.f32 %v4436_v61, %v5526_v44  ;;  %v803_v4 = vadd.f32 %v4460_v62, %v5526_v44 }
 0x15b   : > { %v717_v5 = vpop.f32.mrf.mxu0  ;;  %v797_v6 = vpop.f32.mrf.mxu1 }
 0x15c   : > { %861 = vst [vmem:[#allocation2 + $0x28] sm:$0xff] %v723_v63  ;;  %877 = vst [vmem:[#allocation2 + $0xa8] sm:$0xff] %v803_v4  ;;  %v718_v7 = vadd.f32 %v5526_v44, %v717_v5  ;;  %v798_v8 = vadd.f32 %v5526_v44, %v797_v6 }
 0x15d   : > { %v4439_v9 = vpop.f32.mrf.mxu0  ;;  %v4463_v10 = vpop.f32.mrf.mxu1 }
 0x15e   : > { %860 = vst [vmem:[#allocation2 + $0x20] sm:$0xff] %v718_v7  ;;  %876 = vst [vmem:[#allocation2 + $0xa0] sm:$0xff] %v798_v8  ;;  %v733_v11 = vadd.f32 %v4439_v9, %v5526_v44  ;;  %v813_v12 = vadd.f32 %v4463_v10, %v5526_v44 }
 0x15f   : > { %v727_v13 = vpop.f32.mrf.mxu0  ;;  %v807_v14 = vpop.f32.mrf.mxu1 }
 0x160   : > { %863 = vst [vmem:[#allocation2 + $0x38] sm:$0xff] %v733_v11  ;;  %879 = vst [vmem:[#allocation2 + $0xb8] sm:$0xff] %v813_v12  ;;  %v728_v15 = vadd.f32 %v5526_v44, %v727_v13  ;;  %v808_v16 = vadd.f32 %v5526_v44, %v807_v14 }
 0x161   : > { %v4442_v17 = vpop.f32.mrf.mxu0  ;;  %v4466_v18 = vpop.f32.mrf.mxu1 }
 0x162   : > { %862 = vst [vmem:[#allocation2 + $0x30] sm:$0xff] %v728_v15  ;;  %878 = vst [vmem:[#allocation2 + $0xb0] sm:$0xff] %v808_v16  ;;  %v743_v19 = vadd.f32 %v4442_v17, %v5526_v44  ;;  %v823_v20 = vadd.f32 %v4466_v18, %v5526_v44 }
 0x163   : > { %v737_v21 = vpop.f32.mrf.mxu0  ;;  %v817_v22 = vpop.f32.mrf.mxu1 }
 0x164   : > { %865 = vst [vmem:[#allocation2 + $0x48] sm:$0xff] %v743_v19  ;;  %881 = vst [vmem:[#allocation2 + $0xc8] sm:$0xff] %v823_v20  ;;  %v738_v23 = vadd.f32 %v5526_v44, %v737_v21  ;;  %v818_v24 = vadd.f32 %v5526_v44, %v817_v22 }
 0x165   : > { %v4445_v25 = vpop.f32.mrf.mxu0  ;;  %v4469_v26 = vpop.f32.mrf.mxu1 }
 0x166   : > { %864 = vst [vmem:[#allocation2 + $0x40] sm:$0xff] %v738_v23  ;;  %880 = vst [vmem:[#allocation2 + $0xc0] sm:$0xff] %v818_v24  ;;  %v753_v27 = vadd.f32 %v4445_v25, %v5526_v44  ;;  %v833_v28 = vadd.f32 %v4469_v26, %v5526_v44 }
 0x167   : > { %v747_v29 = vpop.f32.mrf.mxu0  ;;  %v827_v30 = vpop.f32.mrf.mxu1 }
 0x168   : > { %867 = vst [vmem:[#allocation2 + $0x58] sm:$0xff] %v753_v27  ;;  %883 = vst [vmem:[#allocation2 + $0xd8] sm:$0xff] %v833_v28  ;;  %v748_v31 = vadd.f32 %v5526_v44, %v747_v29  ;;  %v828_v32 = vadd.f32 %v5526_v44, %v827_v30 }
 0x169   : > { %v4448_v33 = vpop.f32.mrf.mxu0  ;;  %v4472_v34 = vpop.f32.mrf.mxu1 }
 0x16a   : > { %866 = vst [vmem:[#allocation2 + $0x50] sm:$0xff] %v748_v31  ;;  %882 = vst [vmem:[#allocation2 + $0xd0] sm:$0xff] %v828_v32  ;;  %v763_v35 = vadd.f32 %v4448_v33, %v5526_v44  ;;  %v843_v36 = vadd.f32 %v4472_v34, %v5526_v44 }
 0x16b   : > { %v757_v37 = vpop.f32.mrf.mxu0  ;;  %v837_v38 = vpop.f32.mrf.mxu1 }
 0x16c   : > { %869 = vst [vmem:[#allocation2 + $0x68] sm:$0xff] %v763_v35  ;;  %885 = vst [vmem:[#allocation2 + $0xe8] sm:$0xff] %v843_v36  ;;  %v758_v39 = vadd.f32 %v5526_v44, %v757_v37  ;;  %v838_v40 = vadd.f32 %v5526_v44, %v837_v38 }
 0x16d   : > { %v4451_v41 = vpop.f32.mrf.mxu0  ;;  %v4475_v42 = vpop.f32.mrf.mxu1 }
 0x16e   : > { %868 = vst [vmem:[#allocation2 + $0x60] sm:$0xff] %v758_v39  ;;  %884 = vst [vmem:[#allocation2 + $0xe0] sm:$0xff] %v838_v40  ;;  %v773_v43 = vadd.f32 %v4451_v41, %v5526_v44  ;;  %v853_v45 = vadd.f32 %v4475_v42, %v5526_v44 }
 0x16f   : > { %v767_v46 = vpop.f32.mrf.mxu0  ;;  %v847_v47 = vpop.f32.mrf.mxu1 }
 0x170   : > { %871 = vst [vmem:[#allocation2 + $0x78] sm:$0xff] %v773_v43  ;;  %887 = vst [vmem:[#allocation2 + $0xf8] sm:$0xff] %v853_v45  ;;  %v768_v48 = vadd.f32 %v5526_v44, %v767_v46  ;;  %v848_v49 = vadd.f32 %v5526_v44, %v847_v47 }
 0x172   : > { %870 = vst [vmem:[#allocation2 + $0x70] sm:$0xff] %v768_v48  ;;  %886 = vst [vmem:[#allocation2 + $0xf0] sm:$0xff] %v848_v49 }
 0x173 LB: >> { %v5141_v44 = vmov 0.0   ;;  %vm5142_vm1 = vmmov 0   ;;  %s5143_s29 = smov 32   ;;  %vm907_vm2 = vcmask 261120   ;;  %s4101_s22 = sshll.u32 %s5133_s30, 5  ;;  %vm1010_vm3 = vcmask 130048   ;;  %s5133_s30 = sphi %s5568_s30, %s897_s30   ;;  %v5129_v51 = vphi %v5566_v51, %v1347_v51   ;;  %v5125_v50 = vphi %v5564_v50, %v1341_v50  }
 0x174   : >> { %4476 = vmatprep.subr.mxu0 %v5141_v44  ;;  %4484 = vmatprep.mubr.msk.f32.mxu0 %vm5142_vm1, %v5141_v44  ;;  %s5609_s7 = scalar_lea.vmem [#allocation2], %s4101_s22  ;;  %s5144_s19 = smov 64  }
 0x175   : >> { %905 = vrot.lane.b32.xlu0 %v5129_v51, %s5143_s29  ;;  %4477 = vmatpush3.msra.mxu0 %v5433_v3  ;;  %s5619_s24 = scalar_lea.vmem [#allocation3], %s4101_s22  ;;  %s5145_s23 = smov 16  }
 0x176   : >> { %4478 = vmatprep.subr.mxu0 %v5141_v44  ;;  %4487 = vmatprep.subr.mxu1 %v5141_v44  ;;  %s4100_s12 = sshll.u32 %s5133_s30, 2  ;;  %s897_s30 = sadd.s32 1, %s5133_s30  }
 0x177   : >> { %4479 = vmatpush3.msra.mxu0 %v5431_v2  ;;  %4488 = vmatpush3.msra.mxu1 %v5433_v3  ;;  %s1012_s28 = ssub.s32 31, %s4100_s12  ;;  %s1126_s14 = ssub.s32 30, %s4100_s12 }
 0x178   : >> { %4480 = vmatprep.subr.mxu0 %v5141_v44  ;;  %4489 = vmatprep.subr.mxu1 %v5141_v44  ;;  %s4104_s13 = sshll.u32 %s1012_s28, 3  ;;  %s1240_s27 = ssub.s32 29, %s4100_s12 }
 0x179   : >> { %4481 = vmatpush3.msra.mxu0 %v5429_v1  ;;  %4490 = vmatpush3.msra.mxu1 %v5431_v2  ;;  %v903_v53 = vld [vmem:[%s5609_s7] sm:$0xff]  ;;  %v4107_v11 = vld [vmem:[%s5609_s7 + $0x8] sm:$0xff]  ;;  %v4116_v29 = vld [vmem:[%s5609_s7 + $0x10] sm:$0xff]  ;;  %s1017_s3 = scalar_lea.vmem [#allocation4], %s4104_s13  ;;  %s4113_s16 = sshll.u32 %s1126_s14, 3 }
 0x17a   : >> { %4482 = vmatprep.subr.mxu0 %v5141_v44  ;;  %4491 = vmatprep.subr.mxu1 %v5141_v44  ;;  %v4125_v48 = vld [vmem:[%s5609_s7 + $0x18] sm:$0xff]  ;;  %s4122_s22 = sshll.u32 %s1240_s27, 3  ;;  %s1131_s7 = scalar_lea.vmem [#allocation4], %s4113_s16 }
 0x17b   : >> { %4483 = vmatpush3.msra.mxu0 %v5427_v0  ;;  %4492 = vmatpush3.msra.mxu1 %v5429_v1  ;;  %s1245_s28 = scalar_lea.vmem [#allocation4], %s4122_s22  ;;  %p894_p10 = scmp.ge.s32.totalorder %s897_s30, 8  }
 0x17c   : >> { %4493 = vmatprep.subr.mxu1 %v5141_v44  ;;  %4495 = vmatprep.mubr.msk.f32.mxu1 %vm5142_vm1, %v5141_v44  ;;  %vm2072_vm4 = vcmask (%p894_p10), 31744   ;;  %s5146_s22 = smov (%p894_p10), 8   ;;  %vm3454_vm5 = vcmask (%p894_p10), 64512   ;;  %vm3487_vm6 = vcmask (%p894_p10), 97280   ;;  %vm3552_vm7 = vcmask (%p894_p10), 162816   ;;  %p7834_p11 = scmp.ne.s32.totalorder (%p894_p10), %s7653_s15, 0 }
 0x17d   : >> { %4494 = vmatpush3.msra.mxu1 %v5427_v0  ;;  %4498 = vmatprep.subr.mxu0 %v5141_v44  ;;  %vm3585_vm8 = vcmask (%p894_p10), 195584   ;;  %vm3618_vm9 = vcmask (%p894_p10), 228352   ;;  %vm5154_vm10 = vmmov (%p894_p10), 0  }
 0x17e   : >> { %4509 = vmatprep.subr.mxu1 %v5141_v44 }
 0x1e7   : >> { %v906_v52 = vpop.permute.xlu0 %905 }
 0x1e8   : >> { %4485 = vmatmul.mubr.msk.f32.vlgmr.msra.gmra.mxu0 %vm907_vm2, %v906_v52 }
 0x1e9   : >> { %4499 = vmatpush3.msra.mxu0 %v5433_v3  ;;  %4506 = vmatprep.mubr.msk.f32.mxu0 %vm5142_vm1, %v5141_v44 }
 0x1ea   : >> { %4500 = vmatprep.subr.mxu0 %v5141_v44 }
 0x1eb   : >> { %4501 = vmatpush3.msra.mxu0 %v5431_v2 }
 0x1ec   : >> { %4502 = vmatprep.subr.mxu0 %v5141_v44 }
 0x1ed   : >> { %4503 = vmatpush3.msra.mxu0 %v5429_v1 }
 0x1ee   : >> { %4504 = vmatprep.subr.mxu0 %v5141_v44 }
 0x1ef   : >> { %4505 = vmatpush3.msra.mxu0 %v5427_v0 }
 0x2a8   : >> { %v976_v54 = vpop.f32.mrf.mxu0 }
 0x2a9   : >> { %v980_v55 = vadd.f32 %v976_v54, %v903_v53 }
 0x2aa   : >> { %v4486_v56 = vpop.f32.mrf.mxu0 }
 0x2ab   : >> { %4823 = vtanh.f32 %v980_v55  ;;  %v4103_v58 = vmul.f32 -1.442695, %v980_v55 }
 0x2ad   : >> { %4825 = vpow2.f32 %v4103_v58 }
 0x2b8   : >> { %v4824_v57 = vpop.eup %4823 }
 0x2b9   : >> { %990 = vrot.lane.b32.xlu0 %v4824_v57, %s5144_s19 }
 0x2ba   : >> { %v4826_v59 = vpop.eup %4825 }
 0x2bb   : >> { %v984_v60 = vadd.f32 1.0, %v4826_v59 }
 0x2bd   : >> { %4827 = vrcp.f32 %v984_v60 }
 0x2ca   : >> { %v4828_v61 = vpop.eup %4827 }
 0x2cb   : >> { %v988_v4 = vmul.f32 %v5125_v50, %v4828_v61 }
 0x32b   : >> { %v991_v62 = vpop.permute.xlu0 %990 }
 0x32c   : >> { %v993_v63 = vmul.f32 %v4828_v61, %v991_v62 }
 0x32e   : >> { %995 = vrot.lane.b32.xlu1 %v993_v63, %s5143_s29 }
 0x3a0   : >> { %v996_v5 = vpop.permute.xlu1 %995 }
 0x3a1   : >> { %v998_v6 = vadd.f32 %v996_v5, %v988_v4 }
 0x3a3   : >> { %4829 = vtanh.f32 %v998_v6 }
 0x3b0   : >> { %v4830_v7 = vpop.eup %4829 }
 0x3b1   : >> { %1001 = vrot.lane.b32.xlu1 %v4830_v7, %s5144_s19  ;;  %v1428_v7 = vld [vmem:[%s7597_s6 + $0x8] sm:$0xff] (%p894_p10) }
 0x3b2   : > { %4520 = vmatprep.subr.mxu0 (%p894_p10), %v1428_v7 }
 0x423   : >> { %v1002_v8 = vpop.permute.xlu1 %1001 }
 0x424   : >> { %v5615_v9 = vmul.f32 %v4828_v61, %v1002_v8  ;;  %v1427_v8 = vld [vmem:[%s7597_s6] sm:$0xff] (%p894_p10) }
 0x426   : >> { %1006 = vrot.lane.b32.xlu0 %v5615_v9, %s5143_s29 }
 0x498   : >> { %v1007_v10 = vpop.permute.xlu0 %1006 }
 0x499   : >> { %1011 = vst.msk [vmem:[%s5619_s24] sm:$0xff] %vm1010_vm3, %v1007_v10  ;;  %4496 = vmatmul.mubr.msk.f32.vlgmr.msra.gmra.mxu1 %vm907_vm2, %v1007_v10 }
 0x49a   : >> { %4510 = vmatpush3.msra.mxu1 %v5433_v3  ;;  %4517 = vmatprep.mubr.msk.f32.mxu1 %vm5142_vm1, %v5141_v44 }
 0x49b   : >> { %4511 = vmatprep.subr.mxu1 %v5141_v44 }
 0x49c   : >> { %4512 = vmatpush3.msra.mxu1 %v5431_v2 }
 0x49d   : >> { %4513 = vmatprep.subr.mxu1 %v5141_v44 }
 0x49e   : >> { %4514 = vmatpush3.msra.mxu1 %v5429_v1  ;;  %v1393_v1 = vld [vmem:[%s7596_s5] sm:$0xff] (%p894_p10) }
 0x49f   : >> { %4515 = vmatprep.subr.mxu1 %v5141_v44 }
 0x4a0   : >> { %4516 = vmatpush3.msra.mxu1 %v5427_v0 }
 0x4a1   : > { %4707 = vmatprep.subr.mxu1 (%p894_p10), %v1428_v7 }
 0x559   : >> { %v1091_v12 = vpop.f32.mrf.mxu1 }
 0x55a   : >> { %v1095_v13 = vadd.f32 %v4107_v11, %v1091_v12  ;;  %v1394_v11 = vld [vmem:[%s7596_s5 + $0x8] sm:$0xff] (%p894_p10) }
 0x55b   : >> { %v4497_v14 = vpop.f32.mrf.mxu1 }
 0x55c   : >> { %4831 = vtanh.f32 %v1095_v13  ;;  %v4109_v16 = vmul.f32 -1.442695, %v1095_v13 }
 0x55e   : >> { %4833 = vpow2.f32 %v4109_v16 }
 0x569   : >> { %v4832_v15 = vpop.eup %4831 }
 0x56a   : >> { %1105 = vrot.lane.b32.xlu1 %v4832_v15, %s5144_s19 }
 0x56b   : >> { %v4834_v17 = vpop.eup %4833 }
 0x56c   : >> { %v1099_v18 = vadd.f32 1.0, %v4834_v17 }
 0x56e   : >> { %4835 = vrcp.f32 %v1099_v18 }
 0x57b   : >> { %v4836_v19 = vpop.eup %4835 }
 0x57c   : >> { %v1103_v22 = vmul.f32 %v4836_v19, %v998_v6 }
 0x5dc   : >> { %v1106_v20 = vpop.permute.xlu1 %1105 }
 0x5dd   : >> { %v1108_v21 = vmul.f32 %v4836_v19, %v1106_v20 }
 0x5df   : >> { %1110 = vrot.lane.b32.xlu0 %v1108_v21, %s5143_s29 }
 0x651   : >> { %v1111_v23 = vpop.permute.xlu0 %1110 }
 0x652   : >> { %v1113_v24 = vadd.f32 %v1111_v23, %v1103_v22 }
 0x654   : >> { %4837 = vtanh.f32 %v1113_v24 }
 0x661   : >> { %v4838_v25 = vpop.eup %4837 }
 0x662   : >> { %1116 = vrot.lane.b32.xlu1 %v4838_v25, %s5144_s19 }
 0x6d4   : >> { %v1117_v26 = vpop.permute.xlu1 %1116 }
 0x6d5   : >> { %v5637_v27 = vmul.f32 %v4836_v19, %v1117_v26 }
 0x6d7   : >> { %1121 = vrot.lane.b32.xlu0 %v5637_v27, %s5143_s29 }
 0x749   : >> { %v1122_v28 = vpop.permute.xlu0 %1121 }
 0x74a   : >> { %4112 = vst.msk [vmem:[%s5619_s24 + $0x8] sm:$0xff] %vm1010_vm3, %v1122_v28  ;;  %4507 = vmatmul.mubr.msk.f32.vlgmr.msra.gmra.mxu0 %vm907_vm2, %v1122_v28 }
 0x74b   : > { %4521 = vmatpush3.msra.mxu0 (%p894_p10), %v1428_v7 }
 0x74c   : > { %4522 = vmatprep.subr.mxu0 (%p894_p10), %v1427_v8 }
 0x74d   : > { %4523 = vmatpush3.msra.mxu0 (%p894_p10), %v1427_v8 }
 0x80a   : >> { %v1205_v30 = vpop.f32.mrf.mxu0 }
 0x80b   : >> { %v1209_v31 = vadd.f32 %v4116_v29, %v1205_v30 }
 0x80c   : >> { %v4508_v32 = vpop.f32.mrf.mxu0 }
 0x80d   : >> { %4839 = vtanh.f32 %v1209_v31  ;;  %v4118_v34 = vmul.f32 -1.442695, %v1209_v31 }
 0x80f   : >> { %4841 = vpow2.f32 %v4118_v34 }
 0x81a   : >> { %v4840_v33 = vpop.eup %4839 }
 0x81b   : >> { %1219 = vrot.lane.b32.xlu1 %v4840_v33, %s5144_s19 }
 0x81c   : >> { %v4842_v35 = vpop.eup %4841 }
 0x81d   : >> { %v1213_v36 = vadd.f32 1.0, %v4842_v35 }
 0x81f   : >> { %4843 = vrcp.f32 %v1213_v36 }
 0x82c   : >> { %v4844_v37 = vpop.eup %4843 }
 0x82d   : >> { %v1217_v40 = vmul.f32 %v4844_v37, %v1113_v24 }
 0x88d   : >> { %v1220_v38 = vpop.permute.xlu1 %1219 }
 0x88e   : >> { %v1222_v39 = vmul.f32 %v4844_v37, %v1220_v38 }
 0x890   : >> { %1224 = vrot.lane.b32.xlu0 %v1222_v39, %s5143_s29 }
 0x902   : >> { %v1225_v41 = vpop.permute.xlu0 %1224 }
 0x903   : >> { %v1227_v42 = vadd.f32 %v1225_v41, %v1217_v40 }
 0x905   : >> { %4845 = vtanh.f32 %v1227_v42 }
 0x912   : >> { %v4846_v43 = vpop.eup %4845 }
 0x913   : >> { %1230 = vrot.lane.b32.xlu1 %v4846_v43, %s5144_s19 }
 0x985   : >> { %v1231_v45 = vpop.permute.xlu1 %1230 }
 0x986   : >> { %v1233_v46 = vmul.f32 %v4844_v37, %v1231_v45 }
 0x988   : >> { %1235 = vrot.lane.b32.xlu0 %v1233_v46, %s5143_s29 }
 0x9fa   : >> { %v1236_v47 = vpop.permute.xlu0 %1235 }
 0x9fb   : >> { %4121 = vst.msk [vmem:[%s5619_s24 + $0x10] sm:$0xff] %vm1010_vm3, %v1236_v47  ;;  %4518 = vmatmul.mubr.msk.f32.vlgmr.msra.gmra.mxu1 %vm907_vm2, %v1236_v47 }
 0x9fc   : > { %4709 = vmatpush3.msra.mxu1 (%p894_p10), %v1428_v7 }
 0x9fd   : > { %4708 = vmatprep.subr.mxu1 (%p894_p10), %v1427_v8 }
 0x9fe   : > { %4710 = vmatpush3.msra.mxu1 (%p894_p10), %v1427_v8 }
 0x9ff   : > { %4572 = vmatprep.subr.mxu1 (%p894_p10), %v1394_v11 }
 0xabb   : >> { %v1319_v49 = vpop.f32.mrf.mxu1 }
 0xabc   : >> { %v1323_v50 = vadd.f32 %v4125_v48, %v1319_v49 }
 0xabd   : >> { %v4519_v51 = vpop.f32.mrf.mxu1 }
 0xabe   : >> { %4847 = vtanh.f32 %v1323_v50  ;;  %v4127_v52 = vmul.f32 -1.442695, %v1323_v50 }
 0xac0   : >> { %4849 = vpow2.f32 %v4127_v52 }
 0xacb   : >> { %v4848_v44 = vpop.eup %4847 }
 0xacc   : >> { %1333 = vrot.lane.b32.xlu1 %v4848_v44, %s5144_s19 }
 0xacd   : >> { %v4850_v53 = vpop.eup %4849 }
 0xace   : >> { %v1327_v54 = vadd.f32 1.0, %v4850_v53 }
 0xad0   : >> { %4851 = vrcp.f32 %v1327_v54 }
 0xadd   : >> { %v4852_v55 = vpop.eup %4851 }
 0xade   : >> { %v1331_v58 = vmul.f32 %v4852_v55, %v1227_v42 }
 0xb3e   : >> { %v1334_v56 = vpop.permute.xlu1 %1333 }
 0xb3f   : >> { %v1336_v57 = vmul.f32 %v4852_v55, %v1334_v56 }
 0xb41   : >> { %1338 = vrot.lane.b32.xlu0 %v1336_v57, %s5143_s29 }
 0xb45   : >> { %1014 = vrot.lane.b32.xlu0 %v5615_v9, %s5145_s23 }
 0xb49   : >> { %1242 = vrot.lane.b32.xlu0 %v1233_v46, %s5145_s23 }
 0xbb3   : >> { %v1339_v59 = vpop.permute.xlu0 %1338 }
 0xbb4   : >> { %v1341_v50 = vadd.f32 %v1339_v59, %v1331_v58  }
 0xbb6   : >> { %4853 = vtanh.f32 %v1341_v50 }
 0xbb7   : >> { %v1015_v60 = vpop.permute.xlu0 %1014 }
 0xbb8   : >> { %1018 = vst.msk [vmem:[%s1017_s3] sm:$0xff] %vm1010_vm3, %v1015_v60 }
 0xbbb   : >> { %v1243_v4 = vpop.permute.xlu0 %1242 }
 0xbc3   : >> { %v4854_v61 = vpop.eup %4853 }
 0xbc4   : >> { %1344 = vrot.lane.b32.xlu1 %v4854_v61, %s5144_s19  ;;  %s1354_s19 = ssub.s32 28, %s4100_s12 }
 0xbc5   : >> { %s4131_s13 = sshll.u32 %s1354_s19, 3  ;;  %s5149_s19 = smov (%p894_p10), 16  }
 0xbc6   : >> { %s1359_s3 = scalar_lea.vmem [#allocation4], %s4131_s13  ;;  %s5151_s13 = smov (%p894_p10), 24  }
 0xbc8   : >> { %1128 = vrot.lane.b32.xlu1 %v5637_v27, %s5145_s23 }
 0xc36   : >> { %v1345_v62 = vpop.permute.xlu1 %1344 }
 0xc37   : >> { %v1347_v51 = vmul.f32 %v4852_v55, %v1345_v62  }
 0xc39   : >> { %1356 = vrot.lane.b32.xlu0 %v1347_v51, %s5145_s23  ;;  %1349 = vrot.lane.b32.xlu1 %v1347_v51, %s5143_s29  ;;  %s5155_s29 = smov (%p894_p10), [#allocation13]  }
 0xc3a   : >> { %v1129_v63 = vpop.permute.xlu1 %1128  ;;  %s5037_s23 = sshll.u32 (%p894_p10), %s5155_s29, 4  ;;  %s5038_s23 = int_to_ptr.vmem [resolvable:$false] %s5037_s23 }
 0xc3b   : >> { %1132 = vst.msk [vmem:[%s1131_s7] sm:$0xff] %vm1010_vm3, %v1129_v63  ;;  %s5147_s7 = smov (%p894_p10), 4  }
 0xc3c   : >> { %1246 = vst.msk [vmem:[%s1245_s28] sm:$0xff] %vm1010_vm3, %v1243_v4  ;;  %s5148_s28 = smov (%p894_p10), 12  }
 0xca8   : > { %896 = sbr.rel (!%p894_p10) target bundleno = 371 (0x173), region = 157 }
 0xcab   : >> { %v1357_v5 = vpop.permute.xlu0 %1356  ;;  %v1350_v6 = vpop.permute.xlu1 %1349 }
 0xcac   : >> { %1360 = vst.msk [vmem:[%s1359_s3] sm:$0xff] %vm1010_vm3, %v1357_v5  ;;  %4130 = vst.msk [vmem:[%s5619_s24 + $0x18] sm:$0xff] %vm1010_vm3, %v1350_v6  ;;  %s5152_s3 = smov (%p894_p10), 28  }
 0xcb3   : > { %v1413_v9 = vld [vmem:[#allocation4 + $0x90] sm:$0xff]  ;;  %v1414_v10 = vld [vmem:[#allocation4 + $0x98] sm:$0xff]  ;;  %v1415_v0 = vld [vmem:[#allocation4 + $0xa0] sm:$0xff] }
 0xcb4   : > { %4551 = vmatprep.mubr.msk.f32.mxu1 %vm1010_vm3, %v1413_v9  ;;  %v1416_v2 = vld [vmem:[#allocation4 + $0xa8] sm:$0xff]  ;;  %v1395_v3 = vld [vmem:[#allocation4] sm:$0xff]  ;;  %v1417_v13 = vld [vmem:[#allocation4 + $0xb0] sm:$0xff] }
 0xcb5   : > { %4552 = vmatmul.mubr.msk.f32.vlgmr.msra.gmra.mxu1 %vm1010_vm3, %v1414_v10  ;;  %v1396_v12 = vld [vmem:[#allocation4 + $0x8] sm:$0xff]  ;;  %v1397_v14 = vld [vmem:[#allocation4 + $0x10] sm:$0xff]  ;;  %4524 = vmatprep.mubr.msk.f32.mxu0 %vm1010_vm3, %v1395_v3  ;;  %v1418_v15 = vld [vmem:[#allocation4 + $0xb8] sm:$0xff] }
 0xcb6   : > { %4573 = vmatpush3.msra.mxu1 %v1394_v11  ;;  %4554 = vmatprep.mubr.msk.f32.mxu1 %vm1010_vm3, %v1415_v0  ;;  %v1398_v16 = vld [vmem:[#allocation4 + $0x18] sm:$0xff]  ;;  %v1419_v17 = vld [vmem:[#allocation4 + $0xc0] sm:$0xff]  ;;  %v1420_v19 = vld [vmem:[#allocation4 + $0xc8] sm:$0xff] }
 0xcb7   : > { %4574 = vmatprep.subr.mxu1 %v1393_v1  ;;  %4525 = vmatmul.mubr.msk.f32.vlgmr.msra.gmra.mxu0 %vm1010_vm3, %v1396_v12  ;;  %v1399_v18 = vld [vmem:[#allocation4 + $0x20] sm:$0xff]  ;;  %v1400_v20 = vld [vmem:[#allocation4 + $0x28] sm:$0xff]  ;;  %v1421_v21 = vld [vmem:[#allocation4 + $0xd0] sm:$0xff] }
 0xcb8   : > { %4575 = vmatpush3.msra.mxu1 %v1393_v1  ;;  %4527 = vmatprep.mubr.msk.f32.mxu0 %vm1010_vm3, %v1397_v14  ;;  %v1401_v22 = vld [vmem:[#allocation4 + $0x30] sm:$0xff]  ;;  %v1422_v23 = vld [vmem:[#allocation4 + $0xd8] sm:$0xff]  ;;  %v1423_v25 = vld [vmem:[#allocation4 + $0xe0] sm:$0xff] }
 0xcb9   : > { %4555 = vmatmul.mubr.msk.f32.gmra.mxu1 %vm1010_vm3, %v1416_v2  ;;  %v1402_v24 = vld [vmem:[#allocation4 + $0x38] sm:$0xff]  ;;  %v1403_v26 = vld [vmem:[#allocation4 + $0x40] sm:$0xff]  ;;  %v1424_v27 = vld [vmem:[#allocation4 + $0xe8] sm:$0xff] }
 0xcba   : > { %4557 = vmatprep.mubr.msk.f32.mxu1 %vm1010_vm3, %v1417_v13  ;;  %v1404_v28 = vld [vmem:[#allocation4 + $0x48] sm:$0xff]  ;;  %v1425_v29 = vld [vmem:[#allocation4 + $0xf0] sm:$0xff]  ;;  %v1426_v31 = vld [vmem:[#allocation4 + $0xf8] sm:$0xff] }
 0xcbb   : > { %4528 = vmatmul.mubr.msk.f32.gmra.mxu0 %vm1010_vm3, %v1398_v16  ;;  %v1405_v30 = vld [vmem:[#allocation4 + $0x50] sm:$0xff]  ;;  %v1406_v32 = vld [vmem:[#allocation4 + $0x58] sm:$0xff]  ;;  %v1361_v33 = vld [vmem:[#allocation3] sm:$0xff] }
 0xcbc   : > { %4530 = vmatprep.mubr.msk.f32.mxu0 %vm1010_vm3, %v1399_v18  ;;  %v1407_v34 = vld [vmem:[#allocation4 + $0x60] sm:$0xff]  ;;  %v1362_v35 = vld [vmem:[#allocation3 + $0x8] sm:$0xff]  ;;  %v1363_v37 = vld [vmem:[#allocation3 + $0x10] sm:$0xff] }
 0xcbd   : > { %4558 = vmatmul.mubr.msk.f32.gmra.mxu1 %vm1010_vm3, %v1418_v15  ;;  %v1408_v36 = vld [vmem:[#allocation4 + $0x68] sm:$0xff]  ;;  %v1409_v38 = vld [vmem:[#allocation4 + $0x70] sm:$0xff]  ;;  %v1364_v39 = vld [vmem:[#allocation3 + $0x18] sm:$0xff] }
 0xcbe   : > { %4560 = vmatprep.mubr.msk.f32.mxu1 %vm1010_vm3, %v1419_v17  ;;  %v1410_v40 = vld [vmem:[#allocation4 + $0x78] sm:$0xff]  ;;  %v1365_v41 = vld [vmem:[#allocation3 + $0x20] sm:$0xff]  ;;  %v1366_v43 = vld [vmem:[#allocation3 + $0x28] sm:$0xff] }
 0xcbf   : > { %4531 = vmatmul.mubr.msk.f32.gmra.mxu0 %vm1010_vm3, %v1400_v20  ;;  %v1411_v42 = vld [vmem:[#allocation4 + $0x80] sm:$0xff]  ;;  %v1412_v45 = vld [vmem:[#allocation4 + $0x88] sm:$0xff]  ;;  %v1367_v46 = vld [vmem:[#allocation3 + $0x30] sm:$0xff] }
 0xcc0   : > { %4533 = vmatprep.mubr.msk.f32.mxu0 %vm1010_vm3, %v1401_v22  ;;  %v1368_v47 = vld [vmem:[#allocation3 + $0x38] sm:$0xff]  ;;  %v1369_v48 = vld [vmem:[#allocation3 + $0x40] sm:$0xff]  ;;  %v1370_v49 = vld [vmem:[#allocation3 + $0x48] sm:$0xff] }
 0xcc1   : > { %4561 = vmatmul.mubr.msk.f32.gmra.mxu1 %vm1010_vm3, %v1420_v19  ;;  %v1371_v50 = vld [vmem:[#allocation3 + $0x50] sm:$0xff]  ;;  %v1372_v51 = vld [vmem:[#allocation3 + $0x58] sm:$0xff]  ;;  %v1373_v44 = vld [vmem:[#allocation3 + $0x60] sm:$0xff] }
 0xcc2   : > { %4563 = vmatprep.mubr.msk.f32.mxu1 %vm1010_vm3, %v1421_v21  ;;  %v1374_v52 = vld [vmem:[#allocation3 + $0x68] sm:$0xff]  ;;  %v1375_v53 = vld [vmem:[#allocation3 + $0x70] sm:$0xff]  ;;  %v1376_v54 = vld [vmem:[#allocation3 + $0x78] sm:$0xff] }
 0xcc3   : > { %4534 = vmatmul.mubr.msk.f32.gmra.mxu0 %vm1010_vm3, %v1402_v24  ;;  %v1377_v55 = vld [vmem:[#allocation3 + $0x80] sm:$0xff]  ;;  %v1378_v56 = vld [vmem:[#allocation3 + $0x88] sm:$0xff]  ;;  %v1379_v57 = vld [vmem:[#allocation3 + $0x90] sm:$0xff] }
 0xcc4   : > { %4536 = vmatprep.mubr.msk.f32.mxu0 %vm1010_vm3, %v1403_v26  ;;  %v1380_v58 = vld [vmem:[#allocation3 + $0x98] sm:$0xff]  ;;  %v1381_v59 = vld [vmem:[#allocation3 + $0xa0] sm:$0xff]  ;;  %v1382_v60 = vld [vmem:[#allocation3 + $0xa8] sm:$0xff] }
 0xcc5   : > { %4564 = vmatmul.mubr.msk.f32.gmra.mxu1 %vm1010_vm3, %v1422_v23  ;;  %v1383_v61 = vld [vmem:[#allocation3 + $0xb0] sm:$0xff]  ;;  %v1384_v62 = vld [vmem:[#allocation3 + $0xb8] sm:$0xff]  ;;  %v1385_v63 = vld [vmem:[#allocation3 + $0xc0] sm:$0xff] }
 0xcc6   : > { %4566 = vmatprep.mubr.msk.f32.mxu1 %vm1010_vm3, %v1423_v25  ;;  %v1386_v4 = vld [vmem:[#allocation3 + $0xc8] sm:$0xff]  ;;  %v1387_v5 = vld [vmem:[#allocation3 + $0xd0] sm:$0xff]  ;;  %v1388_v6 = vld [vmem:[#allocation3 + $0xd8] sm:$0xff] }
 0xcc7   : > { %4537 = vmatmul.mubr.msk.f32.gmra.mxu0 %vm1010_vm3, %v1404_v28  ;;  %v1389_v7 = vld [vmem:[#allocation3 + $0xe0] sm:$0xff]  ;;  %v1390_v8 = vld [vmem:[#allocation3 + $0xe8] sm:$0xff]  ;;  %v1391_v9 = vld [vmem:[#allocation3 + $0xf0] sm:$0xff] }
 0xcc8   : > { %4539 = vmatprep.mubr.msk.f32.mxu0 %vm1010_vm3, %v1405_v30  ;;  %v1392_v10 = vld [vmem:[#allocation3 + $0xf8] sm:$0xff] }
 0xcc9   : > { %4567 = vmatmul.mubr.msk.f32.gmra.mxu1 %vm1010_vm3, %v1424_v27 }
 0xcca   : > { %4569 = vmatprep.mubr.msk.f32.mxu1 %vm1010_vm3, %v1425_v29 }
 0xccb   : > { %4540 = vmatmul.mubr.msk.f32.gmra.mxu0 %vm1010_vm3, %v1406_v32 }
 0xccc   : > { %4542 = vmatprep.mubr.msk.f32.mxu0 %vm1010_vm3, %v1407_v34 }
 0xccd   : > { %4570 = vmatmul.mubr.msk.f32.gmra.mxu1 %vm1010_vm3, %v1426_v31 }
 0xcce   : > { %4576 = vmatprep.mubr.msk.f32.mxu1 %vm1010_vm3, %v1361_v33 }
 0xccf   : > { %4543 = vmatmul.mubr.msk.f32.gmra.mxu0 %vm1010_vm3, %v1408_v36 }
 0xcd0   : > { %4545 = vmatprep.mubr.msk.f32.mxu0 %vm1010_vm3, %v1409_v38 }
 0xcd1   : > { %4577 = vmatmul.mubr.msk.f32.vlgmr.msra.gmra.mxu1 %vm1010_vm3, %v1362_v35 }
 0xcd2   : > { %4579 = vmatprep.mubr.msk.f32.mxu1 %vm1010_vm3, %v1363_v37 }
 0xcd3   : > { %4546 = vmatmul.mubr.msk.f32.gmra.mxu0 %vm1010_vm3, %v1410_v40 }
 0xcd4   : > { %4548 = vmatprep.mubr.msk.f32.mxu0 %vm1010_vm3, %v1411_v42 }
 0xcd5   : > { %4580 = vmatmul.mubr.msk.f32.gmra.mxu1 %vm1010_vm3, %v1364_v39 }
 0xcd6   : > { %4582 = vmatprep.mubr.msk.f32.mxu1 %vm1010_vm3, %v1365_v41 }
 0xcd7   : > { %4549 = vmatmul.mubr.msk.f32.gmra.mxu0 %vm1010_vm3, %v1412_v45 }
 0xcd9   : > { %4583 = vmatmul.mubr.msk.f32.gmra.mxu1 %vm1010_vm3, %v1366_v43 }
 0xcda   : > { %4585 = vmatprep.mubr.msk.f32.mxu1 %vm1010_vm3, %v1367_v46 }
 0xcdd   : > { %4586 = vmatmul.mubr.msk.f32.gmra.mxu1 %vm1010_vm3, %v1368_v47 }
 0xcde   : > { %4588 = vmatprep.mubr.msk.f32.mxu1 %vm1010_vm3, %v1369_v48 }
 0xce1   : > { %4589 = vmatmul.mubr.msk.f32.gmra.mxu1 %vm1010_vm3, %v1370_v49 }
 0xce2   : > { %4591 = vmatprep.mubr.msk.f32.mxu1 %vm1010_vm3, %v1371_v50 }
 0xce5   : > { %4592 = vmatmul.mubr.msk.f32.gmra.mxu1 %vm1010_vm3, %v1372_v51 }
 0xce6   : > { %4594 = vmatprep.mubr.msk.f32.mxu1 %vm1010_vm3, %v1373_v44 }
 0xce9   : > { %4595 = vmatmul.mubr.msk.f32.gmra.mxu1 %vm1010_vm3, %v1374_v52  ;;  %v2395_v52 = vld [vmem:[#allocation11 + $0x18] sm:$0xff] }
 0xcea   : > { %4597 = vmatprep.mubr.msk.f32.mxu1 %vm1010_vm3, %v1375_v53  ;;  %4624 = vmatprep.subr.mxu0 %v2395_v52 }
 0xceb   : > { %4625 = vmatpush3.msra.mxu0 %v2395_v52 }
 0xced   : > { %4598 = vmatmul.mubr.msk.f32.gmra.mxu1 %vm1010_vm3, %v1376_v54 }
 0xcee   : > { %4600 = vmatprep.mubr.msk.f32.mxu1 %vm1010_vm3, %v1377_v55 }
 0xcf1   : > { %4601 = vmatmul.mubr.msk.f32.gmra.mxu1 %vm1010_vm3, %v1378_v56 }
 0xcf2   : > { %4603 = vmatprep.mubr.msk.f32.mxu1 %vm1010_vm3, %v1379_v57 }
 0xcf5   : > { %4604 = vmatmul.mubr.msk.f32.gmra.mxu1 %vm1010_vm3, %v1380_v58 }
 0xcf6   : > { %4606 = vmatprep.mubr.msk.f32.mxu1 %vm1010_vm3, %v1381_v59  ;;  %v2394_v59 = vld [vmem:[#allocation11 + $0x10] sm:$0xff] }
 0xcf7   : > { %4626 = vmatprep.subr.mxu0 %v2394_v59 }
 0xcf8   : > { %4627 = vmatpush3.msra.mxu0 %v2394_v59 }
 0xcf9   : > { %4607 = vmatmul.mubr.msk.f32.gmra.mxu1 %vm1010_vm3, %v1382_v60 }
 0xcfa   : > { %4609 = vmatprep.mubr.msk.f32.mxu1 %vm1010_vm3, %v1383_v61 }
 0xcfd   : > { %4610 = vmatmul.mubr.msk.f32.gmra.mxu1 %vm1010_vm3, %v1384_v62 }
 0xcfe   : > { %4612 = vmatprep.mubr.msk.f32.mxu1 %vm1010_vm3, %v1385_v63 }
 0xd01   : > { %4613 = vmatmul.mubr.msk.f32.gmra.mxu1 %vm1010_vm3, %v1386_v4  ;;  %v2393_v4 = vld [vmem:[#allocation11 + $0x8] sm:$0xff] }
 0xd02   : > { %4615 = vmatprep.mubr.msk.f32.mxu1 %vm1010_vm3, %v1387_v5  ;;  %4628 = vmatprep.subr.mxu0 %v2393_v4 }
 0xd03   : > { %4629 = vmatpush3.msra.mxu0 %v2393_v4 }
 0xd05   : > { %4616 = vmatmul.mubr.msk.f32.gmra.mxu1 %vm1010_vm3, %v1388_v6 }
 0xd06   : > { %4618 = vmatprep.mubr.msk.f32.mxu1 %vm1010_vm3, %v1389_v7 }
 0xd09   : > { %4619 = vmatmul.mubr.msk.f32.gmra.mxu1 %vm1010_vm3, %v1390_v8 }
 0xd0a   : > { %4621 = vmatprep.mubr.msk.f32.mxu1 %vm1010_vm3, %v1391_v9 }
 0xd0d   : > { %4622 = vmatmul.mubr.msk.f32.gmra.mxu1 %vm1010_vm3, %v1392_v10 }
 0xd75   : > { %v5749_v11 = vpop.f32.mrf.mxu1 }
 0xd77   : > { %v5751_v0 = vpop.f32.mrf.mxu1  ;;  %v4526_v2 = vpop.f32.mrf.mxu0 }
 0xd79   : > { %v5753_v1 = vpop.f32.mrf.mxu1  ;;  %v1592_v12 = vpop.f32.mrf.mxu0 }
 0xd7b   : > { %v5755_v3 = vpop.f32.mrf.mxu1  ;;  %v4529_v14 = vpop.f32.mrf.mxu0 }
 0xd7d   : > { %v5757_v13 = vpop.f32.mrf.mxu1  ;;  %v1602_v17 = vpop.f32.mrf.mxu0 }
 0xd7f   : > { %v5759_v15 = vpop.f32.mrf.mxu1  ;;  %v4532_v20 = vpop.f32.mrf.mxu0 }
 0xd81   : > { %v5761_v16 = vpop.f32.mrf.mxu1  ;;  %v1612_v23 = vpop.f32.mrf.mxu0 }
 0xd83   : > { %v5763_v18 = vpop.f32.mrf.mxu1  ;;  %v4535_v26 = vpop.f32.mrf.mxu0 }
 0xd85   : > { %v5765_v19 = vpop.f32.mrf.mxu1  ;;  %v1622_v29 = vpop.f32.mrf.mxu0 }
 0xd87   : > { %v5767_v21 = vpop.f32.mrf.mxu1  ;;  %v4538_v32 = vpop.f32.mrf.mxu0 }
 0xd89   : > { %v5769_v22 = vpop.f32.mrf.mxu1  ;;  %v1632_v35 = vpop.f32.mrf.mxu0 }
 0xd8b   : > { %v5771_v24 = vpop.f32.mrf.mxu1  ;;  %v4541_v38 = vpop.f32.mrf.mxu0 }
 0xd8d   : > { %v5773_v25 = vpop.f32.mrf.mxu1  ;;  %v1642_v41 = vpop.f32.mrf.mxu0 }
 0xd8f   : > { %v5775_v27 = vpop.f32.mrf.mxu1  ;;  %v4544_v45 = vpop.f32.mrf.mxu0 }
 0xd91   : > { %v4578_v28 = vpop.f32.mrf.mxu1  ;;  %v1652_v48 = vpop.f32.mrf.mxu0 }
 0xd92   : > { %v5779_v54 = vadd.f32 %v4578_v28, %v4526_v2 }
 0xd93   : > { %v1913_v30 = vpop.f32.mrf.mxu1  ;;  %v4547_v50 = vpop.f32.mrf.mxu0 }
 0xd94   : > { %v5781_v55 = vadd.f32 %v1913_v30, %v1592_v12  ;;  %v2074_v8 = vsel %vm2072_vm4, %v5779_v54, -inf }
 0xd95   : > { %v4581_v31 = vpop.f32.mrf.mxu1  ;;  %v1662_v57 = vpop.f32.mrf.mxu0 }
 0xd96   : > { %v5783_v56 = vadd.f32 %v4581_v31, %v4529_v14  ;;  %v2073_v9 = vsel %vm2072_vm4, %v5781_v55, -inf }
 0xd97   : > { %v1923_v33 = vpop.f32.mrf.mxu1  ;;  %v4550_v12 = vpop.f32.mrf.mxu0 }
 0xd98   : > { %v5789_v62 = vadd.f32 %v1923_v33, %v1602_v17  ;;  %v2076_v10 = vsel %vm2072_vm4, %v5783_v56, -inf  ;;  %v2392_v17 = vld [vmem:[#allocation11] sm:$0xff] }
 0xd99   : > { %v4584_v34 = vpop.f32.mrf.mxu1  ;;  %4630 = vmatprep.subr.mxu0 %v2392_v17 }
 0xd9a   : > { %v5777_v53 = vadd.f32 %v4584_v34, %v4532_v20  ;;  %v2075_v30 = vsel %vm2072_vm4, %v5789_v62, -inf  ;;  %4631 = vmatpush3.msra.mxu0 %v2392_v17 }
 0xd9b   : > { %v1933_v36 = vpop.f32.mrf.mxu1 }
 0xd9c   : > { %v5785_v60 = vadd.f32 %v1933_v36, %v1612_v23  ;;  %v2079_v5 = vsel %vm2072_vm4, %v5777_v53, -inf  ;;  %v2361_v36 = vld [vmem:[%s5405_s25 + $0x8] sm:$0xff] }
 0xd9d   : > { %v4587_v37 = vpop.f32.mrf.mxu1  ;;  %v2080_v31 = vmax.f32 %v2074_v8, %v2079_v5 }
 0xd9e   : > { %v5787_v61 = vadd.f32 %v4587_v37, %v4535_v26  ;;  %v2077_v20 = vsel %vm2072_vm4, %v5785_v60, -inf }
 0xd9f   : > { %v1943_v39 = vpop.f32.mrf.mxu1 }
 0xda0   : > { %v5793_v6 = vadd.f32 %v1943_v39, %v1622_v29  ;;  %v2083_v23 = vsel %vm2072_vm4, %v5787_v61, -inf  ;;  %v2360_v29 = vld [vmem:[%s5405_s25] sm:$0xff] }
 0xda1   : > { %v4590_v40 = vpop.f32.mrf.mxu1  ;;  %4632 = vmatprep.mubr.msk.f32.mxu0 %vm907_vm2, %v2360_v29 }
 0xda2   : > { %v5803_v2 = vadd.f32 %v4590_v40, %v4538_v32  ;;  %v2081_v37 = vsel %vm2072_vm4, %v5793_v6, -inf  ;;  %4633 = vmatmul.mubr.msk.f32.vlgmr.msra.gmra.mxu0 %vm907_vm2, %v2361_v36 }
 0xda3   : > { %v1953_v42 = vpop.f32.mrf.mxu1 }
 0xda4   : > { %v5816_v32 = vadd.f32 %v1953_v42, %v1632_v35  ;;  %v2078_v35 = vmax.f32 %v2073_v9, %v2077_v20  ;;  %v2087_v42 = vsel %vm2072_vm4, %v5803_v2, -inf }
 0xda5   : > { %v4593_v43 = vpop.f32.mrf.mxu1  ;;  %v2088_v5 = vmax.f32 %v2080_v31, %v2087_v42 }
 0xda6   : > { %v5795_v7 = vadd.f32 %v4593_v43, %v4541_v38  ;;  %v2085_v52 = vsel %vm2072_vm4, %v5816_v32, -inf }
 0xda7   : > { %v1963_v46 = vpop.f32.mrf.mxu1 }
 0xda8   : > { %v5809_v26 = vadd.f32 %v1963_v46, %v1642_v41  ;;  %v2091_v38 = vsel %vm2072_vm4, %v5795_v7, -inf  ;;  %v2084_v41 = vmax.f32 %v2076_v10, %v2083_v23 }
 0xda9   : > { %v4596_v47 = vpop.f32.mrf.mxu1 }
 0xdaa   : > { %v5818_v33 = vadd.f32 %v4596_v47, %v4544_v45  ;;  %v1672_v45 = vpop.f32.mrf.mxu0  ;;  %v2089_v47 = vsel %vm2072_vm4, %v5809_v26, -inf }
 0xdab   : > { %v1973_v49 = vpop.f32.mrf.mxu1 }
 0xdac   : > { %v5834_v43 = vadd.f32 %v1973_v49, %v1652_v48  ;;  %v2095_v48 = vsel %vm2072_vm4, %v5818_v33, -inf }
 0xdad   : > { %v4599_v51 = vpop.f32.mrf.mxu1  ;;  %v2096_v23 = vmax.f32 %v2088_v5, %v2095_v48 }
 0xdae   : > { %v5811_v28 = vadd.f32 %v4599_v51, %v4547_v50  ;;  %v2093_v9 = vsel %vm2072_vm4, %v5834_v43, -inf }
 0xdaf   : > { %v1983_v44 = vpop.f32.mrf.mxu1 }
 0xdb0   : > { %v5826_v39 = vadd.f32 %v1983_v44, %v1662_v57  ;;  %v2099_v50 = vsel %vm2072_vm4, %v5811_v28, -inf  ;;  %v2082_v44 = vmax.f32 %v2075_v30, %v2081_v37  ;;  %v2092_v57 = vmax.f32 %v2084_v41, %v2091_v38 }
 0xdb1   : > { %v4602_v58 = vpop.f32.mrf.mxu1 }
 0xdb2   : > { %v5840_v51 = vadd.f32 %v4602_v58, %v4550_v12  ;;  %v2097_v59 = vsel %vm2072_vm4, %v5826_v39, -inf  ;;  %v2090_v8 = vmax.f32 %v2082_v44, %v2089_v47  ;;  %v2100_v10 = vmax.f32 %v2092_v57, %v2099_v50 }
 0xdb3   : > { %v1993_v63 = vpop.f32.mrf.mxu1 }
 0xdb4   : > { %v5851_v4 = vadd.f32 %v1993_v63, %v1672_v45  ;;  %v2098_v29 = vmax.f32 %v2090_v8, %v2097_v59  ;;  %v2362_v8 = vld [vmem:[%s5405_s25 + $0x10] sm:$0xff] }
 0xdb5   : > { %v4605_v14 = vpop.f32.mrf.mxu1  ;;  %4635 = vmatprep.mubr.msk.f32.mxu0 %vm907_vm2, %v2362_v8  ;;  %v2366_v8 = vld [vmem:[%s5405_s25 + $0x30] sm:$0xff] }
 0xdb6   : > { %v5829_v40 = vadd.f32 %v4605_v14, %v5749_v11  ;;  %v2103_v14 = vsel %vm2072_vm4, %v5840_v51, -inf }
 0xdb7   : > { %v2003_v34 = vpop.f32.mrf.mxu1 }
 0xdb8   : > { %v5843_v11 = vadd.f32 %v2003_v34, %v5751_v0  ;;  %v2107_v58 = vsel %vm2072_vm4, %v5829_v40, -inf  ;;  %v2101_v34 = vsel %vm2072_vm4, %v5851_v4, -inf }
 0xdb9   : > { %v4608_v46 = vpop.f32.mrf.mxu1  ;;  %v2108_v30 = vmax.f32 %v2100_v10, %v2107_v58 }
 0xdba   : > { %v5856_v0 = vadd.f32 %v4608_v46, %v5753_v1  ;;  %v2105_v63 = vsel %vm2072_vm4, %v5843_v11, -inf  ;;  %v2086_v1 = vmax.f32 %v2078_v35, %v2085_v52 }
 0xdbb   : > { %v2013_v49 = vpop.f32.mrf.mxu1  ;;  %v2106_v41 = vmax.f32 %v2098_v29, %v2105_v63  ;;  %v2364_v63 = vld [vmem:[%s5405_s25 + $0x20] sm:$0xff] }
 0xdbc   : > { %v5865_v17 = vadd.f32 %v2013_v49, %v5755_v3  ;;  %v2111_v36 = vsel %vm2072_vm4, %v5856_v0, -inf  ;;  %v2094_v38 = vmax.f32 %v2086_v1, %v2093_v9 }
 0xdbd   : > { %v4611_v12 = vpop.f32.mrf.mxu1 }
 0xdbe   : > { %v5868_v20 = vadd.f32 %v4611_v12, %v5757_v13  ;;  %v2104_v13 = vmax.f32 %v2096_v23, %v2103_v14  ;;  %v2109_v45 = vsel %vm2072_vm4, %v5865_v17, -inf  ;;  %v2102_v50 = vmax.f32 %v2094_v38, %v2101_v34  ;;  %v2363_v12 = vld [vmem:[%s5405_s25 + $0x18] sm:$0xff] }
 0xdbf   : > { %v2023_v31 = vpop.f32.mrf.mxu1  ;;  %4636 = vmatmul.mubr.msk.f32.gmra.mxu0 %vm907_vm2, %v2363_v12 }
 0xdc0   : > { %v2115_v37 = vsel %vm2072_vm4, %v5868_v20, -inf  ;;  %v5877_v3 = vadd.f32 %v2023_v31, %v5759_v15  ;;  %v2112_v44 = vmax.f32 %v2104_v13, %v2111_v36  ;;  %v2110_v49 = vmax.f32 %v2102_v50, %v2109_v45  ;;  %4638 = vmatprep.mubr.msk.f32.mxu0 %vm907_vm2, %v2364_v63 }
 0xdc1   : > { %v2116_v35 = vmax.f32 %v2108_v30, %v2115_v37  ;;  %v4614_v42 = vpop.f32.mrf.mxu1 }
 0xdc2   : > { %v2113_v46 = vsel %vm2072_vm4, %v5877_v3, -inf  ;;  %v5884_v47 = vadd.f32 %v4614_v42, %v5761_v16 }
 0xdc3   : > { %v2114_v15 = vmax.f32 %v2106_v41, %v2113_v46  ;;  %v2033_v52 = vpop.f32.mrf.mxu1 }
 0xdc4   : > { %v2119_v57 = vsel %vm2072_vm4, %v5884_v47, -inf  ;;  %v5889_v48 = vadd.f32 %v2033_v52, %v5763_v18 }
 0xdc5   : > { %v2120_v59 = vmax.f32 %v2112_v44, %v2119_v57  ;;  %v4617_v58 = vpop.f32.mrf.mxu1 }
 0xdc6   : > { %v2117_v16 = vsel %vm2072_vm4, %v5889_v48, -inf  ;;  %v5894_v5 = vadd.f32 %v4617_v58, %v5765_v19  ;;  %v2365_v19 = vld [vmem:[%s5405_s25 + $0x28] sm:$0xff] }
 0xdc7   : > { %v2118_v9 = vmax.f32 %v2110_v49, %v2117_v16  ;;  %v2043_v10 = vpop.f32.mrf.mxu1  ;;  %4639 = vmatmul.mubr.msk.f32.gmra.mxu0 %vm907_vm2, %v2365_v19 }
 0xdc8   : > { %v2123_v18 = vsel %vm2072_vm4, %v5894_v5, -inf  ;;  %v5902_v14 = vadd.f32 %v2043_v10, %v5767_v21  ;;  %4641 = vmatprep.mubr.msk.f32.mxu0 %vm907_vm2, %v2366_v8 }
 0xdc9   : > { %v2124_v1 = vmax.f32 %v2116_v35, %v2123_v18  ;;  %v4620_v23 = vpop.f32.mrf.mxu1 }
 0xdca   : > { %v2121_v29 = vsel %vm2072_vm4, %v5902_v14, -inf  ;;  %v5911_v30 = vadd.f32 %v4620_v23, %v5769_v22 }
 0xdcb   : > { %v2122_v31 = vmax.f32 %v2114_v15, %v2121_v29  ;;  %v2053_v34 = vpop.f32.mrf.mxu1 }
 0xdcc   : > { %v2127_v21 = vsel %vm2072_vm4, %v5911_v30, -inf  ;;  %v5916_v36 = vadd.f32 %v2053_v34, %v5771_v24 }
 0xdcd   : > { %v2128_v37 = vmax.f32 %v2120_v59, %v2127_v21  ;;  %v4623_v38 = vpop.f32.mrf.mxu1 }
 0xdce   : > { %v2125_v13 = vsel %vm2072_vm4, %v5916_v36, -inf  ;;  %v5922_v41 = vadd.f32 %v4623_v38, %v5773_v25 }
 0xdcf   : > { %v2126_v22 = vmax.f32 %v2118_v9, %v2125_v13  ;;  %v2063_v35 = vpop.f32.mrf.mxu1 }
 0xdd0   : > { %v2131_v42 = vsel %vm2072_vm4, %v5922_v41, -inf  ;;  %v5927_v45 = vadd.f32 %v2063_v35, %v5775_v27 }
 0xdd1   : > { %v2133_v24 = vmax.f32 %v2126_v22, %v2128_v37  ;;  %v2132_v46 = vmax.f32 %v2124_v1, %v2131_v42 }
 0xdd2   : > { %v2129_v50 = vsel %vm2072_vm4, %v5927_v45, -inf }
 0xdd3   : > { %v2130_v44 = vmax.f32 %v2122_v31, %v2129_v50 }
 0xdd5   : > { %v2134_v15 = vmax.f32 %v2130_v44, %v2132_v46  ;;  %v2367_v46 = vld [vmem:[%s5405_s25 + $0x38] sm:$0xff] }
 0xdd6   : > { %4642 = vmatmul.mubr.msk.f32.gmra.mxu0 %vm907_vm2, %v2367_v46 }
 0xdd7   : > { %v5931_v52 = vmax.f32 %v2133_v24, %v2134_v15 }
 0xdd9   : > { %v2136_v25 = vsub.f32 %v5781_v55, %v5931_v52  ;;  %v2137_v57 = vsub.f32 %v5779_v54, %v5931_v52  ;;  %v2138_v27 = vsub.f32 %v5789_v62, %v5931_v52  ;;  %v2139_v49 = vsub.f32 %v5783_v56, %v5931_v52 }
 0xdda   : > { %v2140_v59 = vsub.f32 %v5785_v60, %v5931_v52  ;;  %v2154_v58 = vsub.f32 %v5843_v11, %v5931_v52  ;;  %v2155_v16 = vsub.f32 %v5829_v40, %v5931_v52  ;;  %v2156_v55 = vsub.f32 %v5865_v17, %v5931_v52 }
 0xddb   : > { %v2157_v54 = vsub.f32 %v5856_v0, %v5931_v52  ;;  %v2158_v62 = vsub.f32 %v5877_v3, %v5931_v52  ;;  %v2159_v56 = vsub.f32 %v5868_v20, %v5931_v52  ;;  %v2160_v60 = vsub.f32 %v5889_v48, %v5931_v52 }
 0xddc   : > { %v2161_v9 = vsub.f32 %v5884_v47, %v5931_v52  ;;  %v2162_v10 = vsub.f32 %v5902_v14, %v5931_v52  ;;  %v2163_v12 = vsub.f32 %v5894_v5, %v5931_v52  ;;  %v2164_v18 = vsub.f32 %v5916_v36, %v5931_v52 }
 0xddd   : > { %v2165_v63 = vsub.f32 %v5911_v30, %v5931_v52  ;;  %v2166_v1 = vsub.f32 %v5927_v45, %v5931_v52  ;;  %v2167_v23 = vsub.f32 %v5922_v41, %v5931_v52  ;;  %v2168_v19 = vmul.f32 1.442695, %v2136_v25 }
 0xdde   : > { %v2170_v29 = vmul.f32 1.442695, %v2137_v57  ;;  %v2172_v31 = vmul.f32 1.442695, %v2138_v27  ;;  %v2141_v34 = vsub.f32 %v5777_v53, %v5931_v52  ;;  %v2174_v21 = vmul.f32 1.442695, %v2139_v49 }
 0xddf   : > { %4855 = vpow2.f32 %v2168_v19  ;;  %v2142_v37 = vsub.f32 %v5793_v6, %v5931_v52  ;;  %v2176_v38 = vmul.f32 1.442695, %v2140_v59  ;;  %v2143_v13 = vsub.f32 %v5787_v61, %v5931_v52 }
 0xde0   : > { %4857 = vpow2.f32 %v2170_v29  ;;  %v2178_v22 = vmul.f32 1.442695, %v2141_v34  ;;  %v2144_v35 = vsub.f32 %v5816_v32, %v5931_v52  ;;  %v2145_v53 = vsub.f32 %v5803_v2, %v5931_v52 }
 0xde1   : > { %4859 = vpow2.f32 %v2172_v31  ;;  %v2180_v42 = vmul.f32 1.442695, %v2142_v37  ;;  %v2182_v24 = vmul.f32 1.442695, %v2143_v13  ;;  %v2146_v6 = vsub.f32 %v5809_v26, %v5931_v52 }
 0xde2   : > { %4861 = vpow2.f32 %v2174_v21  ;;  %v2184_v50 = vmul.f32 1.442695, %v2144_v35  ;;  %v2147_v61 = vsub.f32 %v5795_v7, %v5931_v52  ;;  %v2186_v32 = vmul.f32 1.442695, %v2145_v53 }
 0xde3   : > { %4863 = vpow2.f32 %v2176_v38  ;;  %v2148_v2 = vsub.f32 %v5834_v43, %v5931_v52  ;;  %v2188_v15 = vmul.f32 1.442695, %v2146_v6  ;;  %v2149_v27 = vsub.f32 %v5818_v33, %v5931_v52  ;;  %v2368_v6 = vld [vmem:[%s5405_s25 + $0x40] sm:$0xff] }
 0xde4   : > { %4865 = vpow2.f32 %v2178_v22  ;;  %v2190_v7 = vmul.f32 1.442695, %v2147_v61  ;;  %v2150_v8 = vsub.f32 %v5826_v39, %v5931_v52  ;;  %v2151_v33 = vsub.f32 %v5811_v28, %v5931_v52  ;;  %4644 = vmatprep.mubr.msk.f32.mxu0 %vm907_vm2, %v2368_v6 }
 0xde5   : > { %4867 = vpow2.f32 %v2180_v42  ;;  %v2192_v19 = vmul.f32 1.442695, %v2148_v2  ;;  %v2194_v21 = vmul.f32 1.442695, %v2149_v27  ;;  %v2152_v13 = vsub.f32 %v5851_v4, %v5931_v52  ;;  %v2369_v27 = vld [vmem:[%s5405_s25 + $0x48] sm:$0xff] }
 0xde6   : > { %4869 = vpow2.f32 %v2182_v24  ;;  %v2196_v22 = vmul.f32 1.442695, %v2150_v8  ;;  %v2153_v53 = vsub.f32 %v5840_v51, %v5931_v52  ;;  %v2198_v24 = vmul.f32 1.442695, %v2151_v33  ;;  %4645 = vmatmul.mubr.msk.f32.gmra.mxu0 %vm907_vm2, %v2369_v27 }
 0xde7   : > { %4871 = vpow2.f32 %v2184_v50  ;;  %v2200_v61 = vmul.f32 1.442695, %v2152_v13  ;;  %v2208_v11 = vmul.f32 1.442695, %v2156_v55  ;;  %v2210_v40 = vmul.f32 1.442695, %v2157_v54 }
 0xde8   : > { %4873 = vpow2.f32 %v2186_v32  ;;  %v2212_v17 = vmul.f32 1.442695, %v2158_v62  ;;  %v2214_v0 = vmul.f32 1.442695, %v2159_v56  ;;  %v2216_v3 = vmul.f32 1.442695, %v2160_v60 }
 0xde9   : > { %4875 = vpow2.f32 %v2188_v15  ;;  %v2202_v15 = vmul.f32 1.442695, %v2153_v53  ;;  %v2218_v20 = vmul.f32 1.442695, %v2161_v9  ;;  %v2220_v48 = vmul.f32 1.442695, %v2162_v10 }
 0xdea   : > { %4877 = vpow2.f32 %v2190_v7  ;;  %v2222_v47 = vmul.f32 1.442695, %v2163_v12  ;;  %v2224_v14 = vmul.f32 1.442695, %v2164_v18  ;;  %v2226_v5 = vmul.f32 1.442695, %v2165_v63 }
 0xdeb   : > { %4879 = vpow2.f32 %v2192_v19  ;;  %v2228_v18 = vmul.f32 1.442695, %v2166_v1  ;;  %v2230_v63 = vmul.f32 1.442695, %v2167_v23 }
 0xdec   : > { %v5989_v44 = vpop.eup %4855  ;;  %4881 = vpow2.f32 %v2194_v21 }
 0xded   : > { %v5993_v25 = vpop.eup %4857  ;;  %v2232_v26 = vsel %vm2072_vm4, %v5989_v44, 0.0  ;;  %4883 = vpow2.f32 %v2196_v22 }
 0xdee   : > { %v5997_v57 = vpop.eup %4859  ;;  %v2233_v49 = vsel %vm2072_vm4, %v5993_v25, 0.0  ;;  %4885 = vpow2.f32 %v2198_v24 }
 0xdef   : > { %v6003_v59 = vpop.eup %4861  ;;  %v2234_v43 = vadd.f32 %v2233_v49, %v2232_v26  ;;  %v2235_v29 = vsel %vm2072_vm4, %v5997_v57, 0.0  ;;  %4887 = vpow2.f32 %v2200_v61 }
 0xdf0   : > { %v6009_v31 = vpop.eup %4863  ;;  %v2237_v37 = vsel %vm2072_vm4, %v6003_v59, 0.0  ;;  %4889 = vpow2.f32 %v2202_v15 }
 0xdf1   : > { %v2236_v34 = vadd.f32 %v2235_v29, %v2234_v43  ;;  %v6015_v38 = vpop.eup %4865  ;;  %v2239_v35 = vsel %vm2072_vm4, %v6009_v31, 0.0  ;;  %v2204_v43 = vmul.f32 1.442695, %v2154_v58 }
 0xdf2   : > { %v6021_v42 = vpop.eup %4867  ;;  %v2241_v46 = vsel %vm2072_vm4, %v6015_v38, 0.0 }
 0xdf3   : > { %v2238_v39 = vadd.f32 %v2237_v37, %v2236_v34  ;;  %v6028_v50 = vpop.eup %4869  ;;  %v2243_v32 = vsel %vm2072_vm4, %v6021_v42, 0.0  ;;  %v2206_v34 = vmul.f32 1.442695, %v2155_v16  ;;  %4891 = vpow2.f32 %v2204_v43 }
 0xdf4   : > { %v6033_v2 = vpop.eup %4871  ;;  %v2245_v26 = vsel %vm2072_vm4, %v6028_v50, 0.0 }
 0xdf5   : > { %v2240_v28 = vadd.f32 %v2239_v35, %v2238_v39  ;;  %v6038_v7 = vpop.eup %4873  ;;  %v2247_v8 = vsel %vm2072_vm4, %v6033_v2, 0.0  ;;  %4893 = vpow2.f32 %v2206_v34 }
 0xdf6   : > { %v6046_v19 = vpop.eup %4875  ;;  %v2249_v33 = vsel %vm2072_vm4, %v6038_v7, 0.0  ;;  %4895 = vpow2.f32 %v2208_v11  ;;  %v2371_v11 = vld [vmem:[%s5405_s25 + $0x58] sm:$0xff] }
 0xdf7   : > { %v2242_v4 = vadd.f32 %v2241_v46, %v2240_v28  ;;  %v6053_v21 = vpop.eup %4877  ;;  %v2251_v58 = vsel %vm2072_vm4, %v6046_v19, 0.0  ;;  %4897 = vpow2.f32 %v2210_v40 }
 0xdf8   : > { %v6060_v39 = vpop.eup %4879  ;;  %v2253_v16 = vsel %vm2072_vm4, %v6053_v21, 0.0  ;;  %4899 = vpow2.f32 %v2212_v17 }
 0xdf9   : > { %v2244_v51 = vadd.f32 %v2243_v32, %v2242_v4  ;;  %v6067_v22 = vpop.eup %4881  ;;  %v2255_v55 = vsel %vm2072_vm4, %v6060_v39, 0.0  ;;  %4901 = vpow2.f32 %v2214_v0 }
 0xdfa   : > { %v6074_v28 = vpop.eup %4883  ;;  %v2257_v54 = vsel %vm2072_vm4, %v6067_v22, 0.0  ;;  %4903 = vpow2.f32 %v2216_v3 }
 0xdfb   : > { %v2246_v49 = vadd.f32 %v2245_v26, %v2244_v51  ;;  %v6081_v24 = vpop.eup %4885  ;;  %v2259_v62 = vsel %vm2072_vm4, %v6074_v28, 0.0  ;;  %4905 = vpow2.f32 %v2218_v20 }
 0xdfc   : > { %v6088_v6 = vpop.eup %4887  ;;  %v2261_v56 = vsel %vm2072_vm4, %v6081_v24, 0.0  ;;  %4907 = vpow2.f32 %v2220_v48 }
 0xdfd   : > { %v2248_v29 = vadd.f32 %v2247_v8, %v2246_v49  ;;  %v6095_v61 = vpop.eup %4889  ;;  %v2263_v60 = vsel %vm2072_vm4, %v6088_v6, 0.0  ;;  %4909 = vpow2.f32 %v2222_v47  ;;  %v2370_v8 = vld [vmem:[%s5405_s25 + $0x50] sm:$0xff] }
 0xdfe   : > { %v2265_v9 = vsel %vm2072_vm4, %v6095_v61, 0.0  ;;  %4647 = vmatprep.mubr.msk.f32.mxu0 %vm907_vm2, %v2370_v8  ;;  %4911 = vpow2.f32 %v2224_v14 }
 0xdff   : > { %v2250_v37 = vadd.f32 %v2249_v33, %v2248_v29  ;;  %4913 = vpow2.f32 %v2226_v5  ;;  %4648 = vmatmul.mubr.msk.f32.gmra.mxu0 %vm907_vm2, %v2371_v11  ;;  %v2373_v5 = vld [vmem:[%s5405_s25 + $0x68] sm:$0xff] }
 0xe00   : > { %v6102_v51 = vpop.eup %4891  ;;  %4915 = vpow2.f32 %v2228_v18 }
 0xe01   : > { %v2252_v13 = vadd.f32 %v2251_v58, %v2250_v37  ;;  %v2267_v10 = vsel %vm2072_vm4, %v6102_v51, 0.0  ;;  %4917 = vpow2.f32 %v2230_v63 }
 0xe02   : > { %v6109_v26 = vpop.eup %4893 }
 0xe03   : > { %v2254_v35 = vadd.f32 %v2253_v16, %v2252_v13  ;;  %v6116_v49 = vpop.eup %4895  ;;  %v2269_v12 = vsel %vm2072_vm4, %v6109_v26, 0.0 }
 0xe04   : > { %v6124_v29 = vpop.eup %4897  ;;  %v2271_v34 = vsel %vm2072_vm4, %v6116_v49, 0.0 }
 0xe05   : > { %v2256_v53 = vadd.f32 %v2255_v55, %v2254_v35  ;;  %v6132_v33 = vpop.eup %4899  ;;  %v2273_v37 = vsel %vm2072_vm4, %v6124_v29, 0.0 }
 0xe06   : > { %v6140_v58 = vpop.eup %4901  ;;  %v2275_v45 = vsel %vm2072_vm4, %v6132_v33, 0.0 }
 0xe07   : > { %v2258_v46 = vadd.f32 %v2257_v54, %v2256_v53  ;;  %v6145_v1 = vpop.eup %4903  ;;  %v2277_v41 = vsel %vm2072_vm4, %v6140_v58, 0.0 }
 0xe08   : > { %v6149_v52 = vpop.eup %4905  ;;  %v2279_v16 = vsel %vm2072_vm4, %v6145_v1, 0.0 }
 0xe09   : > { %v2260_v4 = vadd.f32 %v2259_v62, %v2258_v46  ;;  %v6153_v35 = vpop.eup %4907  ;;  %v2281_v55 = vsel %vm2072_vm4, %v6149_v52, 0.0 }
 0xe0a   : > { %v6157_v53 = vpop.eup %4909  ;;  %v2283_v54 = vsel %vm2072_vm4, %v6153_v35, 0.0 }
 0xe0b   : > { %v2262_v32 = vadd.f32 %v2261_v56, %v2260_v4  ;;  %v6161_v46 = vpop.eup %4911  ;;  %v2285_v62 = vsel %vm2072_vm4, %v6157_v53, 0.0 }
 0xe0c   : > { %v6165_v4 = vpop.eup %4913  ;;  %v2287_v56 = vsel %vm2072_vm4, %v6161_v46, 0.0 }
 0xe0d   : > { %v2264_v15 = vadd.f32 %v2263_v60, %v2262_v32  ;;  %v4916_v32 = vpop.eup %4915  ;;  %v2289_v60 = vsel %vm2072_vm4, %v6165_v4, 0.0 }
 0xe0f   : > { %v2266_v27 = vadd.f32 %v2265_v9, %v2264_v15  ;;  %v6171_v15 = vpop.eup %4917  ;;  %v2291_v9 = vsel %vm2072_vm4, %v4916_v32, 0.0 }
 0xe10   : > { %v2293_v14 = vsel %vm2072_vm4, %v6171_v15, 0.0 }
 0xe11   : > { %v2268_v43 = vadd.f32 %v2267_v10, %v2266_v27 }
 0xe13   : > { %v2270_v36 = vadd.f32 %v2269_v12, %v2268_v43  ;;  %v2372_v43 = vld [vmem:[%s5405_s25 + $0x60] sm:$0xff] }
 0xe14   : > { %4650 = vmatprep.mubr.msk.f32.mxu0 %vm907_vm2, %v2372_v43 }
 0xe15   : > { %v2272_v30 = vadd.f32 %v2271_v34, %v2270_v36  ;;  %4651 = vmatmul.mubr.msk.f32.gmra.mxu0 %vm907_vm2, %v2373_v5 }
 0xe17   : > { %v2274_v13 = vadd.f32 %v2273_v37, %v2272_v30 }
 0xe19   : > { %v2276_v40 = vadd.f32 %v2275_v45, %v2274_v13  ;;  %v2374_v13 = vld [vmem:[%s5405_s25 + $0x70] sm:$0xff]  ;;  %v2375_v45 = vld [vmem:[%s5405_s25 + $0x78] sm:$0xff] }
 0xe1a   : > { %4653 = vmatprep.mubr.msk.f32.mxu0 %vm907_vm2, %v2374_v13 }
 0xe1b   : > { %v2278_v23 = vadd.f32 %v2277_v41, %v2276_v40  ;;  %4654 = vmatmul.mubr.msk.f32.gmra.mxu0 %vm907_vm2, %v2375_v45  ;;  %v2377_v40 = vld [vmem:[%s5405_s25 + $0x88] sm:$0xff]  ;;  %v2378_v41 = vld [vmem:[%s5405_s25 + $0x90] sm:$0xff] }
 0xe1d   : > { %v2280_v17 = vadd.f32 %v2279_v16, %v2278_v23  ;;  %v2380_v23 = vld [vmem:[%s5405_s25 + $0xa0] sm:$0xff]  ;;  %v2381_v16 = vld [vmem:[%s5405_s25 + $0xa8] sm:$0xff] }
 0xe1f   : > { %v2282_v0 = vadd.f32 %v2281_v55, %v2280_v17 }
 0xe21   : > { %v2284_v3 = vadd.f32 %v2283_v54, %v2282_v0 }
 0xe23   : > { %v2286_v20 = vadd.f32 %v2285_v62, %v2284_v3 }
 0xe25   : > { %v2288_v48 = vadd.f32 %v2287_v56, %v2286_v20  ;;  %v2382_v20 = vld [vmem:[%s5405_s25 + $0xb0] sm:$0xff]  ;;  %v2383_v56 = vld [vmem:[%s5405_s25 + $0xb8] sm:$0xff] }
 0xe27   : > { %v2290_v47 = vadd.f32 %v2289_v60, %v2288_v48 }
 0xe29   : > { %v2292_v27 = vadd.f32 %v2291_v9, %v2290_v47 }
 0xe2b   : > { %v2294_v10 = vadd.f32 %v2293_v14, %v2292_v27 }
 0xe2d   : > { %4919 = vrcp.f32 %v2294_v10 }
 0xe3a   : > { %v4920_v12 = vpop.eup %4919 }
 0xe3b   : > { %v6180_v8 = vmul.f32 %v4920_v12, %v4916_v32  ;;  %v6183_v36 = vmul.f32 %v4920_v12, %v5989_v44  ;;  %v6186_v18 = vmul.f32 %v4920_v12, %v5993_v25  ;;  %v6189_v34 = vmul.f32 %v4920_v12, %v5997_v57 }
 0xe3c   : > { %v6192_v30 = vmul.f32 %v4920_v12, %v6003_v59  ;;  %v6195_v63 = vmul.f32 %v4920_v12, %v6009_v31  ;;  %v6198_v37 = vmul.f32 %v4920_v12, %v6015_v38  ;;  %v6201_v11 = vmul.f32 %v4920_v12, %v6021_v42 }
 0xe3d   : > { %7664 = vst [vmem:[#allocation24_spill] sm:$0xff] %v6180_v8  ;;  %2358 = vst.msk [vmem:[%s5425_s26 + $0xf0] sm:$0xff] %vm2072_vm4, %v6180_v8  ;;  %v6207_v44 = vmul.f32 %v4920_v12, %v6028_v50  ;;  %v6210_v25 = vmul.f32 %v4920_v12, %v6033_v2  ;;  %v6213_v57 = vmul.f32 %v4920_v12, %v6038_v7  ;;  %2846 = vrot.lane.b32.xlu1 %v6183_v36, %s5146_s22 }
 0xe3e   : > { %v6216_v59 = vmul.f32 %v4920_v12, %v6046_v19  ;;  %2328 = vst.msk [vmem:[%s5425_s26] sm:$0xff] %vm2072_vm4, %v6183_v36  ;;  %2329 = vst.msk [vmem:[%s5425_s26 + $0x8] sm:$0xff] %vm2072_vm4, %v6186_v18  ;;  %v6230_v31 = vmul.f32 %v4920_v12, %v6053_v21  ;;  %v6233_v38 = vmul.f32 %v4920_v12, %v6060_v39  ;;  %2750 = vrot.lane.b32.xlu0 %v6183_v36, %s5147_s7 }
 0xe3f   : > { %7665 = vst [vmem:[#allocation25_spill] sm:$0xff] %v6207_v44  ;;  %7666 = vst [vmem:[#allocation26_spill] sm:$0xff] %v6210_v25  ;;  %v6236_v42 = vmul.f32 %v4920_v12, %v6067_v22  ;;  %v6239_v50 = vmul.f32 %v4920_v12, %v6074_v28  ;;  %v6256_v2 = vmul.f32 %v4920_v12, %v6081_v24 }
 0xe40   : > { %7667 = vst [vmem:[#allocation27_spill] sm:$0xff] %v6213_v57  ;;  %7668 = vst [vmem:[#allocation28_spill] sm:$0xff] %v6216_v59  ;;  %v6259_v7 = vmul.f32 %v4920_v12, %v6088_v6  ;;  %v6262_v19 = vmul.f32 %v4920_v12, %v6095_v61  ;;  %v6265_v21 = vmul.f32 %v4920_v12, %v6102_v51 }
 0xe41   : > { %2330 = vst.msk [vmem:[%s5425_s26 + $0x10] sm:$0xff] %vm2072_vm4, %v6189_v34  ;;  %7669 = vst [vmem:[#allocation29_spill] sm:$0xff] %v6230_v31  ;;  %v6280_v39 = vmul.f32 %v4920_v12, %v6109_v26  ;;  %v6283_v22 = vmul.f32 %v4920_v12, %v6116_v49  ;;  %v6286_v28 = vmul.f32 %v4920_v12, %v6124_v29  ;;  %2848 = vrot.lane.b32.xlu1 %v6186_v18, %s5146_s22 }
 0xe42   : > { %7670 = vst [vmem:[#allocation30_spill] sm:$0xff] %v6233_v38  ;;  %7671 = vst [vmem:[#allocation31_spill] sm:$0xff] %v6236_v42  ;;  %v6289_v24 = vmul.f32 %v4920_v12, %v6132_v33  ;;  %v6304_v6 = vmul.f32 %v4920_v12, %v6140_v58  ;;  %v6307_v61 = vmul.f32 %v4920_v12, %v6145_v1  ;;  %2752 = vrot.lane.b32.xlu0 %v6186_v18, %s5147_s7  ;;  %v2376_v1 = vld [vmem:[%s5405_s25 + $0x80] sm:$0xff] }
 0xe43   : > { %7672 = vst [vmem:[#allocation32_spill] sm:$0xff] %v6239_v50  ;;  %2331 = vst.msk [vmem:[%s5425_s26 + $0x18] sm:$0xff] %vm2072_vm4, %v6192_v30  ;;  %v6310_v51 = vmul.f32 %v4920_v12, %v6149_v52  ;;  %v6313_v26 = vmul.f32 %v4920_v12, %v6153_v35  ;;  %v6330_v49 = vmul.f32 %v4920_v12, %v6157_v53  ;;  %4656 = vmatprep.mubr.msk.f32.mxu0 %vm907_vm2, %v2376_v1  ;;  %v2379_v52 = vld [vmem:[%s5405_s25 + $0x98] sm:$0xff]  ;;  %v2384_v1 = vld [vmem:[%s5405_s25 + $0xc0] sm:$0xff] }
 0xe44   : > { %2332 = vst.msk [vmem:[%s5425_s26 + $0x20] sm:$0xff] %vm2072_vm4, %v6195_v63  ;;  %2333 = vst.msk [vmem:[%s5425_s26 + $0x28] sm:$0xff] %vm2072_vm4, %v6198_v37  ;;  %v6333_v29 = vmul.f32 %v4920_v12, %v6161_v46  ;;  %v6336_v33 = vmul.f32 %v4920_v12, %v6165_v4  ;;  %v6339_v58 = vmul.f32 %v4920_v12, %v6171_v15  ;;  %4657 = vmatmul.mubr.msk.f32.gmra.mxu0 %vm907_vm2, %v2377_v40  ;;  %v2385_v40 = vld [vmem:[%s5405_s25 + $0xc8] sm:$0xff] }
 0xe45   : > { %2334 = vst.msk [vmem:[%s5425_s26 + $0x30] sm:$0xff] %vm2072_vm4, %v6201_v11  ;;  %7673 = vst [vmem:[#allocation33_spill] sm:$0xff] %v6256_v2  ;;  %2942 = vrot.lane.b32.xlu1 %v6183_v36, %s5148_s28  ;;  %4659 = vmatprep.mubr.msk.f32.mxu0 %vm907_vm2, %v2378_v41 }
 0xe46   : > { %7674 = vst [vmem:[#allocation34_spill] sm:$0xff] %v6259_v7  ;;  %7675 = vst [vmem:[#allocation35_spill] sm:$0xff] %v6262_v19  ;;  %2754 = vrot.lane.b32.xlu0 %v6189_v34, %s5147_s7 }
 0xe47   : > { %7676 = vst [vmem:[#allocation36_spill] sm:$0xff] %v6265_v21  ;;  %2335 = vst.msk [vmem:[%s5425_s26 + $0x38] sm:$0xff] %vm2072_vm4, %v6207_v44 }
 0xe48   : > { %2336 = vst.msk [vmem:[%s5425_s26 + $0x40] sm:$0xff] %vm2072_vm4, %v6210_v25  ;;  %2337 = vst.msk [vmem:[%s5425_s26 + $0x48] sm:$0xff] %vm2072_vm4, %v6213_v57  ;;  %4660 = vmatmul.mubr.msk.f32.gmra.mxu0 %vm907_vm2, %v2379_v52 }
 0xe49   : > { %2338 = vst.msk [vmem:[%s5425_s26 + $0x50] sm:$0xff] %vm2072_vm4, %v6216_v59  ;;  %7677 = vst [vmem:[#allocation37_spill] sm:$0xff] %v6280_v39  ;;  %2850 = vrot.lane.b32.xlu1 %v6189_v34, %s5146_s22  ;;  %4662 = vmatprep.mubr.msk.f32.mxu0 %vm907_vm2, %v2380_v23 }
 0xe4a   : > { %7678 = vst [vmem:[#allocation38_spill] sm:$0xff] %v6283_v22  ;;  %7679 = vst [vmem:[#allocation39_spill] sm:$0xff] %v6286_v28  ;;  %2944 = vrot.lane.b32.xlu0 %v6186_v18, %s5148_s28 }
 0xe4b   : > { %2339 = vst.msk [vmem:[%s5425_s26 + $0x58] sm:$0xff] %vm2072_vm4, %v6230_v31  ;;  %2340 = vst.msk [vmem:[%s5425_s26 + $0x60] sm:$0xff] %vm2072_vm4, %v6233_v38 }
 0xe4c   : > { %2341 = vst.msk [vmem:[%s5425_s26 + $0x68] sm:$0xff] %vm2072_vm4, %v6236_v42  ;;  %2342 = vst.msk [vmem:[%s5425_s26 + $0x70] sm:$0xff] %vm2072_vm4, %v6239_v50  ;;  %4663 = vmatmul.mubr.msk.f32.gmra.mxu0 %vm907_vm2, %v2381_v16 }
 0xe4d   : > { %2343 = vst.msk [vmem:[%s5425_s26 + $0x78] sm:$0xff] %vm2072_vm4, %v6256_v2  ;;  %2344 = vst.msk [vmem:[%s5425_s26 + $0x80] sm:$0xff] %vm2072_vm4, %v6259_v7  ;;  %3040 = vrot.lane.b32.xlu1 %v6186_v18, %s5149_s19  ;;  %4665 = vmatprep.mubr.msk.f32.mxu0 %vm907_vm2, %v2382_v20 }
 0xe4e   : > { %2345 = vst.msk [vmem:[%s5425_s26 + $0x88] sm:$0xff] %vm2072_vm4, %v6262_v19  ;;  %2346 = vst.msk [vmem:[%s5425_s26 + $0x90] sm:$0xff] %vm2072_vm4, %v6265_v21  ;;  %3038 = vrot.lane.b32.xlu0 %v6183_v36, %s5149_s19 }
 0xe4f   : > { %7680 = vst [vmem:[#allocation40_spill] sm:$0xff] %v6330_v49  ;;  %7681 = vst [vmem:[#allocation41_spill] sm:$0xff] %v6333_v29 }
 0xe50   : > { %7682 = vst [vmem:[#allocation42_spill] sm:$0xff] %v6336_v33  ;;  %7683 = vst [vmem:[#allocation43_spill] sm:$0xff] %v6339_v58  ;;  %4666 = vmatmul.mubr.msk.f32.gmra.mxu0 %vm907_vm2, %v2383_v56 }
 0xe51   : > { %2347 = vst.msk [vmem:[%s5425_s26 + $0x98] sm:$0xff] %vm2072_vm4, %v6280_v39  ;;  %2348 = vst.msk [vmem:[%s5425_s26 + $0xa0] sm:$0xff] %vm2072_vm4, %v6283_v22  ;;  %2946 = vrot.lane.b32.xlu1 %v6189_v34, %s5148_s28  ;;  %4668 = vmatprep.mubr.msk.f32.mxu0 %vm907_vm2, %v2384_v1 }
 0xe52   : > { %2349 = vst.msk [vmem:[%s5425_s26 + $0xa8] sm:$0xff] %vm2072_vm4, %v6286_v28  ;;  %2350 = vst.msk [vmem:[%s5425_s26 + $0xb0] sm:$0xff] %vm2072_vm4, %v6289_v24  ;;  %2756 = vrot.lane.b32.xlu0 %v6192_v30, %s5147_s7 }
 0xe53   : > { %2351 = vst.msk [vmem:[%s5425_s26 + $0xb8] sm:$0xff] %vm2072_vm4, %v6304_v6  ;;  %2352 = vst.msk [vmem:[%s5425_s26 + $0xc0] sm:$0xff] %vm2072_vm4, %v6307_v61 }
 0xe54   : > { %2353 = vst.msk [vmem:[%s5425_s26 + $0xc8] sm:$0xff] %vm2072_vm4, %v6310_v51  ;;  %2354 = vst.msk [vmem:[%s5425_s26 + $0xd0] sm:$0xff] %vm2072_vm4, %v6313_v26  ;;  %4669 = vmatmul.mubr.msk.f32.gmra.mxu0 %vm907_vm2, %v2385_v40 }
 0xe55   : > { %2355 = vst.msk [vmem:[%s5425_s26 + $0xd8] sm:$0xff] %vm2072_vm4, %v6330_v49  ;;  %2356 = vst.msk [vmem:[%s5425_s26 + $0xe0] sm:$0xff] %vm2072_vm4, %v6333_v29 }
 0xe56   : > { %2357 = vst.msk [vmem:[%s5425_s26 + $0xe8] sm:$0xff] %vm2072_vm4, %v6336_v33  ;;  %2359 = vst.msk [vmem:[%s5425_s26 + $0xf8] sm:$0xff] %vm2072_vm4, %v6339_v58  ;;  %s5150_s26 = smov 20  }
 0xe57   : > { %3136 = vrot.lane.b32.xlu1 %v6186_v18, %s5150_s26  ;;  %3134 = vrot.lane.b32.xlu0 %v6183_v36, %s5150_s26 }
 0xe5b   : > { %3042 = vrot.lane.b32.xlu1 %v6189_v34, %s5149_s19  ;;  %2852 = vrot.lane.b32.xlu0 %v6192_v30, %s5146_s22 }
 0xe5f   : > { %3232 = vrot.lane.b32.xlu1 %v6186_v18, %s5151_s13  ;;  %3230 = vrot.lane.b32.xlu0 %v6183_v36, %s5151_s13 }
 0xe63   : > { %2948 = vrot.lane.b32.xlu1 %v6192_v30, %s5148_s28  ;;  %2758 = vrot.lane.b32.xlu0 %v6195_v63, %s5147_s7 }
 0xe67   : > { %3326 = vrot.lane.b32.xlu1 %v6183_v36, %s5152_s3  ;;  %3138 = vrot.lane.b32.xlu0 %v6189_v34, %s5150_s26 }
 0xe6b   : > { %2854 = vrot.lane.b32.xlu1 %v6195_v63, %s5146_s22  ;;  %3328 = vrot.lane.b32.xlu0 %v6186_v18, %s5152_s3 }
 0xe6f   : > { %3234 = vrot.lane.b32.xlu1 %v6189_v34, %s5151_s13  ;;  %3044 = vrot.lane.b32.xlu0 %v6192_v30, %s5149_s19 }
 0xe73   : > { %2950 = vrot.lane.b32.xlu1 %v6195_v63, %s5148_s28  ;;  %2760 = vrot.lane.b32.xlu0 %v6198_v37, %s5147_s7 }
 0xe77   : > { %3330 = vrot.lane.b32.xlu1 %v6189_v34, %s5152_s3  ;;  %3140 = vrot.lane.b32.xlu0 %v6192_v30, %s5150_s26 }
 0xe7b   : > { %3046 = vrot.lane.b32.xlu1 %v6195_v63, %s5149_s19  ;;  %2856 = vrot.lane.b32.xlu0 %v6198_v37, %s5146_s22 }
 0xe7f   : > { %2762 = vrot.lane.b32.xlu1 %v6201_v11, %s5147_s7  ;;  %3236 = vrot.lane.b32.xlu0 %v6192_v30, %s5151_s13 }
 0xe83   : > { %3142 = vrot.lane.b32.xlu1 %v6195_v63, %s5150_s26  ;;  %2952 = vrot.lane.b32.xlu0 %v6198_v37, %s5148_s28 }
 0xe87   : > { %2858 = vrot.lane.b32.xlu1 %v6201_v11, %s5146_s22  ;;  %3332 = vrot.lane.b32.xlu0 %v6192_v30, %s5152_s3 }
 0xe8b   : > { %3238 = vrot.lane.b32.xlu1 %v6195_v63, %s5151_s13  ;;  %3048 = vrot.lane.b32.xlu0 %v6198_v37, %s5149_s19 }
 0xe8f   : > { %2954 = vrot.lane.b32.xlu1 %v6201_v11, %s5148_s28  ;;  %2764 = vrot.lane.b32.xlu0 %v6207_v44, %s5147_s7 }
 0xe93   : > { %3334 = vrot.lane.b32.xlu1 %v6195_v63, %s5152_s3  ;;  %3144 = vrot.lane.b32.xlu0 %v6198_v37, %s5150_s26 }
 0xe97   : > { %3050 = vrot.lane.b32.xlu1 %v6201_v11, %s5149_s19  ;;  %2860 = vrot.lane.b32.xlu0 %v6207_v44, %s5146_s22 }
 0xe9b   : > { %2766 = vrot.lane.b32.xlu1 %v6210_v25, %s5147_s7  ;;  %3240 = vrot.lane.b32.xlu0 %v6198_v37, %s5151_s13 }
 0xe9f   : > { %3146 = vrot.lane.b32.xlu1 %v6201_v11, %s5150_s26  ;;  %2956 = vrot.lane.b32.xlu0 %v6207_v44, %s5148_s28 }
 0xea3   : > { %2862 = vrot.lane.b32.xlu1 %v6210_v25, %s5146_s22  ;;  %3336 = vrot.lane.b32.xlu0 %v6198_v37, %s5152_s3 }
 0xea7   : > { %3242 = vrot.lane.b32.xlu1 %v6201_v11, %s5151_s13  ;;  %3052 = vrot.lane.b32.xlu0 %v6207_v44, %s5149_s19 }
 0xeab   : > { %2958 = vrot.lane.b32.xlu1 %v6210_v25, %s5148_s28  ;;  %2768 = vrot.lane.b32.xlu0 %v6213_v57, %s5147_s7 }
 0xeaf   : > { %3338 = vrot.lane.b32.xlu1 %v6201_v11, %s5152_s3  ;;  %3148 = vrot.lane.b32.xlu0 %v6207_v44, %s5150_s26  ;;  %v6503_v35 = vpop.permute.xlu1 %2846 }
 0xeb0   : > { %v6505_v17 = vpop.permute.xlu0 %2750 }
 0xeb3   : > { %3054 = vrot.lane.b32.xlu1 %v6210_v25, %s5149_s19  ;;  %2864 = vrot.lane.b32.xlu0 %v6213_v57, %s5146_s22  ;;  %v6511_v55 = vpop.permute.xlu1 %2848 }
 0xeb4   : > { %v6513_v53 = vpop.permute.xlu0 %2752 }
 0xeb7   : > { %2770 = vrot.lane.b32.xlu1 %v6216_v59, %s5147_s7  ;;  %3244 = vrot.lane.b32.xlu0 %v6207_v44, %s5151_s13  ;;  %v6519_v0 = vpop.permute.xlu1 %2942 }
 0xeb8   : > { %v6521_v54 = vpop.permute.xlu0 %2754 }
 0xebb   : > { %3150 = vrot.lane.b32.xlu1 %v6210_v25, %s5150_s26  ;;  %2960 = vrot.lane.b32.xlu0 %v6213_v57, %s5148_s28  ;;  %v6527_v46 = vpop.permute.xlu1 %2850 }
 0xebc   : > { %v6529_v3 = vpop.permute.xlu0 %2944 }
 0xebf   : > { %2866 = vrot.lane.b32.xlu1 %v6216_v59, %s5146_s22  ;;  %3340 = vrot.lane.b32.xlu0 %v6207_v44, %s5152_s3  ;;  %v6535_v62 = vpop.permute.xlu1 %3040 }
 0xec0   : > { %v6537_v4 = vpop.permute.xlu0 %3038 }
 0xec3   : > { %3246 = vrot.lane.b32.xlu1 %v6210_v25, %s5151_s13  ;;  %3056 = vrot.lane.b32.xlu0 %v6213_v57, %s5149_s19  ;;  %v6547_v32 = vpop.permute.xlu1 %2946 }
 0xec4   : > { %v6549_v48 = vpop.permute.xlu0 %2756 }
 0xec7   : > { %2962 = vrot.lane.b32.xlu1 %v6216_v59, %s5148_s28  ;;  %2772 = vrot.lane.b32.xlu0 %v6230_v31, %s5147_s7 }
 0xec9   : > { %v6555_v60 = vpop.permute.xlu1 %3136  ;;  %v6557_v15 = vpop.permute.xlu0 %3134 }
 0xecb   : > { %3342 = vrot.lane.b32.xlu1 %v6210_v25, %s5152_s3  ;;  %3152 = vrot.lane.b32.xlu0 %v6213_v57, %s5150_s26  ;;  %v2387_v25 = vld [vmem:[%s5405_s25 + $0xd8] sm:$0xff] }
 0xecd   : > { %v6563_v47 = vpop.permute.xlu1 %3042  ;;  %v6565_v9 = vpop.permute.xlu0 %2852 }
 0xecf   : > { %3058 = vrot.lane.b32.xlu1 %v6216_v59, %s5149_s19  ;;  %2868 = vrot.lane.b32.xlu0 %v6230_v31, %s5146_s22 }
 0xed1   : > { %v6571_v27 = vpop.permute.xlu1 %3232  ;;  %v6573_v14 = vpop.permute.xlu0 %3230 }
 0xed3   : > { %2774 = vrot.lane.b32.xlu1 %v6233_v38, %s5147_s7  ;;  %3248 = vrot.lane.b32.xlu0 %v6213_v57, %s5151_s13 }
 0xed5   : > { %v6579_v10 = vpop.permute.xlu1 %2948  ;;  %v6581_v43 = vpop.permute.xlu0 %2758 }
 0xed7   : > { %3154 = vrot.lane.b32.xlu1 %v6216_v59, %s5150_s26  ;;  %2964 = vrot.lane.b32.xlu0 %v6230_v31, %s5148_s28 }
 0xed9   : > { %v6587_v5 = vpop.permute.xlu1 %3326  ;;  %v6589_v12 = vpop.permute.xlu0 %3138 }
 0xedb   : > { %2870 = vrot.lane.b32.xlu1 %v6233_v38, %s5146_s22  ;;  %3344 = vrot.lane.b32.xlu0 %v6213_v57, %s5152_s3  ;;  %v2386_v57 = vld [vmem:[%s5405_s25 + $0xd0] sm:$0xff] }
 0xedc   : > { %4671 = vmatprep.mubr.msk.f32.mxu0 %vm907_vm2, %v2386_v57 }
 0xedd   : > { %v6595_v13 = vpop.permute.xlu1 %2854  ;;  %v6597_v45 = vpop.permute.xlu0 %3328  ;;  %4672 = vmatmul.mubr.msk.f32.gmra.mxu0 %vm907_vm2, %v2387_v25 }
 0xedf   : > { %3250 = vrot.lane.b32.xlu1 %v6216_v59, %s5151_s13  ;;  %3060 = vrot.lane.b32.xlu0 %v6230_v31, %s5149_s19 }
 0xee1   : > { %v6607_v41 = vpop.permute.xlu1 %3234  ;;  %v6609_v52 = vpop.permute.xlu0 %3044 }
 0xee3   : > { %2966 = vrot.lane.b32.xlu1 %v6233_v38, %s5148_s28  ;;  %2776 = vrot.lane.b32.xlu0 %v6236_v42, %s5147_s7 }
 0xee5   : > { %v6615_v23 = vpop.permute.xlu1 %2950  ;;  %v6617_v16 = vpop.permute.xlu0 %2760 }
 0xee7   : > { %3346 = vrot.lane.b32.xlu1 %v6216_v59, %s5152_s3  ;;  %3156 = vrot.lane.b32.xlu0 %v6230_v31, %s5150_s26 }
 0xee9   : > { %v6623_v20 = vpop.permute.xlu1 %3330  ;;  %v6625_v56 = vpop.permute.xlu0 %3140 }
 0xeeb   : > { %3062 = vrot.lane.b32.xlu1 %v6233_v38, %s5149_s19  ;;  %2872 = vrot.lane.b32.xlu0 %v6236_v42, %s5146_s22 }
 0xeed   : > { %v6631_v1 = vpop.permute.xlu1 %3046  ;;  %v6633_v40 = vpop.permute.xlu0 %2856 }
 0xeef   : > { %2778 = vrot.lane.b32.xlu1 %v6239_v50, %s5147_s7  ;;  %3252 = vrot.lane.b32.xlu0 %v6230_v31, %s5151_s13 }
 0xef1   : > { %v6639_v58 = vpop.permute.xlu1 %2762  ;;  %v6641_v8 = vpop.permute.xlu0 %3236 }
 0xef3   : > { %3158 = vrot.lane.b32.xlu1 %v6233_v38, %s5150_s26  ;;  %2968 = vrot.lane.b32.xlu0 %v6236_v42, %s5148_s28 }
 0xef5   : > { %v6647_v33 = vpop.permute.xlu1 %3142  ;;  %v6649_v29 = vpop.permute.xlu0 %2952 }
 0xef6   : > { %7684 = vst [vmem:[#allocation44_spill] sm:$0xff] %v6649_v29 }
 0xef7   : > { %2874 = vrot.lane.b32.xlu1 %v6239_v50, %s5146_s22  ;;  %3348 = vrot.lane.b32.xlu0 %v6230_v31, %s5152_s3 }
 0xef9   : > { %v6655_v49 = vpop.permute.xlu1 %2858  ;;  %v6657_v59 = vpop.permute.xlu0 %3332 }
 0xefa   : > { %7685 = vst [vmem:[#allocation45_spill] sm:$0xff] %v6655_v49 }
 0xefb   : > { %3254 = vrot.lane.b32.xlu1 %v6233_v38, %s5151_s13  ;;  %3064 = vrot.lane.b32.xlu0 %v6236_v42, %s5149_s19 }
 0xefd   : > { %v6667_v44 = vpop.permute.xlu1 %3238  ;;  %v6669_v29 = vpop.permute.xlu0 %3048 }
 0xefe   : > { %7686 = vst [vmem:[#allocation46_spill] sm:$0xff] %v6669_v29 }
 0xeff   : > { %2970 = vrot.lane.b32.xlu1 %v6239_v50, %s5148_s28  ;;  %2780 = vrot.lane.b32.xlu0 %v6256_v2, %s5147_s7 }
 0xf01   : > { %v6675_v31 = vpop.permute.xlu1 %2954  ;;  %v6677_v49 = vpop.permute.xlu0 %2764 }
 0xf02   : > { %7687 = vst [vmem:[#allocation47_spill] sm:$0xff] %v6675_v31  ;;  %7688 = vst [vmem:[#allocation48_spill] sm:$0xff] %v6677_v49 }
 0xf03   : > { %3350 = vrot.lane.b32.xlu1 %v6233_v38, %s5152_s3  ;;  %3160 = vrot.lane.b32.xlu0 %v6236_v42, %s5150_s26 }
 0xf05   : > { %v6683_v25 = vpop.permute.xlu1 %3334  ;;  %v6685_v57 = vpop.permute.xlu0 %3144 }
 0xf06   : > { %7689 = vst [vmem:[#allocation49_spill] sm:$0xff] %v6683_v25  ;;  %7690 = vst [vmem:[#allocation50_spill] sm:$0xff] %v6685_v57  ;;  %v2389_v25 = vld [vmem:[%s5405_s25 + $0xe8] sm:$0xff] }
 0xf07   : > { %3066 = vrot.lane.b32.xlu1 %v6239_v50, %s5149_s19  ;;  %2876 = vrot.lane.b32.xlu0 %v6256_v2, %s5146_s22 }
 0xf09   : > { %v6691_v31 = vpop.permute.xlu1 %3050  ;;  %v6693_v49 = vpop.permute.xlu0 %2860 }
 0xf0a   : > { %7691 = vst [vmem:[#allocation51_spill] sm:$0xff] %v6691_v31  ;;  %7692 = vst [vmem:[#allocation52_spill] sm:$0xff] %v6693_v49 }
 0xf0b   : > { %2782 = vrot.lane.b32.xlu1 %v6259_v7, %s5147_s7  ;;  %3256 = vrot.lane.b32.xlu0 %v6236_v42, %s5151_s13 }
 0xf0d   : > { %v6699_v38 = vpop.permute.xlu1 %2766  ;;  %v6701_v57 = vpop.permute.xlu0 %3240 }
 0xf0e   : > { %7693 = vst [vmem:[#allocation53_spill] sm:$0xff] %v6699_v38  ;;  %7694 = vst [vmem:[#allocation54_spill] sm:$0xff] %v6701_v57  ;;  %v2388_v57 = vld [vmem:[%s5405_s25 + $0xe0] sm:$0xff] }
 0xf0f   : > { %3162 = vrot.lane.b32.xlu1 %v6239_v50, %s5150_s26  ;;  %2972 = vrot.lane.b32.xlu0 %v6256_v2, %s5148_s28 }
 0xf10   : > { %4674 = vmatprep.mubr.msk.f32.mxu0 %vm907_vm2, %v2388_v57 }
 0xf11   : > { %v6707_v29 = vpop.permute.xlu1 %3146  ;;  %v6709_v31 = vpop.permute.xlu0 %2956  ;;  %4675 = vmatmul.mubr.msk.f32.gmra.mxu0 %vm907_vm2, %v2389_v25 }
 0xf12   : > { %7695 = vst [vmem:[#allocation55_spill] sm:$0xff] %v6709_v31 }
 0xf13   : > { %2878 = vrot.lane.b32.xlu1 %v6259_v7, %s5146_s22  ;;  %3352 = vrot.lane.b32.xlu0 %v6236_v42, %s5152_s3 }
 0xf15   : > { %v6715_v49 = vpop.permute.xlu1 %2862  ;;  %v6717_v38 = vpop.permute.xlu0 %3336 }
 0xf16   : > { %7696 = vst [vmem:[#allocation56_spill] sm:$0xff] %v6715_v49 }
 0xf17   : > { %3258 = vrot.lane.b32.xlu1 %v6239_v50, %s5151_s13  ;;  %3068 = vrot.lane.b32.xlu0 %v6256_v2, %s5149_s19 }
 0xf19   : > { %v6727_v31 = vpop.permute.xlu1 %3242  ;;  %v6729_v42 = vpop.permute.xlu0 %3052 }
 0xf1a   : > { %7697 = vst [vmem:[#allocation57_spill] sm:$0xff] %v6727_v31  ;;  %7698 = vst [vmem:[#allocation58_spill] sm:$0xff] %v6729_v42 }
 0xf1b   : > { %2974 = vrot.lane.b32.xlu1 %v6259_v7, %s5148_s28  ;;  %2784 = vrot.lane.b32.xlu0 %v6262_v19, %s5147_s7 }
 0xf1d   : > { %v6735_v49 = vpop.permute.xlu1 %2958  ;;  %v6737_v57 = vpop.permute.xlu0 %2768 }
 0xf1e   : > { %7699 = vst [vmem:[#allocation59_spill] sm:$0xff] %v6735_v49  ;;  %7700 = vst [vmem:[#allocation60_spill] sm:$0xff] %v6737_v57 }
 0xf1f   : > { %3354 = vrot.lane.b32.xlu1 %v6239_v50, %s5152_s3  ;;  %3164 = vrot.lane.b32.xlu0 %v6256_v2, %s5150_s26  ;;  %v2390_v50 = vld [vmem:[%s5405_s25 + $0xf0] sm:$0xff] }
 0xf20   : > { %4677 = vmatprep.mubr.msk.f32.mxu0 %vm907_vm2, %v2390_v50 }
 0xf21   : > { %v6743_v25 = vpop.permute.xlu1 %3338  ;;  %v6745_v42 = vpop.permute.xlu0 %3148 }
 0xf22   : > { %7701 = vst [vmem:[#allocation61_spill] sm:$0xff] %v6743_v25  ;;  %7702 = vst [vmem:[#allocation62_spill] sm:$0xff] %v6745_v42  ;;  %v2391_v25 = vld [vmem:[%s5405_s25 + $0xf8] sm:$0xff] }
 0xf23   : > { %3070 = vrot.lane.b32.xlu1 %v6259_v7, %s5149_s19  ;;  %2880 = vrot.lane.b32.xlu0 %v6262_v19, %s5146_s22 }
 0xf24   : > { %4678 = vmatmul.mubr.msk.f32.gmra.mxu0 %vm907_vm2, %v2391_v25 }
 0xf25   : > { %v6751_v31 = vpop.permute.xlu1 %3054  ;;  %v6753_v49 = vpop.permute.xlu0 %2864 }
 0xf26   : > { %7703 = vst [vmem:[#allocation63_spill] sm:$0xff] %v6751_v31  ;;  %7704 = vst [vmem:[#allocation64_spill] sm:$0xff] %v6753_v49 }
 0xf27   : > { %2786 = vrot.lane.b32.xlu1 %v6265_v21, %s5147_s7  ;;  %3260 = vrot.lane.b32.xlu0 %v6256_v2, %s5151_s13 }
 0xf29   : > { %v6762_v42 = vpop.permute.xlu1 %2770  ;;  %v6765_v57 = vpop.permute.xlu0 %3244 }
 0xf2a   : > { %7705 = vst [vmem:[#allocation65_spill] sm:$0xff] %v6762_v42 }
 0xf2b   : > { %3166 = vrot.lane.b32.xlu1 %v6259_v7, %s5150_s26  ;;  %2976 = vrot.lane.b32.xlu0 %v6262_v19, %s5148_s28 }
 0xf2d   : > { %v6771_v49 = vpop.permute.xlu1 %3150  ;;  %v6773_v31 = vpop.permute.xlu0 %2960 }
 0xf2e   : > { %7706 = vst [vmem:[#allocation66_spill] sm:$0xff] %v6771_v49 }
 0xf2f   : > { %2882 = vrot.lane.b32.xlu1 %v6265_v21, %s5146_s22  ;;  %3356 = vrot.lane.b32.xlu0 %v6256_v2, %s5152_s3 }
 0xf31   : > { %v6779_v50 = vpop.permute.xlu1 %2866  ;;  %v6781_v25 = vpop.permute.xlu0 %3340 }
 0xf32   : > { %7707 = vst [vmem:[#allocation67_spill] sm:$0xff] %v6779_v50  ;;  %7708 = vst [vmem:[#allocation68_spill] sm:$0xff] %v6781_v25 }
 0xf33   : > { %3262 = vrot.lane.b32.xlu1 %v6259_v7, %s5151_s13  ;;  %3072 = vrot.lane.b32.xlu0 %v6262_v19, %s5149_s19 }
 0xf35   : > { %v6787_v42 = vpop.permute.xlu1 %3246  ;;  %v6789_v49 = vpop.permute.xlu0 %3056 }
 0xf36   : > { %7709 = vst [vmem:[#allocation69_spill] sm:$0xff] %v6787_v42  ;;  %7710 = vst [vmem:[#allocation70_spill] sm:$0xff] %v6789_v49 }
 0xf37   : > { %2978 = vrot.lane.b32.xlu1 %v6265_v21, %s5148_s28  ;;  %2788 = vrot.lane.b32.xlu0 %v6280_v39, %s5147_s7 }
 0xf39   : > { %v6795_v2 = vpop.permute.xlu1 %2962  ;;  %v6797_v50 = vpop.permute.xlu0 %2772 }
 0xf3a   : > { %7711 = vst [vmem:[#allocation71_spill] sm:$0xff] %v6795_v2  ;;  %7712 = vst [vmem:[#allocation72_spill] sm:$0xff] %v6797_v50 }
 0xf3b   : > { %3358 = vrot.lane.b32.xlu1 %v6259_v7, %s5152_s3  ;;  %3168 = vrot.lane.b32.xlu0 %v6262_v19, %s5150_s26 }
 0xf3d   : > { %v6803_v25 = vpop.permute.xlu1 %3342  ;;  %v6805_v42 = vpop.permute.xlu0 %3152 }
 0xf3e   : > { %7713 = vst [vmem:[#allocation73_spill] sm:$0xff] %v6803_v25 }
 0xf3f   : > { %3074 = vrot.lane.b32.xlu1 %v6265_v21, %s5149_s19  ;;  %2884 = vrot.lane.b32.xlu0 %v6280_v39, %s5146_s22 }
 0xf41   : > { %v6811_v49 = vpop.permute.xlu1 %3058  ;;  %v6813_v2 = vpop.permute.xlu0 %2868 }
 0xf42   : > { %7714 = vst [vmem:[#allocation74_spill] sm:$0xff] %v6811_v49  ;;  %7715 = vst [vmem:[#allocation75_spill] sm:$0xff] %v6813_v2 }
 0xf43   : > { %2790 = vrot.lane.b32.xlu1 %v6283_v22, %s5147_s7  ;;  %3264 = vrot.lane.b32.xlu0 %v6262_v19, %s5151_s13 }
 0xf45   : > { %v6819_v7 = vpop.permute.xlu1 %2774  ;;  %v6821_v50 = vpop.permute.xlu0 %3248 }
 0xf46   : > { %7716 = vst [vmem:[#allocation76_spill] sm:$0xff] %v6819_v7  ;;  %7717 = vst [vmem:[#allocation77_spill] sm:$0xff] %v6821_v50 }
 0xf47   : > { %3170 = vrot.lane.b32.xlu1 %v6265_v21, %s5150_s26  ;;  %2980 = vrot.lane.b32.xlu0 %v6280_v39, %s5148_s28 }
 0xf49   : > { %v6827_v25 = vpop.permute.xlu1 %3154  ;;  %v6829_v49 = vpop.permute.xlu0 %2964 }
 0xf4a   : > { %7718 = vst [vmem:[#allocation78_spill] sm:$0xff] %v6827_v25  ;;  %7719 = vst [vmem:[#allocation79_spill] sm:$0xff] %v6829_v49 }
 0xf4b   : > { %2886 = vrot.lane.b32.xlu1 %v6283_v22, %s5146_s22  ;;  %3360 = vrot.lane.b32.xlu0 %v6262_v19, %s5152_s3 }
 0xf4d   : > { %v6835_v2 = vpop.permute.xlu1 %2870  ;;  %v6837_v7 = vpop.permute.xlu0 %3344 }
 0xf4e   : > { %7720 = vst [vmem:[#allocation80_spill] sm:$0xff] %v6835_v2 }
 0xf4f   : > { %3266 = vrot.lane.b32.xlu1 %v6265_v21, %s5151_s13  ;;  %3076 = vrot.lane.b32.xlu0 %v6280_v39, %s5149_s19 }
 0xf51   : > { %v6843_v50 = vpop.permute.xlu1 %3250  ;;  %v6845_v25 = vpop.permute.xlu0 %3060 }
 0xf52   : > { %7721 = vst [vmem:[#allocation81_spill] sm:$0xff] %v6843_v50  ;;  %7722 = vst [vmem:[#allocation82_spill] sm:$0xff] %v6845_v25 }
 0xf53   : > { %2982 = vrot.lane.b32.xlu1 %v6283_v22, %s5148_s28  ;;  %2792 = vrot.lane.b32.xlu0 %v6286_v28, %s5147_s7 }
 0xf55   : > { %v6851_v19 = vpop.permute.xlu1 %2966  ;;  %v6853_v2 = vpop.permute.xlu0 %2776 }
 0xf56   : > { %7723 = vst [vmem:[#allocation83_spill] sm:$0xff] %v6851_v19  ;;  %7724 = vst [vmem:[#allocation84_spill] sm:$0xff] %v6853_v2 }
 0xf57   : > { %3362 = vrot.lane.b32.xlu1 %v6265_v21, %s5152_s3  ;;  %3172 = vrot.lane.b32.xlu0 %v6280_v39, %s5150_s26 }
 0xf59   : > { %v6859_v49 = vpop.permute.xlu1 %3346  ;;  %v6861_v50 = vpop.permute.xlu0 %3156 }
 0xf5a   : > { %7725 = vst [vmem:[#allocation85_spill] sm:$0xff] %v6861_v50 }
 0xf5b   : > { %3078 = vrot.lane.b32.xlu1 %v6283_v22, %s5149_s19  ;;  %2888 = vrot.lane.b32.xlu0 %v6286_v28, %s5146_s22 }
 0xf5d   : > { %v6867_v25 = vpop.permute.xlu1 %3062  ;;  %v6869_v19 = vpop.permute.xlu0 %2872 }
 0xf5e   : > { %7726 = vst [vmem:[#allocation86_spill] sm:$0xff] %v6867_v25  ;;  %7727 = vst [vmem:[#allocation87_spill] sm:$0xff] %v6869_v19 }
 0xf5f   : > { %2794 = vrot.lane.b32.xlu1 %v6289_v24, %s5147_s7  ;;  %3268 = vrot.lane.b32.xlu0 %v6280_v39, %s5151_s13 }
 0xf61   : > { %v6875_v21 = vpop.permute.xlu1 %2778  ;;  %v6877_v2 = vpop.permute.xlu0 %3252 }
 0xf62   : > { %7728 = vst [vmem:[#allocation88_spill] sm:$0xff] %v6875_v21  ;;  %7729 = vst [vmem:[#allocation89_spill] sm:$0xff] %v6877_v2 }
 0xf63   : > { %3174 = vrot.lane.b32.xlu1 %v6283_v22, %s5150_s26  ;;  %2984 = vrot.lane.b32.xlu0 %v6286_v28, %s5148_s28 }
 0xf65   : > { %v6883_v50 = vpop.permute.xlu1 %3158  ;;  %v6885_v25 = vpop.permute.xlu0 %2968 }
 0xf66   : > { %7730 = vst [vmem:[#allocation90_spill] sm:$0xff] %v6883_v50  ;;  %7731 = vst [vmem:[#allocation91_spill] sm:$0xff] %v6885_v25 }
 0xf67   : > { %2890 = vrot.lane.b32.xlu1 %v6289_v24, %s5146_s22  ;;  %3364 = vrot.lane.b32.xlu0 %v6280_v39, %s5152_s3 }
 0xf69   : > { %v6891_v19 = vpop.permute.xlu1 %2874  ;;  %v6893_v21 = vpop.permute.xlu0 %3348 }
 0xf6a   : > { %7732 = vst [vmem:[#allocation92_spill] sm:$0xff] %v6891_v19 }
 0xf6b   : > { %3270 = vrot.lane.b32.xlu1 %v6283_v22, %s5151_s13  ;;  %3080 = vrot.lane.b32.xlu0 %v6286_v28, %s5149_s19 }
 0xf6d   : > { %v6899_v2 = vpop.permute.xlu1 %3254  ;;  %v6901_v50 = vpop.permute.xlu0 %3064 }
 0xf6e   : > { %7733 = vst [vmem:[#allocation93_spill] sm:$0xff] %v6899_v2  ;;  %7734 = vst [vmem:[#allocation94_spill] sm:$0xff] %v6901_v50 }
 0xf6f   : > { %2986 = vrot.lane.b32.xlu1 %v6289_v24, %s5148_s28  ;;  %2796 = vrot.lane.b32.xlu0 %v6304_v6, %s5147_s7 }
 0xf71   : > { %v6907_v39 = vpop.permute.xlu1 %2970  ;;  %v6909_v19 = vpop.permute.xlu0 %2780 }
 0xf72   : > { %7735 = vst [vmem:[#allocation95_spill] sm:$0xff] %v6907_v39  ;;  %7736 = vst [vmem:[#allocation96_spill] sm:$0xff] %v6909_v19 }
 0xf73   : > { %3366 = vrot.lane.b32.xlu1 %v6283_v22, %s5152_s3  ;;  %3176 = vrot.lane.b32.xlu0 %v6286_v28, %s5150_s26 }
 0xf75   : > { %v6915_v25 = vpop.permute.xlu1 %3350  ;;  %v6917_v2 = vpop.permute.xlu0 %3160 }
 0xf76   : > { %7737 = vst [vmem:[#allocation97_spill] sm:$0xff] %v6915_v25  ;;  %7738 = vst [vmem:[#allocation98_spill] sm:$0xff] %v6917_v2 }
 0xf77   : > { %3082 = vrot.lane.b32.xlu1 %v6289_v24, %s5149_s19  ;;  %2892 = vrot.lane.b32.xlu0 %v6304_v6, %s5146_s22 }
 0xf79   : > { %v6923_v50 = vpop.permute.xlu1 %3066  ;;  %v6925_v39 = vpop.permute.xlu0 %2876 }
 0xf7a   : > { %7739 = vst [vmem:[#allocation99_spill] sm:$0xff] %v6923_v50  ;;  %7740 = vst [vmem:[#allocation100_spill] sm:$0xff] %v6925_v39 }
 0xf7b   : > { %2798 = vrot.lane.b32.xlu1 %v6307_v61, %s5147_s7  ;;  %3272 = vrot.lane.b32.xlu0 %v6286_v28, %s5151_s13 }
 0xf7d   : > { %v6931_v22 = vpop.permute.xlu1 %2782  ;;  %v6933_v19 = vpop.permute.xlu0 %3256 }
 0xf7e   : > { %7741 = vst [vmem:[#allocation101_spill] sm:$0xff] %v6931_v22  ;;  %7742 = vst [vmem:[#allocation102_spill] sm:$0xff] %v6933_v19  ;;  %v4634_v19 = vpop.f32.mrf.mxu0 }
 0xf7f   : > { %3178 = vrot.lane.b32.xlu1 %v6289_v24, %s5150_s26  ;;  %2988 = vrot.lane.b32.xlu0 %v6304_v6, %s5148_s28 }
 0xf81   : > { %v6939_v2 = vpop.permute.xlu1 %3162  ;;  %v6941_v50 = vpop.permute.xlu0 %2972 }
 0xf82   : > { %7743 = vst [vmem:[#allocation103_spill] sm:$0xff] %v6939_v2  ;;  %7744 = vst [vmem:[#allocation104_spill] sm:$0xff] %v6941_v50  ;;  %v3423_v50 = vsel %vm2072_vm4, %v6186_v18, %v6513_v53  ;;  %v3424_v53 = vsel %vm2072_vm4, %v6189_v34, %v6521_v54 }
 0xf83   : > { %2894 = vrot.lane.b32.xlu1 %v6307_v61, %s5146_s22  ;;  %3368 = vrot.lane.b32.xlu0 %v6286_v28, %s5152_s3  ;;  %v3422_v28 = vsel %vm2072_vm4, %v6183_v36, %v6505_v17 }
 0xf84   : > { %v3455_v17 = vsel %vm3454_vm5, %v3422_v28, %v6503_v35 }
 0xf85   : > { %v6947_v39 = vpop.permute.xlu1 %2878  ;;  %v6949_v22 = vpop.permute.xlu0 %3352  ;;  %v3488_v34 = vsel %vm3487_vm6, %v3455_v17, %v6519_v0 }
 0xf86   : > { %7745 = vst [vmem:[#allocation105_spill] sm:$0xff] %v6947_v39  ;;  %v2559_v39 = vpop.f32.mrf.mxu0  ;;  %v3520_v28 = vsel %vm1010_vm3, %v3488_v34, %v6537_v4 }
 0xf87   : > { %3274 = vrot.lane.b32.xlu1 %v6289_v24, %s5151_s13  ;;  %3084 = vrot.lane.b32.xlu0 %v6304_v6, %s5149_s19 }
 0xf89   : > { %v6955_v2 = vpop.permute.xlu1 %3258  ;;  %v6960_v25 = vpop.permute.xlu0 %3068 }
 0xf8a   : > { %7746 = vst [vmem:[#allocation106_spill] sm:$0xff] %v6955_v2  ;;  %7747 = vst [vmem:[#allocation107_spill] sm:$0xff] %v6960_v25  ;;  %v3456_v2 = vsel %vm3454_vm5, %v3423_v50, %v6511_v55  ;;  %v3457_v55 = vsel %vm3454_vm5, %v3424_v53, %v6527_v46 }
 0xf8b   : > { %2990 = vrot.lane.b32.xlu1 %v6307_v61, %s5148_s28  ;;  %2800 = vrot.lane.b32.xlu0 %v6310_v51, %s5147_s7  ;;  %v3489_v25 = vsel %vm3487_vm6, %v3456_v2, %v6529_v3  ;;  %v3490_v2 = vsel %vm3487_vm6, %v3457_v55, %v6547_v32  ;;  %v3553_v3 = vsel %vm3552_vm7, %v3520_v28, %v6557_v15 }
 0xf8c   : > { %v3521_v50 = vsel %vm1010_vm3, %v3489_v25, %v6535_v62  ;;  %v3522_v35 = vsel %vm1010_vm3, %v3490_v2, %v6563_v47  ;;  %v3586_v4 = vsel %vm3585_vm8, %v3553_v3, %v6573_v14  ;;  %v3425_v15 = vsel %vm2072_vm4, %v6192_v30, %v6549_v48 }
 0xf8d   : > { %v6971_v18 = vpop.permute.xlu1 %2974  ;;  %v6978_v36 = vpop.permute.xlu0 %2784  ;;  %v3554_v54 = vsel %vm3552_vm7, %v3521_v50, %v6555_v60  ;;  %v3555_v62 = vsel %vm3552_vm7, %v3522_v35, %v6589_v12  ;;  %v3619_v12 = vsel %vm3618_vm9, %v3586_v4, %v6587_v5  ;;  %v3458_v14 = vsel %vm3454_vm5, %v3425_v15, %v6565_v9  ;;  %v7750_v35 = vld [vmem:[#allocation49_spill] sm:$0xff] }
 0xf8e   : > { %7748 = vst [vmem:[#allocation108_spill] sm:$0xff] %v6971_v18  ;;  %v4637_v18 = vpop.f32.mrf.mxu0  ;;  %v3587_v46 = vsel %vm3585_vm8, %v3554_v54, %v6571_v27  ;;  %v3588_v47 = vsel %vm3585_vm8, %v3555_v62, %v6607_v41  ;;  %v3491_v30 = vsel %vm3487_vm6, %v3458_v14, %v6579_v10  ;;  %v3426_v48 = vsel %vm2072_vm4, %v6195_v63, %v6581_v43  ;;  %v7752_v62 = vld [vmem:[#allocation46_spill] sm:$0xff]  ;;  %v7755_v15 = vld [vmem:[#allocation25_spill] sm:$0xff] }
 0xf8f   : > { %3370 = vrot.lane.b32.xlu1 %v6289_v24, %s5152_s3  ;;  %3180 = vrot.lane.b32.xlu0 %v6304_v6, %s5150_s26  ;;  %v3620_v32 = vsel %vm3618_vm9, %v3587_v46, %v6597_v45  ;;  %v3621_v45 = vsel %vm3618_vm9, %v3588_v47, %v6623_v20  ;;  %v3651_v20 = vmul.f32 %v3619_v12, %v2559_v39 }
 0xf90   : > { %v2569_v27 = vpop.f32.mrf.mxu0  ;;  %v3652_v41 = vmul.f32 %v4634_v19, %v3620_v32  ;;  %v3459_v17 = vsel %vm3454_vm5, %v3426_v48, %v6595_v13  ;;  %v3523_v19 = vsel %vm1010_vm3, %v3491_v30, %v6609_v52 }
 0xf91   : > { %v7002_v0 = vpop.permute.xlu1 %3354  ;;  %v7010_v60 = vpop.permute.xlu0 %3164  ;;  %v3653_v9 = vmul.f32 %v3621_v45, %v2569_v27  ;;  %v3492_v10 = vsel %vm3487_vm6, %v3459_v17, %v6615_v23  ;;  %v3556_v55 = vsel %vm3552_vm7, %v3523_v19, %v6625_v56  ;;  %v3427_v23 = vsel %vm2072_vm4, %v6198_v37, %v6617_v16  ;;  %v7754_v27 = vld [vmem:[#allocation48_spill] sm:$0xff]  ;;  %v7756_v45 = vld [vmem:[#allocation50_spill] sm:$0xff] }
 0xf92   : > { %v7029_v25 = vpop.f32.mrf.mxu0  ;;  %v3684_v63 = vsel %vm907_vm2, %v3652_v41, 0.0  ;;  %v3524_v39 = vsel %vm1010_vm3, %v3492_v10, %v6631_v1  ;;  %v3589_v43 = vsel %vm3585_vm8, %v3556_v55, %v6641_v8  ;;  %v3683_v1 = vsel %vm907_vm2, %v3651_v20, 0.0  ;;  %v7758_v20 = vld [vmem:[#allocation52_spill] sm:$0xff]  ;;  %v7759_v19 = vld [vmem:[#allocation54_spill] sm:$0xff]  ;;  %v7760_v55 = vld [vmem:[#allocation53_spill] sm:$0xff] }
 0xf93   : > { %3086 = vrot.lane.b32.xlu1 %v6307_v61, %s5149_s19  ;;  %2896 = vrot.lane.b32.xlu0 %v6310_v51, %s5146_s22  ;;  %v3557_v56 = vsel %vm3552_vm7, %v3524_v39, %v6647_v33  ;;  %v3622_v50 = vsel %vm3618_vm9, %v3589_v43, %v6657_v59  ;;  %v3686_v2 = vsel %vm907_vm2, %v3653_v9, 0.0  ;;  %v3460_v8 = vsel %vm3454_vm5, %v3427_v23, %v6633_v40  ;;  %v7749_v33 = vld [vmem:[#allocation44_spill] sm:$0xff]  ;;  %v7751_v40 = vld [vmem:[#allocation45_spill] sm:$0xff] }
 0xf94   : > { %v2579_v13 = vpop.f32.mrf.mxu0  ;;  %v3590_v54 = vsel %vm3585_vm8, %v3557_v56, %v6667_v44  ;;  %v3685_v37 = vadd.f32 %v3684_v63, %v3683_v1  ;;  %v3428_v59 = vsel %vm2072_vm4, %v6201_v11, %v6639_v58  ;;  %v3493_v16 = vsel %vm3487_vm6, %v3460_v8, %v7749_v33  ;;  %v7753_v11 = vld [vmem:[#allocation47_spill] sm:$0xff]  ;;  %v7761_v63 = vld [vmem:[#allocation26_spill] sm:$0xff]  ;;  %v7763_v1 = vld [vmem:[#allocation56_spill] sm:$0xff] }
 0xf95   : > { %v7031_v53 = vpop.permute.xlu1 %3070  ;;  %v7038_v5 = vpop.permute.xlu0 %2880  ;;  %v3623_v46 = vsel %vm3618_vm9, %v3590_v54, %v7750_v35  ;;  %v3461_v44 = vsel %vm3454_vm5, %v3428_v59, %v7751_v40  ;;  %v3654_v3 = vmul.f32 %v4637_v18, %v3622_v50  ;;  %v3525_v32 = vsel %vm1010_vm3, %v3493_v16, %v7752_v62  ;;  %v7757_v18 = vld [vmem:[#allocation51_spill] sm:$0xff]  ;;  %v7764_v8 = vld [vmem:[#allocation57_spill] sm:$0xff]  ;;  %v7767_v35 = vld [vmem:[#allocation60_spill] sm:$0xff] }
 0xf96   : > { %v4643_v28 = vpop.f32.mrf.mxu0  ;;  %v3687_v47 = vadd.f32 %v3686_v2, %v3685_v37  ;;  %v3494_v58 = vsel %vm3487_vm6, %v3461_v44, %v7753_v11  ;;  %v3429_v12 = vsel %vm2072_vm4, %v7755_v15, %v7754_v27  ;;  %v3558_v14 = vsel %vm3552_vm7, %v3525_v32, %v7756_v45  ;;  %v7765_v37 = vld [vmem:[#allocation58_spill] sm:$0xff]  ;;  %v7766_v16 = vld [vmem:[#allocation59_spill] sm:$0xff]  ;;  %v7770_v62 = vld [vmem:[#allocation61_spill] sm:$0xff] }
 0xf97   : > { %2802 = vrot.lane.b32.xlu1 %v6313_v26, %s5147_s7  ;;  %3276 = vrot.lane.b32.xlu0 %v6304_v6, %s5151_s13  ;;  %v3655_v30 = vmul.f32 %v3623_v46, %v2579_v13  ;;  %v3526_v48 = vsel %vm1010_vm3, %v3494_v58, %v7757_v18  ;;  %v3462_v17 = vsel %vm3454_vm5, %v3429_v12, %v7758_v20  ;;  %v7762_v13 = vld [vmem:[#allocation55_spill] sm:$0xff]  ;;  %v3688_v50 = vsel %vm907_vm2, %v3654_v3, 0.0  ;;  %v7769_v44 = vld [vmem:[#allocation62_spill] sm:$0xff]  ;;  %v7772_v12 = vld [vmem:[#allocation64_spill] sm:$0xff] }
 0xf98   : > { %v3591_v9 = vsel %vm3585_vm8, %v3558_v14, %v7759_v19  ;;  %v2589_v10 = vpop.f32.mrf.mxu0  ;;  %v3430_v39 = vsel %vm2072_vm4, %v7761_v63, %v7760_v55  ;;  %v3559_v43 = vsel %vm3552_vm7, %v3526_v48, %v6707_v29  ;;  %v3495_v23 = vsel %vm3487_vm6, %v3462_v17, %v7762_v13  ;;  %v7768_v46 = vld [vmem:[#allocation27_spill] sm:$0xff]  ;;  %v7773_v48 = vld [vmem:[#allocation66_spill] sm:$0xff]  ;;  %v7774_v17 = vld [vmem:[#allocation68_spill] sm:$0xff] }
 0xf99   : > { %v7057_v52 = vpop.permute.xlu1 %2786  ;;  %v7066_v34 = vpop.permute.xlu0 %3260  ;;  %v3624_v56 = vsel %vm3618_vm9, %v3591_v9, %v6717_v38  ;;  %v3463_v2 = vsel %vm3454_vm5, %v3430_v39, %v7763_v1  ;;  %v3592_v54 = vsel %vm3585_vm8, %v3559_v43, %v7764_v8  ;;  %v3527_v29 = vsel %vm1010_vm3, %v3495_v23, %v7765_v37  ;;  %v7771_v27 = vld [vmem:[#allocation63_spill] sm:$0xff]  ;;  %v7775_v55 = vld [vmem:[#allocation65_spill] sm:$0xff]  ;;  %v7778_v43 = vld [vmem:[#allocation70_spill] sm:$0xff] }
 0xf9a   : > { %v4646_v59 = vpop.f32.mrf.mxu0  ;;  %v3496_v38 = vsel %vm3487_vm6, %v3463_v2, %v7766_v16  ;;  %v3431_v40 = vsel %vm2072_vm4, %v7768_v46, %v7767_v35  ;;  %v3560_v3 = vsel %vm3552_vm7, %v3527_v29, %v7769_v44  ;;  %v3625_v32 = vsel %vm3618_vm9, %v3592_v54, %v7770_v62  ;;  %v7777_v39 = vld [vmem:[#allocation69_spill] sm:$0xff]  ;;  %v7779_v1 = vld [vmem:[#allocation67_spill] sm:$0xff]  ;;  %v7784_v62 = vld [vmem:[#allocation40_spill] sm:$0xff] }
 0xf9b   : > { %3182 = vrot.lane.b32.xlu1 %v6307_v61, %s5150_s26  ;;  %2992 = vrot.lane.b32.xlu0 %v6310_v51, %s5148_s28  ;;  %v3656_v58 = vmul.f32 %v7029_v25, %v3624_v56  ;;  %v3528_v15 = vsel %vm1010_vm3, %v3496_v38, %v7771_v27  ;;  %v3464_v45 = vsel %vm3454_vm5, %v3431_v40, %v7772_v12  ;;  %v3690_v18 = vsel %vm907_vm2, %v3655_v30, 0.0  ;;  %v7780_v8 = vld [vmem:[#allocation73_spill] sm:$0xff]  ;;  %v7781_v38 = vld [vmem:[#allocation71_spill] sm:$0xff] }
 0xf9c   : > { %v3593_v14 = vsel %vm3585_vm8, %v3560_v3, %v6765_v57  ;;  %v3561_v20 = vsel %vm3552_vm7, %v3528_v15, %v7773_v48  ;;  %v3497_v25 = vsel %vm3487_vm6, %v3464_v45, %v6773_v31  ;;  %v3657_v9 = vmul.f32 %v3625_v32, %v2589_v10  ;;  %v7776_v57 = vld [vmem:[#allocation28_spill] sm:$0xff]  ;;  %v2599_v23 = vpop.f32.mrf.mxu0  ;;  %v7782_v46 = vld [vmem:[#allocation77_spill] sm:$0xff] }
 0xf9d   : > { %v7089_v4 = vpop.permute.xlu1 %3166  ;;  %v7098_v41 = vpop.permute.xlu0 %2976  ;;  %v3626_v19 = vsel %vm3618_vm9, %v3593_v14, %v7774_v17  ;;  %v3432_v63 = vsel %vm2072_vm4, %v7776_v57, %v7775_v55  ;;  %v3594_v30 = vsel %vm3585_vm8, %v3561_v20, %v7777_v39  ;;  %v3529_v13 = vsel %vm1010_vm3, %v3497_v25, %v7778_v43  ;;  %v7786_v45 = vld [vmem:[#allocation81_spill] sm:$0xff]  ;;  %v7789_v57 = vld [vmem:[#allocation75_spill] sm:$0xff]  ;;  %v7791_v43 = vld [vmem:[#allocation30_spill] sm:$0xff] }
 0xf9e   : > { %v3689_v31 = vadd.f32 %v3688_v50, %v3687_v47  ;;  %v3465_v2 = vsel %vm3454_vm5, %v3432_v63, %v7779_v1  ;;  %v3562_v10 = vsel %vm3552_vm7, %v3529_v13, %v6805_v42  ;;  %v3627_v54 = vsel %vm3618_vm9, %v3594_v30, %v7780_v8  ;;  %v4649_v50 = vpop.f32.mrf.mxu0  ;;  %v7783_v42 = vld [vmem:[#allocation74_spill] sm:$0xff]  ;;  %v7788_v20 = vld [vmem:[#allocation29_spill] sm:$0xff]  ;;  %v7790_v30 = vld [vmem:[#allocation76_spill] sm:$0xff] }
 0xf9f   : > { %2898 = vrot.lane.b32.xlu1 %v6313_v26, %s5146_s22  ;;  %3372 = vrot.lane.b32.xlu0 %v6304_v6, %s5152_s3  ;;  %v3692_v29 = vsel %vm907_vm2, %v3656_v58, 0.0  ;;  %v3658_v16 = vmul.f32 %v4643_v28, %v3626_v19  ;;  %v3498_v35 = vsel %vm3487_vm6, %v3465_v2, %v7781_v38  ;;  %v3595_v47 = vsel %vm3585_vm8, %v3562_v10, %v7782_v46  ;;  %v7785_v58 = vld [vmem:[#allocation78_spill] sm:$0xff]  ;;  %v7792_v13 = vld [vmem:[#allocation79_spill] sm:$0xff]  ;;  %v7793_v1 = vld [vmem:[#allocation80_spill] sm:$0xff] }
 0xfa0   : > { %v3691_v40 = vadd.f32 %v3690_v18, %v3689_v31  ;;  %v3530_v44 = vsel %vm1010_vm3, %v3498_v35, %v7783_v42  ;;  %v3628_v3 = vsel %vm3618_vm9, %v3595_v47, %v6837_v7  ;;  %v3694_v28 = vsel %vm907_vm2, %v3657_v9, 0.0  ;;  %v7787_v7 = vld [vmem:[#allocation72_spill] sm:$0xff]  ;;  %v2609_v19 = vpop.f32.mrf.mxu0  ;;  %v7794_v10 = vld [vmem:[#allocation82_spill] sm:$0xff]  ;;  %v7795_v38 = vld [vmem:[#allocation83_spill] sm:$0xff] }
 0xfa1   : > { %v7126_v33 = vpop.permute.xlu1 %2882  ;;  %v7137_v11 = vpop.permute.xlu0 %3356  ;;  %v3659_v32 = vmul.f32 %v3627_v54, %v2599_v23  ;;  %v3563_v27 = vsel %vm3552_vm7, %v3530_v44, %v7785_v58  ;;  %v3696_v48 = vsel %vm907_vm2, %v3658_v16, 0.0  ;;  %v3433_v25 = vsel %vm2072_vm4, %v7788_v20, %v7787_v7  ;;  %v7796_v46 = vld [vmem:[#allocation85_spill] sm:$0xff]  ;;  %v7797_v44 = vld [vmem:[#allocation86_spill] sm:$0xff]  ;;  %v7799_v58 = vld [vmem:[#allocation84_spill] sm:$0xff] }
 0xfa2   : > { %v3693_v12 = vadd.f32 %v3692_v29, %v3691_v40  ;;  %v3596_v14 = vsel %vm3585_vm8, %v3563_v27, %v7786_v45  ;;  %v3660_v17 = vmul.f32 %v4646_v59, %v3628_v3  ;;  %v3466_v63 = vsel %vm3454_vm5, %v3433_v25, %v7789_v57  ;;  %v4652_v40 = vpop.f32.mrf.mxu0  ;;  %v7800_v27 = vld [vmem:[#allocation31_spill] sm:$0xff]  ;;  %v7801_v45 = vld [vmem:[#allocation90_spill] sm:$0xff] }
 0xfa3   : > { %3278 = vrot.lane.b32.xlu1 %v6307_v61, %s5151_s13  ;;  %3088 = vrot.lane.b32.xlu0 %v6310_v51, %s5149_s19  ;;  %v3629_v9 = vsel %vm3618_vm9, %v3596_v14, %v6859_v49  ;;  %v3698_v39 = vsel %vm907_vm2, %v3659_v32, 0.0  ;;  %v3434_v59 = vsel %vm2072_vm4, %v7791_v43, %v7790_v30  ;;  %v3499_v23 = vsel %vm3487_vm6, %v3466_v63, %v7792_v13  ;;  %v7804_v63 = vld [vmem:[#allocation88_spill] sm:$0xff]  ;;  %v7806_v43 = vld [vmem:[#allocation91_spill] sm:$0xff] }
 0xfa4   : > { %v3695_v55 = vadd.f32 %v3694_v28, %v3693_v12  ;;  %v3467_v2 = vsel %vm3454_vm5, %v3434_v59, %v7793_v1  ;;  %v3531_v8 = vsel %vm1010_vm3, %v3499_v23, %v7794_v10  ;;  %v3661_v54 = vmul.f32 %v3629_v9, %v2609_v19  ;;  %v7798_v28 = vld [vmem:[#allocation89_spill] sm:$0xff]  ;;  %v2619_v13 = vpop.f32.mrf.mxu0  ;;  %v7809_v1 = vld [vmem:[#allocation92_spill] sm:$0xff] }
 0xfa5   : > { %v7164_v56 = vpop.permute.xlu1 %3262  ;;  %v7172_v37 = vpop.permute.xlu0 %3072  ;;  %v3700_v16 = vsel %vm907_vm2, %v3660_v17, 0.0  ;;  %v3500_v35 = vsel %vm3487_vm6, %v3467_v2, %v7795_v38  ;;  %v3564_v47 = vsel %vm3552_vm7, %v3531_v8, %v7796_v46  ;;  %v3435_v12 = vsel %vm2072_vm4, %v7800_v27, %v7799_v58  ;;  %v7802_v17 = vld [vmem:[#allocation87_spill] sm:$0xff]  ;;  %v7803_v9 = vld [vmem:[#allocation93_spill] sm:$0xff]  ;;  %v7810_v8 = vld [vmem:[#allocation94_spill] sm:$0xff] }
 0xfa6   : > { %v3697_v31 = vadd.f32 %v3696_v48, %v3695_v55  ;;  %v3532_v3 = vsel %vm1010_vm3, %v3500_v35, %v7797_v44  ;;  %v3597_v32 = vsel %vm3585_vm8, %v3564_v47, %v7798_v28  ;;  %v3702_v25 = vsel %vm907_vm2, %v3661_v54, 0.0  ;;  %v7811_v35 = vld [vmem:[#allocation95_spill] sm:$0xff]  ;;  %v7812_v47 = vld [vmem:[#allocation96_spill] sm:$0xff] }
 0xfa7   : > { %2994 = vrot.lane.b32.xlu1 %v6313_v26, %s5148_s28  ;;  %2804 = vrot.lane.b32.xlu0 %v7784_v62, %s5147_s7  ;;  %v3565_v14 = vsel %vm3552_vm7, %v3532_v3, %v7801_v45  ;;  %v3630_v48 = vsel %vm3618_vm9, %v3597_v32, %v6893_v21  ;;  %v3468_v19 = vsel %vm3454_vm5, %v3435_v12, %v7802_v17  ;;  %v7807_v21 = vld [vmem:[#allocation97_spill] sm:$0xff]  ;;  %v7814_v3 = vld [vmem:[#allocation98_spill] sm:$0xff]  ;;  %v7815_v58 = vld [vmem:[#allocation99_spill] sm:$0xff] }
 0xfa8   : > { %v3699_v42 = vadd.f32 %v3698_v39, %v3697_v31  ;;  %v3598_v55 = vsel %vm3585_vm8, %v3565_v14, %v7803_v9  ;;  %v7805_v39 = vld [vmem:[#allocation32_spill] sm:$0xff]  ;;  %v3501_v59 = vsel %vm3487_vm6, %v3468_v19, %v7806_v43  ;;  %v7808_v31 = vld [vmem:[#allocation41_spill] sm:$0xff]  ;;  %v3662_v10 = vmul.f32 %v4649_v50, %v3630_v48  ;;  %v7816_v12 = vld [vmem:[#allocation102_spill] sm:$0xff]  ;;  %v4655_v14 = vpop.f32.mrf.mxu0 }
 0xfa9   : > { %v7190_v15 = vpop.permute.xlu1 %2978  ;;  %v7194_v18 = vpop.permute.xlu0 %2788  ;;  %v3436_v30 = vsel %vm2072_vm4, %v7805_v39, %v7804_v63  ;;  %v3631_v23 = vsel %vm3618_vm9, %v3598_v55, %v7807_v21  ;;  %v3533_v54 = vsel %vm1010_vm3, %v3501_v59, %v7810_v8  ;;  %v7817_v48 = vld [vmem:[#allocation36_spill] sm:$0xff]  ;;  %v7819_v9 = vld [vmem:[#allocation101_spill] sm:$0xff]  ;;  %v7820_v55 = vld [vmem:[#allocation34_spill] sm:$0xff] }
 0xfaa   : > { %v3701_v20 = vadd.f32 %v3700_v16, %v3699_v42  ;;  %v3469_v2 = vsel %vm3454_vm5, %v3436_v30, %v7809_v1  ;;  %v5153_v16 = vmov 0.0   ;;  %v7813_v42 = vld [vmem:[#allocation33_spill] sm:$0xff]  ;;  %v3566_v50 = vsel %vm3552_vm7, %v3533_v54, %v7814_v3  ;;  %v7818_v17 = vld [vmem:[#allocation100_spill] sm:$0xff]  ;;  %v7821_v59 = vld [vmem:[#allocation103_spill] sm:$0xff] }
 0xfab   : > { %3374 = vrot.lane.b32.xlu1 %v6307_v61, %s5152_s3  ;;  %3184 = vrot.lane.b32.xlu0 %v6310_v51, %s5150_s26  ;;  %v3502_v46 = vsel %vm3487_vm6, %v3469_v2, %v7811_v35  ;;  %v3437_v44 = vsel %vm2072_vm4, %v7813_v42, %v7812_v47  ;;  %v3663_v32 = vmul.f32 %v3631_v23, %v2619_v13  ;;  %v3704_v43 = vsel %vm907_vm2, %v3662_v10, 0.0  ;;  %v7822_v21 = vld [vmem:[#allocation104_spill] sm:$0xff]  ;;  %v7824_v2 = vld [vmem:[#allocation35_spill] sm:$0xff]  ;;  %v7825_v8 = vld [vmem:[#allocation37_spill] sm:$0xff]  ;;  %v2629_v47 = vpop.f32.mrf.mxu0 }
 0xfac   : > { %4680 = vmatprep.subr.mxu1 %v5153_v16  ;;  %v3703_v38 = vadd.f32 %v3702_v25, %v3701_v20  ;;  %v3534_v27 = vsel %vm1010_vm3, %v3502_v46, %v7815_v58  ;;  %v3599_v45 = vsel %vm3585_vm8, %v3566_v50, %v7816_v12  ;;  %v3440_v20 = vsel %vm2072_vm4, %v7817_v48, %v7057_v52  ;;  %v3749_v52 = vld [vmem:[%s7599_s8 + $0x18] sm:$0xff] }
 0xfad   : > { %v7214_v49 = vpop.permute.xlu1 %3358  ;;  %v7220_v29 = vpop.permute.xlu0 %3168  ;;  %v3470_v19 = vsel %vm3454_vm5, %v3437_v44, %v7818_v17  ;;  %v3438_v63 = vsel %vm2072_vm4, %v7820_v55, %v7819_v9  ;;  %v3632_v39 = vsel %vm3618_vm9, %v3599_v45, %v6949_v22  ;;  %v3473_v30 = vsel %vm3454_vm5, %v3440_v20, %v7126_v33  ;;  %4681 = vmatpush3.msra.mxu1 %v3749_v52  ;;  %v7823_v33 = vld [vmem:[#allocation105_spill] sm:$0xff] }
 0xfae   : > { %v3567_v13 = vsel %vm3552_vm7, %v3534_v27, %v7821_v59  ;;  %v3503_v23 = vsel %vm3487_vm6, %v3470_v19, %v7822_v21  ;;  %v3506_v22 = vsel %vm3487_vm6, %v3473_v30, %v7190_v15  ;;  %v3471_v1 = vsel %vm3454_vm5, %v3438_v63, %v7823_v33  ;;  %4682 = vmatprep.subr.mxu1 %v5153_v16  ;;  %v7827_v27 = vld [vmem:[#allocation107_spill] sm:$0xff]  ;;  %v4658_v20 = vpop.f32.mrf.mxu0 }
 0xfaf   : > { %3090 = vrot.lane.b32.xlu1 %v6313_v26, %s5149_s19  ;;  %2900 = vrot.lane.b32.xlu0 %v7784_v62, %s5146_s22  ;;  %v3439_v10 = vsel %vm2072_vm4, %v7824_v2, %v6978_v36  ;;  %v3441_v54 = vsel %vm2072_vm4, %v7825_v8, %v7194_v18  ;;  %v3664_v15 = vmul.f32 %v4652_v40, %v3632_v39  ;;  %v7826_v36 = vld [vmem:[#allocation106_spill] sm:$0xff] }
 0xfb0   : > { %v3472_v42 = vsel %vm3454_vm5, %v3439_v10, %v7038_v5  ;;  %v3600_v58 = vsel %vm3585_vm8, %v3567_v13, %v7826_v36  ;;  %v3535_v18 = vsel %vm1010_vm3, %v3503_v23, %v7827_v27  ;;  %v7828_v5 = vld [vmem:[#allocation108_spill] sm:$0xff]  ;;  %v2639_v52 = vpop.f32.mrf.mxu0  ;;  %4688 = vmatprep.mubr.msk.f32.mxu1 %vm5154_vm10, %v5153_v16 }
 0xfb1   : > { %v3075_v7 = vpop.permute.xlu1 %3074  ;;  %v2885_v57 = vpop.permute.xlu0 %2884  ;;  %v3568_v12 = vsel %vm3552_vm7, %v3535_v18, %v7010_v60  ;;  %v3633_v45 = vsel %vm3618_vm9, %v3600_v58, %v7002_v0  ;;  %v7829_v60 = vld [vmem:[#allocation38_spill] sm:$0xff] }
 0xfb2   : > { %v3538_v35 = vsel %vm1010_vm3, %v3506_v22, %v3075_v7  ;;  %v3474_v44 = vsel %vm3454_vm5, %v3441_v54, %v2885_v57  ;;  %v3505_v7 = vsel %vm3487_vm6, %v3472_v42, %v7098_v41  ;;  %v3504_v57 = vsel %vm3487_vm6, %v3471_v1, %v7828_v5  ;;  %v4661_v33 = vpop.f32.mrf.mxu0  ;;  %v7831_v5 = vld [vmem:[#allocation39_spill] sm:$0xff] }
 0xfb3   : > { %2806 = vrot.lane.b32.xlu1 %v7808_v31, %s5147_s7  ;;  %3280 = vrot.lane.b32.xlu0 %v6310_v51, %s5151_s13  ;;  %v3537_v48 = vsel %vm1010_vm3, %v3505_v7, %v7172_v37  ;;  %v3536_v41 = vsel %vm1010_vm3, %v3504_v57, %v7031_v53  ;;  %v3601_v17 = vsel %vm3585_vm8, %v3568_v12, %v7066_v34  ;;  %v3706_v34 = vsel %vm907_vm2, %v3663_v32, 0.0 }
 0xfb4   : > { %v3570_v19 = vsel %vm3552_vm7, %v3537_v48, %v7220_v29  ;;  %v3569_v37 = vsel %vm3552_vm7, %v3536_v41, %v7089_v4  ;;  %v3634_v55 = vsel %vm3618_vm9, %v3601_v17, %v7137_v11  ;;  %v3665_v30 = vmul.f32 %v3633_v45, %v2629_v47  ;;  %v2649_v47 = vpop.f32.mrf.mxu0  ;;  %v7832_v41 = vld [vmem:[#allocation24_spill] sm:$0xff] }
 0xfb5   : > { %v2791_v28 = vpop.permute.xlu1 %2790  ;;  %v3265_v25 = vpop.permute.xlu0 %3264  ;;  %v3602_v29 = vsel %vm3585_vm8, %v3569_v37, %v7164_v56  ;;  %v3705_v4 = vadd.f32 %v3704_v43, %v3703_v38  ;;  %v3666_v32 = vmul.f32 %v4655_v14, %v3634_v55  ;;  %v7830_v43 = vld [vmem:[#allocation42_spill] sm:$0xff] }
 0xfb6   : > { %v3442_v9 = vsel %vm2072_vm4, %v7829_v60, %v2791_v28  ;;  %v3603_v63 = vsel %vm3585_vm8, %v3570_v19, %v3265_v25  ;;  %v3635_v11 = vsel %vm3618_vm9, %v3602_v29, %v7214_v49  ;;  %v3708_v25 = vsel %vm907_vm2, %v3664_v15, 0.0 }
 0xfb7   : > { %3186 = vrot.lane.b32.xlu1 %v6313_v26, %s5150_s26  ;;  %2996 = vrot.lane.b32.xlu0 %v7784_v62, %s5148_s28  ;;  %v3707_v13 = vadd.f32 %v3706_v34, %v3705_v4  ;;  %v3710_v23 = vsel %vm907_vm2, %v3665_v30, 0.0  ;;  %v3667_v22 = vmul.f32 %v3635_v11, %v2639_v52  ;;  %v3712_v14 = vsel %vm907_vm2, %v3666_v32, 0.0  ;;  %v3747_v30 = vld [vmem:[%s7599_s8 + $0x8] sm:$0xff] }
 0xfb9   : > { %v3171_v46 = vpop.permute.xlu1 %3170  ;;  %v2981_v50 = vpop.permute.xlu0 %2980  ;;  %v3709_v49 = vadd.f32 %v3708_v25, %v3707_v13 }
 0xfba   : > { %v3571_v3 = vsel %vm3552_vm7, %v3538_v35, %v3171_v46  ;;  %v3507_v40 = vsel %vm3487_vm6, %v3474_v44, %v2981_v50  ;;  %v3748_v35 = vld [vmem:[%s7599_s8 + $0x10] sm:$0xff]  ;;  %v3714_v46 = vsel %vm907_vm2, %v3667_v22, 0.0  ;;  %v4664_v13 = vpop.f32.mrf.mxu0 }
 0xfbb   : > { %2902 = vrot.lane.b32.xlu1 %v7808_v31, %s5146_s22  ;;  %3376 = vrot.lane.b32.xlu0 %v6310_v51, %s5152_s3  ;;  %v3711_v10 = vadd.f32 %v3710_v23, %v3709_v49 }
 0xfbc   : > { %4683 = vmatpush3.msra.mxu1 %v3748_v35  ;;  %v2659_v22 = vpop.f32.mrf.mxu0 }
 0xfbd   : > { %v2887_v0 = vpop.permute.xlu1 %2886  ;;  %v3361_v39 = vpop.permute.xlu0 %3360  ;;  %v3713_v15 = vadd.f32 %v3712_v14, %v3711_v10  ;;  %4684 = vmatprep.subr.mxu1 %v5153_v16 }
 0xfbe   : > { %v3475_v53 = vsel %vm3454_vm5, %v3442_v9, %v2887_v0  ;;  %v3636_v28 = vsel %vm3618_vm9, %v3603_v63, %v3361_v39  ;;  %4685 = vmatpush3.msra.mxu1 %v3747_v30 }
 0xfbf   : > { %3282 = vrot.lane.b32.xlu1 %v6313_v26, %s5151_s13  ;;  %3092 = vrot.lane.b32.xlu0 %v7784_v62, %s5149_s19  ;;  %v3668_v1 = vmul.f32 %v4658_v20, %v3636_v28 }
 0xfc0   : > { %4686 = vmatprep.subr.mxu1 %v5153_v16 }
 0xfc1   : > { %v3267_v59 = vpop.permute.xlu1 %3266  ;;  %v3077_v21 = vpop.permute.xlu0 %3076  ;;  %v3716_v42 = vsel %vm907_vm2, %v3668_v1, 0.0 }
 0xfc2   : > { %v3604_v56 = vsel %vm3585_vm8, %v3571_v3, %v3267_v59  ;;  %v3539_v38 = vsel %vm1010_vm3, %v3507_v40, %v3077_v21  ;;  %v3715_v3 = vadd.f32 %v3714_v46, %v3713_v15  ;;  %v7833_v59 = vld [vmem:[#allocation43_spill] sm:$0xff] }
 0xfc3   : > { %2998 = vrot.lane.b32.xlu1 %v7808_v31, %s5148_s28  ;;  %2808 = vrot.lane.b32.xlu0 %v7830_v43, %s5147_s7 }
 0xfc4   : > { %v3717_v18 = vadd.f32 %v3716_v42, %v3715_v3 }
 0xfc5   : > { %v2983_v2 = vpop.permute.xlu1 %2982  ;;  %v2793_v8 = vpop.permute.xlu0 %2792 }
 0xfc6   : > { %v3508_v54 = vsel %vm3487_vm6, %v3475_v53, %v2983_v2  ;;  %v3443_v57 = vsel %vm2072_vm4, %v7831_v5, %v2793_v8  ;;  %v3746_v2 = vld [vmem:[%s7599_s8] sm:$0xff] }
 0xfc7   : > { %3378 = vrot.lane.b32.xlu1 %v6313_v26, %s5152_s3  ;;  %3188 = vrot.lane.b32.xlu0 %v7784_v62, %s5150_s26 }
 0xfc8   : > { %4687 = vmatpush3.msra.mxu1 %v3746_v2 }
 0xfc9   : > { %v3363_v44 = vpop.permute.xlu1 %3362  ;;  %v3173_v50 = vpop.permute.xlu0 %3172 }
 0xfca   : > { %v3637_v36 = vsel %vm3618_vm9, %v3604_v56, %v3363_v44  ;;  %v3572_v58 = vsel %vm3552_vm7, %v3539_v38, %v3173_v50 }
 0xfcb   : > { %v3669_v27 = vmul.f32 %v3637_v36, %v2649_v47  ;;  %3094 = vrot.lane.b32.xlu1 %v7808_v31, %s5149_s19  ;;  %2904 = vrot.lane.b32.xlu0 %v7830_v43, %s5146_s22 }
 0xfcd   : > { %v3718_v7 = vsel %vm907_vm2, %v3669_v27, 0.0  ;;  %v3079_v40 = vpop.permute.xlu1 %3078  ;;  %v2889_v48 = vpop.permute.xlu0 %2888 }
 0xfce   : > { %v3719_v12 = vadd.f32 %v3718_v7, %v3717_v18  ;;  %v3540_v45 = vsel %vm1010_vm3, %v3508_v54, %v3079_v40  ;;  %v3476_v20 = vsel %vm3454_vm5, %v3443_v57, %v2889_v48 }
 0xfcf   : > { %2810 = vrot.lane.b32.xlu1 %v7832_v41, %s5147_s7  ;;  %3284 = vrot.lane.b32.xlu0 %v7784_v62, %s5151_s13 }
 0xfd1   : > { %v2795_v17 = vpop.permute.xlu1 %2794  ;;  %v3269_v19 = vpop.permute.xlu0 %3268 }
 0xfd2   : > { %v3605_v60 = vsel %vm3585_vm8, %v3572_v58, %v3269_v19  ;;  %v3444_v63 = vsel %vm2072_vm4, %v6289_v24, %v2795_v17  ;;  %v4667_v17 = vpop.f32.mrf.mxu0 }
 0xfd3   : > { %3190 = vrot.lane.b32.xlu1 %v7808_v31, %s5150_s26  ;;  %3000 = vrot.lane.b32.xlu0 %v7830_v43, %s5148_s28 }
 0xfd5   : > { %v3175_v9 = vpop.permute.xlu1 %3174  ;;  %v2985_v37 = vpop.permute.xlu0 %2984 }
 0xfd6   : > { %v3573_v0 = vsel %vm3552_vm7, %v3540_v45, %v3175_v9  ;;  %v3509_v55 = vsel %vm3487_vm6, %v3476_v20, %v2985_v37 }
 0xfd7   : > { %2906 = vrot.lane.b32.xlu1 %v7832_v41, %s5146_s22  ;;  %3380 = vrot.lane.b32.xlu0 %v7784_v62, %s5152_s3 }
 0xfd9   : > { %v2891_v53 = vpop.permute.xlu1 %2890  ;;  %v3365_v34 = vpop.permute.xlu0 %3364 }
 0xfda   : > { %v3477_v39 = vsel %vm3454_vm5, %v3444_v63, %v2891_v53  ;;  %v3638_v29 = vsel %vm3618_vm9, %v3605_v60, %v3365_v34 }
 0xfdb   : > { %3286 = vrot.lane.b32.xlu1 %v7808_v31, %s5151_s13  ;;  %v3670_v28 = vmul.f32 %v4661_v33, %v3638_v29  ;;  %3096 = vrot.lane.b32.xlu0 %v7830_v43, %s5149_s19 }
 0xfdd   : > { %v3271_v24 = vpop.permute.xlu1 %3270  ;;  %v3720_v4 = vsel %vm907_vm2, %v3670_v28, 0.0  ;;  %v3081_v11 = vpop.permute.xlu0 %3080 }
 0xfde   : > { %v3606_v52 = vsel %vm3585_vm8, %v3573_v0, %v3271_v24  ;;  %v3541_v25 = vsel %vm1010_vm3, %v3509_v55, %v3081_v11  ;;  %v3721_v32 = vadd.f32 %v3720_v4, %v3719_v12  ;;  %v2669_v0 = vpop.f32.mrf.mxu0 }
 0xfdf   : > { %3002 = vrot.lane.b32.xlu1 %v7832_v41, %s5148_s28  ;;  %2812 = vrot.lane.b32.xlu0 %v7833_v59, %s5147_s7  ;;  %s4231_s7 = sshll.u32 %s5237_s21, 7  ;;  %s5039_s21 = scalar_lea.vmem %s5038_s23, 256 }
 0xfe1   : > { %v2987_v56 = vpop.permute.xlu1 %2986  ;;  %v2797_v21 = vpop.permute.xlu0 %2796 }
 0xfe2   : > { %v3510_v23 = vsel %vm3487_vm6, %v3477_v39, %v2987_v56  ;;  %v3445_v54 = vsel %vm2072_vm4, %v6304_v6, %v2797_v21 }
 0xfe3   : > { %3382 = vrot.lane.b32.xlu1 %v7808_v31, %s5152_s3  ;;  %3192 = vrot.lane.b32.xlu0 %v7830_v43, %s5150_s26 }
 0xfe5   : > { %v3367_v38 = vpop.permute.xlu1 %3366  ;;  %v3177_v49 = vpop.permute.xlu0 %3176 }
 0xfe6   : > { %v3639_v33 = vsel %vm3618_vm9, %v3606_v52, %v3367_v38  ;;  %v3574_v14 = vsel %vm3552_vm7, %v3541_v25, %v3177_v49 }
 0xfe7   : > { %v3671_v1 = vmul.f32 %v3639_v33, %v2659_v22  ;;  %3098 = vrot.lane.b32.xlu1 %v7832_v41, %s5149_s19  ;;  %2908 = vrot.lane.b32.xlu0 %v7833_v59, %s5146_s22 }
 0xfe9   : > { %v3722_v10 = vsel %vm907_vm2, %v3671_v1, 0.0  ;;  %v3083_v8 = vpop.permute.xlu1 %3082  ;;  %v2893_v15 = vpop.permute.xlu0 %2892 }
 0xfea   : > { %v3723_v35 = vadd.f32 %v3722_v10, %v3721_v32  ;;  %v3542_v46 = vsel %vm1010_vm3, %v3510_v23, %v3083_v8  ;;  %v3478_v47 = vsel %vm3454_vm5, %v3445_v54, %v2893_v15 }
 0xfeb   : > { %3004 = vrot.lane.b32.xlu1 %v7833_v59, %s5148_s28  ;;  %3288 = vrot.lane.b32.xlu0 %v7830_v43, %s5151_s13  ;;  %s3861_s28 = sshll.u32 %s5562_s17, 4  ;;  %s3862_s28 = int_to_ptr.vmem [resolvable:$true] %s3861_s28 }
 0xfec   : > { %s5033_s25 = scalar_lea.vmem %s3862_s28, 128  ;;  %p5040_p1 = scmp.lt.s32.totalorder %s3862_s28, %s5038_s23 }
 0xfed   : > { %v2799_v42 = vpop.permute.xlu1 %2798  ;;  %v3273_v44 = vpop.permute.xlu0 %3272  ;;  %p5034_p3 = scmp.ne.s32.totalorder %s3862_s28, %s5033_s25  ;;  %p5041_p4 = scmp.lt.s32.totalorder %s5039_s21, %s5033_s25 }
 0xfee   : > { %v3607_v3 = vsel %vm3585_vm8, %v3574_v14, %v3273_v44  ;;  %v3446_v27 = vsel %vm2072_vm4, %v6307_v61, %v2799_v42 }
 0xfef   : > { %3384 = vrot.lane.b32.xlu1 %v7830_v43, %s5152_s3  ;;  %3194 = vrot.lane.b32.xlu0 %v7832_v41, %s5150_s26  ;;  %p5035_p9 = pnand %p5034_p3, %p7834_p11  ;;  %p5042_p5 = por %p5041_p4, %p5040_p1 }
 0xff1   : > { %v3179_v6 = vpop.permute.xlu1 %3178  ;;  %v2989_v36 = vpop.permute.xlu0 %2988  ;;  %p5036_p13 = pneg %p5035_p9 }
 0xff2   : > { %v3575_v50 = vsel %vm3552_vm7, %v3542_v46, %v3179_v6  ;;  %v3511_v58 = vsel %vm3487_vm6, %v3478_v47, %v2989_v36  ;;  %v4670_v46 = vpop.f32.mrf.mxu0 }
 0xff3   : > { %3290 = vrot.lane.b32.xlu1 %v7832_v41, %s5151_s13  ;;  %3100 = vrot.lane.b32.xlu0 %v7833_v59, %s5149_s19  ;;  %p5043_p7 = pnand %p5042_p5, %p5036_p13 }
 0xff4   : > { %v2679_v42 = vpop.f32.mrf.mxu0 }
 0xff5   : > { %v2895_v18 = vpop.permute.xlu1 %2894  ;;  %v3369_v40 = vpop.permute.xlu0 %3368 }
 0xff6   : > { %v3479_v7 = vsel %vm3454_vm5, %v3446_v27, %v2895_v18  ;;  %v3640_v5 = vsel %vm3618_vm9, %v3607_v3, %v3369_v40 }
 0xff7   : > { %3386 = vrot.lane.b32.xlu1 %v7832_v41, %s5152_s3  ;;  %v3672_v57 = vmul.f32 %v4664_v13, %v3640_v5  ;;  %3196 = vrot.lane.b32.xlu0 %v7833_v59, %s5150_s26 }
 0xff9   : > { %v3275_v12 = vpop.permute.xlu1 %3274  ;;  %v3724_v45 = vsel %vm907_vm2, %v3672_v57, 0.0  ;;  %v3085_v48 = vpop.permute.xlu0 %3084 }
 0xffa   : > { %v3608_v61 = vsel %vm3585_vm8, %v3575_v50, %v3275_v12  ;;  %v3543_v16 = vsel %vm1010_vm3, %v3511_v58, %v3085_v48  ;;  %v3725_v20 = vadd.f32 %v3724_v45, %v3723_v35 }
 0xffb   : > { %3388 = vrot.lane.b32.xlu1 %v7833_v59, %s5152_s3  ;;  %3292 = vrot.lane.b32.xlu0 %v7833_v59, %s5151_s13  ;;  %s3859_s13 = scalar_lea.hbm %s7601_s10, %s4231_s7  ;;  %s3843_s3 = scalar_lea.sflag [#allocation7], %s5394_s0 }
 0xffd   : > { %v2991_v19 = vpop.permute.xlu1 %2990  ;;  %v2801_v60 = vpop.permute.xlu0 %2800 }
 0xffe   : > { %v3512_v9 = vsel %vm3487_vm6, %v3479_v7, %v2991_v19  ;;  %v3447_v29 = vsel %vm2072_vm4, %v6310_v51, %v2801_v60 }
0x1001   : > { %v3371_v37 = vpop.permute.xlu1 %3370  ;;  %v3181_v55 = vpop.permute.xlu0 %3180 }
0x1002   : > { %v3641_v63 = vsel %vm3618_vm9, %v3608_v61, %v3371_v37  ;;  %v3576_v53 = vsel %vm3552_vm7, %v3543_v16, %v3181_v55  ;;  %v4673_v37 = vpop.f32.mrf.mxu0 }
0x1003   : > { %v3673_v39 = vmul.f32 %v3641_v63, %v2669_v0 }
0x1005   : > { %v3726_v34 = vsel %vm907_vm2, %v3673_v39, 0.0  ;;  %v3087_v30 = vpop.permute.xlu1 %3086  ;;  %v2897_v4 = vpop.permute.xlu0 %2896 }
0x1006   : > { %v3727_v28 = vadd.f32 %v3726_v34, %v3725_v20  ;;  %v3544_v24 = vsel %vm1010_vm3, %v3512_v9, %v3087_v30  ;;  %v3480_v52 = vsel %vm3454_vm5, %v3447_v29, %v2897_v4  ;;  %v2689_v34 = vpop.f32.mrf.mxu0 }
0x1009   : > { %v2803_v11 = vpop.permute.xlu1 %2802  ;;  %v3277_v25 = vpop.permute.xlu0 %3276 }
0x100a   : > { %v3609_v32 = vsel %vm3585_vm8, %v3576_v53, %v3277_v25  ;;  %v3448_v22 = vsel %vm2072_vm4, %v6313_v26, %v2803_v11 }
0x100d   : > { %v3183_v13 = vpop.permute.xlu1 %3182  ;;  %v2993_v21 = vpop.permute.xlu0 %2992 }
0x100e   : > { %v3577_v56 = vsel %vm3552_vm7, %v3544_v24, %v3183_v13  ;;  %v3513_v23 = vsel %vm3487_vm6, %v3480_v52, %v2993_v21 }
0x1011   : > { %v2899_v51 = vpop.permute.xlu1 %2898  ;;  %v3373_v49 = vpop.permute.xlu0 %3372 }
0x1012   : > { %v3481_v38 = vsel %vm3454_vm5, %v3448_v22, %v2899_v51  ;;  %v3642_v33 = vsel %vm3618_vm9, %v3609_v32, %v3373_v49 }
0x1013   : > { %v3674_v14 = vmul.f32 %v4667_v17, %v3642_v33 }
0x1015   : > { %v3279_v1 = vpop.permute.xlu1 %3278  ;;  %v3728_v2 = vsel %vm907_vm2, %v3674_v14, 0.0  ;;  %v3089_v8 = vpop.permute.xlu0 %3088 }
0x1016   : > { %v3610_v10 = vsel %vm3585_vm8, %v3577_v56, %v3279_v1  ;;  %v3545_v54 = vsel %vm1010_vm3, %v3513_v23, %v3089_v8  ;;  %v3729_v35 = vadd.f32 %v3728_v2, %v3727_v28 }
0x1019   : > { %v2995_v15 = vpop.permute.xlu1 %2994  ;;  %v2805_v47 = vpop.permute.xlu0 %2804 }
0x101a   : > { %v3514_v26 = vsel %vm3487_vm6, %v3481_v38, %v2995_v15  ;;  %v3449_v18 = vsel %vm2072_vm4, %v7784_v62, %v2805_v47 }
0x101d   : > { %v3375_v44 = vpop.permute.xlu1 %3374  ;;  %v3185_v3 = vpop.permute.xlu0 %3184 }
0x101e   : > { %v3643_v6 = vsel %vm3618_vm9, %v3610_v10, %v3375_v44  ;;  %v3578_v50 = vsel %vm3552_vm7, %v3545_v54, %v3185_v3 }
0x101f   : > { %v3675_v36 = vmul.f32 %v3643_v6, %v2679_v42 }
0x1021   : > { %v3730_v58 = vsel %vm907_vm2, %v3675_v36, 0.0  ;;  %v3091_v27 = vpop.permute.xlu1 %3090  ;;  %v2901_v40 = vpop.permute.xlu0 %2900 }
0x1022   : > { %v3731_v7 = vadd.f32 %v3730_v58, %v3729_v35  ;;  %v3482_v5 = vsel %vm3454_vm5, %v3449_v18, %v2901_v40  ;;  %v3546_v53 = vsel %vm1010_vm3, %v3514_v26, %v3091_v27 }
0x1025   : > { %v2807_v57 = vpop.permute.xlu1 %2806  ;;  %v3281_v12 = vpop.permute.xlu0 %3280 }
0x1026   : > { %v3611_v16 = vsel %vm3585_vm8, %v3578_v50, %v3281_v12  ;;  %v3450_v6 = vsel %vm2072_vm4, %v7808_v31, %v2807_v57  ;;  %v4676_v50 = vpop.f32.mrf.mxu0 }
0x1029   : > { %v3187_v45 = vpop.permute.xlu1 %3186  ;;  %v2997_v61 = vpop.permute.xlu0 %2996 }
0x102a   : > { %v3579_v39 = vsel %vm3552_vm7, %v3546_v53, %v3187_v45  ;;  %v3515_v22 = vsel %vm3487_vm6, %v3482_v5, %v2997_v61  ;;  %v2699_v61 = vpop.f32.mrf.mxu0 }
0x102d   : > { %v2903_v48 = vpop.permute.xlu1 %2902  ;;  %v3377_v20 = vpop.permute.xlu0 %3376 }
0x102e   : > { %v3644_v17 = vsel %vm3618_vm9, %v3611_v16, %v3377_v20  ;;  %v3483_v58 = vsel %vm3454_vm5, %v3450_v6, %v2903_v48 }
0x102f   : > { %v3676_v19 = vmul.f32 %v4670_v46, %v3644_v17  ;;  %v4679_v17 = vpop.f32.mrf.mxu0 }
0x1031   : > { %v3283_v60 = vpop.permute.xlu1 %3282  ;;  %v3732_v9 = vsel %vm907_vm2, %v3676_v19, 0.0  ;;  %v3093_v0 = vpop.permute.xlu0 %3092 }
0x1032   : > { %v3733_v62 = vadd.f32 %v3732_v9, %v3731_v7  ;;  %v3612_v30 = vsel %vm3585_vm8, %v3579_v39, %v3283_v60  ;;  %v3547_v51 = vsel %vm1010_vm3, %v3515_v22, %v3093_v0  ;;  %v2709_v53 = vpop.f32.mrf.mxu0 }
0x1035   : > { %v2999_v55 = vpop.permute.xlu1 %2998  ;;  %v2809_v63 = vpop.permute.xlu0 %2808 }
0x1036   : > { %v3451_v27 = vsel %vm2072_vm4, %v7830_v43, %v2809_v63  ;;  %v3516_v18 = vsel %vm3487_vm6, %v3483_v58, %v2999_v55 }
0x1039   : > { %v3379_v29 = vpop.permute.xlu1 %3378  ;;  %v3189_v28 = vpop.permute.xlu0 %3188 }
0x103a   : > { %v3645_v24 = vsel %vm3618_vm9, %v3612_v30, %v3379_v29  ;;  %v3580_v38 = vsel %vm3552_vm7, %v3547_v51, %v3189_v28 }
0x103b   : > { %v3677_v4 = vmul.f32 %v3645_v24, %v2689_v34 }
0x103d   : > { %v3734_v52 = vsel %vm907_vm2, %v3677_v4, 0.0  ;;  %v3095_v11 = vpop.permute.xlu1 %3094  ;;  %v2905_v32 = vpop.permute.xlu0 %2904 }
0x103e   : > { %v3735_v25 = vadd.f32 %v3734_v52, %v3733_v62  ;;  %v3548_v7 = vsel %vm1010_vm3, %v3516_v18, %v3095_v11  ;;  %v3484_v40 = vsel %vm3454_vm5, %v3451_v27, %v2905_v32 }
0x1041   : > { %v2811_v13 = vpop.permute.xlu1 %2810  ;;  %v3285_v56 = vpop.permute.xlu0 %3284 }
0x1042   : > { %v3613_v33 = vsel %vm3585_vm8, %v3580_v38, %v3285_v56  ;;  %v3452_v43 = vsel %vm2072_vm4, %v7832_v41, %v2811_v13 }
0x1045   : > { %v3191_v21 = vpop.permute.xlu1 %3190  ;;  %v3001_v23 = vpop.permute.xlu0 %3000 }
0x1046   : > { %v3581_v12 = vsel %vm3552_vm7, %v3548_v7, %v3191_v21  ;;  %v3517_v45 = vsel %vm3487_vm6, %v3484_v40, %v3001_v23 }
0x1049   : > { %v2907_v49 = vpop.permute.xlu1 %2906  ;;  %v3381_v14 = vpop.permute.xlu0 %3380 }
0x104a   : > { %v3646_v1 = vsel %vm3618_vm9, %v3613_v33, %v3381_v14  ;;  %v3485_v19 = vsel %vm3454_vm5, %v3452_v43, %v2907_v49 }
0x104b   : > { %v3678_v2 = vmul.f32 %v4673_v37, %v3646_v1 }
0x104d   : > { %v3287_v10 = vpop.permute.xlu1 %3286  ;;  %v3736_v8 = vsel %vm907_vm2, %v3678_v2, 0.0  ;;  %v3097_v54 = vpop.permute.xlu0 %3096 }
0x104e   : > { %v3737_v35 = vadd.f32 %v3736_v8, %v3735_v25  ;;  %v3614_v57 = vsel %vm3585_vm8, %v3581_v12, %v3287_v10  ;;  %v3549_v48 = vsel %vm1010_vm3, %v3517_v45, %v3097_v54  ;;  %v4228_v10 = vld [vmem:[%s7600_s9] ss:$0 sm:$0xff] }
0x1051   : > { %v3003_v46 = vpop.permute.xlu1 %3002  ;;  %v2813_v15 = vpop.permute.xlu0 %2812 }
0x1052   : > { %v3518_v0 = vsel %vm3487_vm6, %v3485_v19, %v3003_v46  ;;  %v3453_v29 = vsel %vm2072_vm4, %v7833_v59, %v2813_v15 }
0x1055   : > { %v3383_v47 = vpop.permute.xlu1 %3382  ;;  %v3193_v26 = vpop.permute.xlu0 %3192 }
0x1056   : > { %v3582_v16 = vsel %vm3552_vm7, %v3549_v48, %v3193_v26  ;;  %v3647_v20 = vsel %vm3618_vm9, %v3614_v57, %v3383_v47 }
0x1057   : > { %v3679_v55 = vmul.f32 %v3647_v20, %v2699_v61 }
0x1059   : > { %v3099_v42 = vpop.permute.xlu1 %3098  ;;  %v2909_v44 = vpop.permute.xlu0 %2908  ;;  %v3738_v4 = vsel %vm907_vm2, %v3679_v55, 0.0 }
0x105a   : > { %v3550_v63 = vsel %vm1010_vm3, %v3518_v0, %v3099_v42  ;;  %v3486_v52 = vsel %vm3454_vm5, %v3453_v29, %v2909_v44  ;;  %v3739_v21 = vadd.f32 %v3738_v4, %v3737_v35 }
0x105d   : > { %v3005_v3 = vpop.permute.xlu1 %3004  ;;  %v3289_v36 = vpop.permute.xlu0 %3288 }
0x105e   : > { %v3615_v60 = vsel %vm3585_vm8, %v3582_v16, %v3289_v36  ;;  %v3519_v25 = vsel %vm3487_vm6, %v3486_v52, %v3005_v3 }
0x1061   : > { %v3385_v5 = vpop.permute.xlu1 %3384  ;;  %v3195_v31 = vpop.permute.xlu0 %3194 }
0x1062   : > { %v3648_v62 = vsel %vm3618_vm9, %v3615_v60, %v3385_v5  ;;  %v3583_v41 = vsel %vm3552_vm7, %v3550_v63, %v3195_v31 }
0x1063   : > { %v3680_v39 = vmul.f32 %v4676_v50, %v3648_v62 }
0x1065   : > { %v3291_v9 = vpop.permute.xlu1 %3290  ;;  %v3101_v37 = vpop.permute.xlu0 %3100  ;;  %v3740_v32 = vsel %vm907_vm2, %v3680_v39, 0.0 }
0x1066   : > { %v3616_v34 = vsel %vm3585_vm8, %v3583_v41, %v3291_v9  ;;  %v3551_v13 = vsel %vm1010_vm3, %v3519_v25, %v3101_v37  ;;  %v3741_v38 = vadd.f32 %v3740_v32, %v3739_v21 }
0x1069   : > { %v3387_v30 = vpop.permute.xlu1 %3386  ;;  %v3197_v28 = vpop.permute.xlu0 %3196 }
0x106a   : > { %v3649_v24 = vsel %vm3618_vm9, %v3616_v34, %v3387_v30  ;;  %v3584_v23 = vsel %vm3552_vm7, %v3551_v13, %v3197_v28 }
0x106b   : > { %v3681_v11 = vmul.f32 %v3649_v24, %v2709_v53 }
0x106d   : > { %v3389_v56 = vpop.permute.xlu1 %3388  ;;  %v3293_v22 = vpop.permute.xlu0 %3292  ;;  %v3742_v59 = vsel %vm907_vm2, %v3681_v11, 0.0 }
0x106e   : > { %v3617_v51 = vsel %vm3585_vm8, %v3584_v23, %v3293_v22  ;;  %v3743_v14 = vadd.f32 %v3742_v59, %v3741_v38 }
0x106f   : > { %v3650_v49 = vsel %vm3618_vm9, %v3617_v51, %v3389_v56 }
0x1070   : > { %v3682_v33 = vmul.f32 %v4679_v17, %v3650_v49 }
0x1072   : > { %v3744_v1 = vsel %vm907_vm2, %v3682_v33, 0.0 }
0x1073   : > { %v3745_v2 = vadd.f32 %v3744_v1, %v3743_v14 }
0x1075   : > { %4689 = vmatmul.mubr.msk.f32.vlgmr.msra.gmra.mxu1 %vm907_vm2, %v3745_v2 }
0x1135   : > { %v3826_v8 = vpop.f32.mrf.mxu1 }
0x1136   : > { %v3827_v54 = vadd.f32 %v4228_v10, %v3826_v8 }
0x1137   : > { %v4690_v35 = vpop.f32.mrf.mxu1 }
0x1138   : > { %v3830_v46 = vsel %vm3454_vm5, %v3827_v54, -inf }
0x1139   : > { %3831 = vmax.xlane.f32.xlu0 %v3830_v46 }
0x11c2   : > { %v3832_v15 = vpop.xlane.xlu0 %3831 }
0x11c3   : > { %v3833_v47 = vsub.f32 %v3827_v54, %v3832_v15 }
0x11c5   : > { %v3834_v26 = vmul.f32 1.442695, %v3833_v47 }
0x11c7   : > { %4921 = vpow2.f32 %v3834_v26 }
0x11d4   : > { %v4922_v42 = vpop.eup %4921 }
0x11d5   : > { %v3836_v44 = vsel %vm3454_vm5, %v4922_v42, 0.0 }
0x11d6   : > { %3837 = vadd.xlane.f32.xlu1 %v3836_v44 }
0x125f   : > { %v3838_v3 = vpop.xlane.xlu1 %3837 }
0x1260   : > { %4923 = vrcp.f32 %v3838_v3 }
0x126d   : > { %v4924_v6 = vpop.eup %4923 }
0x126e   : > { %v3840_v50 = vmul.f32 %v4924_v6, %v4922_v42 }
0x1270   : > { %3841 = vst.msk [vmem:[%s5562_s17] sm:$0xff] %vm3454_vm5, %v3840_v50 }
0x1271   : > { %5046 = shalt.err (!%p5043_p7)
}
0x1272   : > { %s5047_s12 = scalar_lea.hbm %s3859_s13, 128  ;;  %s5051_s14 = scalar_lea.hbm %s7601_s10, 256 }
0x1273   : > { %p5048_p8 = scmp.ne.s32.totalorder %s3859_s13, %s5047_s12  ;;  %p5052_p12 = scmp.lt.s32.totalorder %s3859_s13, %s7601_s10 }
0x1274   : > { %p5053_p0 = scmp.lt.s32.totalorder %s5051_s14, %s5047_s12 }
0x1275   : > { %p5049_p2 = pnand %p5048_p8, %p7834_p11 }
0x1276   : > { %p5054_p10 = por %p5053_p0, %p5052_p12 }
0x1277   : > { %p5050_p6 = pneg %p5049_p2 }
0x1279   : > { %p5055_p3 = pnand %p5054_p10, %p5050_p6 }
0x127b   : > { %5058 = shalt.err (!%p5055_p3)
}
0x127c   : > { %4723 = dma.vmem_to_hbm [thread:$0]  (%p7834_p11), %s3862_s28, 128, %s3859_s13, %s3843_s3  }
0x127d PF: > { %s7835_s30 = sld [smem:[#allocation19_spill]]  ;;  %p7838_p13 = scmp.ge.s32.totalorder %s5121_s20, 2 }
0x127e   : > { %s7836_s16 = sld [smem:[#allocation21_spill]] }
0x1283   : > { %s3876_s22 = sand.u32 1, %s7835_s30  }
0x1284   : > { %p7837_p9 = scmp.ne.s32.totalorder %s7836_s16, 0  ;;  %s3877_s7 = scalar_lea.sflag [#allocation7], %s3876_s22 }
0x1286   : > { %p4740_p1 = pnand %p7838_p13, %p7837_p9 }
0x1288   : > { %p4741_p4 = pneg %p4740_p1 }
0x128a   : > { %5104 = dma.done.wait (%p4741_p4), %s3877_s7, 128  }
0x128b   : > { %5106 = vsyncadd (%p4741_p4), %s3877_s7, 4294967168  ;;  %s7839_s20 = sld [smem:[#allocation22_spill]]  ;;  %s7842_s17 = smov %s5113_s18 }
0x128c   : > { %s7840_s19 = sld [smem:[#allocation20_spill]] }
0x128d   : > { %s7841_s26 = sld [smem:[#allocation23_spill]] }
0x1291   : > { %p29_p5 = scmp.ge.s32.totalorder %s7839_s20, 4  }
0x1292   : > { %s7843_s18 = smov %s7840_s19 }
0x1293   : > { %s7844_s19 = smov %s7841_s26  ;;  %31 = sbr.rel (!%p29_p5) target bundleno = 12 (0xc), region = 168 }
0x1298   :  { %3890 = vsyncpa [#allocation6], 1 }
0x1299   :  { %3892 = vsyncpa [#allocation6 + $0x1], 1 }
0x129a   :  { %3893 = vsyncpa [#allocation9], 1 }
0x129b   :  { %3895 = vsyncpa [#allocation9 + $0x1], 1 }
0x129c   :  { %3896 = vsyncpa [#allocation12], 1 }
0x129d   :  { %3897 = vsyncpa [#allocation7], 1 }
0x129e   :  { %3899 = vsyncpa [#allocation7 + $0x1], 1 }

</bundles_post_ra>
